<compile_context>
chip_gen: v5e
topology: v5e:2x2
jax: 0.10.0
libtpu: 0.0.40
codegen_flags: <defaults>
</compile_context>

<pallas_src>
import functools

import jax
import jax.numpy as jnp
import numpy as np
from jax.experimental import pallas as pl
from jax.experimental.pallas import tpu as pltpu

NEG_SLOPE = 0.01   # nn.LeakyReLU default negative_slope
EPS = 1e-12        # F.normalize default eps
NUM_LAYERS = 3
LANE = 128


def _leaky(v):
    return jnp.where(v >= 0, v, NEG_SLOPE * v)


def _round_up(x, m):
    return ((x + m - 1) // m) * m


def _pad2(x, rows, cols):
    return jnp.pad(x, ((0, rows - x.shape[0]), (0, cols - x.shape[1])))


# ----------------------------- prepass kernel ---------------------------------
# Per row tile (once per layer): Y1 = bf16(x@W1+b1); X_hat = bf16(leaky(x@W2+b2)+id).

def gcn_prepass_kernel(x_ref, id_ref, w1_ref, b1_ref, w2_ref, b2_ref,
                       y1_ref, xhat_ref, *, normalize_x):
    x = x_ref[...]
    if normalize_x:
        # F.normalize(x, dim=-1) fused into layer 0 (row-local, exact per tile).
        xf = x.astype(jnp.float32)
        nrm2 = jnp.sum(xf * xf, axis=-1, keepdims=True)
        xf = xf * jax.lax.rsqrt(jnp.maximum(nrm2, EPS * EPS))
        xb = xf.astype(jnp.bfloat16)
    else:
        xb = x.astype(jnp.bfloat16)        # no-op for bf16 inter-layer inputs

    y1 = jnp.dot(xb, w1_ref[...], preferred_element_type=jnp.float32) + b1_ref[...]
    y1_ref[...] = y1.astype(jnp.bfloat16)

    y2 = jnp.dot(xb, w2_ref[...], preferred_element_type=jnp.float32) + b2_ref[...]
    xhat_ref[...] = (_leaky(y2) + id_ref[...]).astype(jnp.bfloat16)


def gcn_prepass(x_p, id_p, w1, b1, w2, b2, *, tile, normalize_x):
    n_pad, din_pad = x_p.shape
    d_pad = w1.shape[1]
    e_pad = w2.shape[1]
    nt = n_pad // tile
    const = lambda i: (0, 0)
    kernel = functools.partial(gcn_prepass_kernel, normalize_x=normalize_x)
    return pl.pallas_call(
        kernel,
        out_shape=(jax.ShapeDtypeStruct((n_pad, d_pad), jnp.bfloat16),
                   jax.ShapeDtypeStruct((n_pad, e_pad), jnp.bfloat16)),
        grid_spec=pltpu.PrefetchScalarGridSpec(
            num_scalar_prefetch=0,
            grid=(nt,),
            in_specs=[
                pl.BlockSpec((tile, din_pad), lambda i: (i, 0)),   # x
                pl.BlockSpec((tile, e_pad), lambda i: (i, 0)),     # idEmbds (f32)
                pl.BlockSpec(w1.shape, const),                     # W1 (bf16)
                pl.BlockSpec(b1.shape, const),                     # b1 (f32)
                pl.BlockSpec(w2.shape, const),                     # W2 (bf16)
                pl.BlockSpec(b2.shape, const),                     # b2 (f32)
            ],
            out_specs=[pl.BlockSpec((tile, d_pad), lambda i: (i, 0)),
                       pl.BlockSpec((tile, e_pad), lambda i: (i, 0))]),
        compiler_params=pltpu.CompilerParams(
            dimension_semantics=("parallel",)),
    )(x_p, id_p, w1, b1, w2, b2)


# --------------------------- aggregation kernel -------------------------------

def gcn_aggr_kernel(y1_ref, a_ref, xhat_ref, w3h_ref, w3x_ref, b3_ref,
                    o_ref, acc_ref):
    k = pl.program_id(1)                     # reduction (adjacency column) tile

    @pl.when(k == 0)
    def _():
        acc_ref[...] = jnp.zeros_like(acc_ref)

    # acc_i += A_ik @ Y1_k   — bf16 operands, f32 accumulation on the MXU.
    acc_ref[...] += jnp.dot(a_ref[...], y1_ref[...],
                            preferred_element_type=jnp.float32)

    @pl.when(k == pl.num_programs(1) - 1)
    def _():
        h = _leaky(acc_ref[...]).astype(jnp.bfloat16)    # LeakyReLU(A @ linear1(x))
        # fusion ('cat'): Linear3(cat(h, x_hat)) == h @ W3h + x_hat @ W3x + b3
        o = (jnp.dot(h, w3h_ref[...], preferred_element_type=jnp.float32)
             + jnp.dot(xhat_ref[...], w3x_ref[...], preferred_element_type=jnp.float32)
             + b3_ref[...])
        o_ref[...] = _leaky(o).astype(o_ref.dtype)


def gcn_aggregate(y1, a_p, xhat, w3h, w3x, b3, *, ti, tk, out_dtype):
    n_pad, d_pad = y1.shape
    e_pad = xhat.shape[1]
    nti = n_pad // ti
    ntk = n_pad // tk
    out_bytes = jnp.dtype(out_dtype).itemsize
    # VMEM footprint: double-buffered streams + resident weights + f32 scratch,
    # with 2x headroom — stays far below v7x's 64 MiB physical VMEM.
    fp = (2 * ti * tk * 2            # A tiles (bf16, double-buffered)
          + 2 * tk * d_pad * 2       # Y1 tiles
          + 2 * ti * e_pad * 2       # X_hat tiles
          + 2 * ti * e_pad * out_bytes          # output tiles
          + 2 * (d_pad * e_pad + e_pad * e_pad) * 2 + 2 * e_pad * 4  # weights
          + ti * d_pad * 4)          # f32 accumulator scratch
    vmem_limit = int(min(2 * fp + (4 << 20), 48 << 20))
    const = lambda i, k: (0, 0)      # resident weights: DMA'd once
    return pl.pallas_call(
        gcn_aggr_kernel,
        out_shape=jax.ShapeDtypeStruct((n_pad, e_pad), out_dtype),
        grid_spec=pltpu.PrefetchScalarGridSpec(
            num_scalar_prefetch=0,
            grid=(nti, ntk),
            in_specs=[
                pl.BlockSpec((tk, d_pad), lambda i, k: (k, 0)),    # Y1 (bf16)
                pl.BlockSpec((ti, tk), lambda i, k: (i, k)),       # A  (bf16)
                pl.BlockSpec((ti, e_pad), lambda i, k: (i, 0)),    # X_hat (bf16)
                pl.BlockSpec(w3h.shape, const),                    # W3h (bf16)
                pl.BlockSpec(w3x.shape, const),                    # W3x (bf16)
                pl.BlockSpec(b3.shape, const),                     # b3  (f32)
            ],
            out_specs=pl.BlockSpec((ti, e_pad), lambda i, k: (i, 0)),
            scratch_shapes=[pltpu.VMEM((ti, d_pad), jnp.float32)]),  # A@Y1 acc
        compiler_params=pltpu.CompilerParams(
            dimension_semantics=("parallel", "arbitrary"),
            vmem_limit_bytes=vmem_limit),
    )(y1, a_p, xhat, w3h, w3x, b3)


# ----------------------------- forward wrapper --------------------------------

def graph_conv_net_forward(params, m_item, id_embds, A, *, ti=256, tk=256):
    # x = cat(mUser, mItem); F.normalize is fused into layer 0's prepass kernel.
    x = jnp.concatenate([params["mUser"], m_item], axis=0)        # (N, F) f32
    n, f = x.shape
    e = id_embds.shape[1]
    f_pad = _round_up(f, LANE)
    e_pad = _round_up(e, LANE)
    n_pad = _round_up(n, int(np.lcm(ti, tk)))

    x_p = _pad2(x, n_pad, f_pad)                                  # f32
    a_p = _pad2(A, n_pad, n_pad).astype(jnp.bfloat16)             # bf16 A stream
    id_p = _pad2(id_embds, n_pad, e_pad)                          # f32

    for l in range(NUM_LAYERS):
        p = params["layers"][l]
        din_pad = f_pad if l == 0 else e_pad          # layer input dim (padded)
        d_pad = din_pad                               # aggr layer is square d->d
        w1 = _pad2(p["w1"], din_pad, d_pad).astype(jnp.bfloat16)
        b1 = _pad2(p["b1"], 1, d_pad)
        w2 = _pad2(p["w2"], din_pad, e_pad).astype(jnp.bfloat16)
        b2 = _pad2(p["b2"], 1, e_pad)
        w3h = _pad2(p["w3h"], d_pad, e_pad).astype(jnp.bfloat16)
        w3x = _pad2(p["w3x"], e_pad, e_pad).astype(jnp.bfloat16)
        b3 = _pad2(p["b3"], 1, e_pad)

        y1, xhat = gcn_prepass(x_p, id_p, w1, b1, w2, b2,
                               tile=tk, normalize_x=(l == 0))
        out_dtype = jnp.float32 if l == NUM_LAYERS - 1 else jnp.bfloat16
        x_p = gcn_aggregate(y1, a_p, xhat, w3h, w3x, b3,
                            ti=ti, tk=tk, out_dtype=out_dtype)
    return x_p[:n, :e]


# ----------------------------- parameter init ---------------------------------

def _init_linear(key, fan_in, fan_out):
    # PyTorch nn.Linear default init bounds, deterministic. Stored as (in, out).
    kw, kb = jax.random.split(key)
    bound = 1.0 / np.sqrt(fan_in)
    w = jax.random.uniform(kw, (fan_in, fan_out), jnp.float32, -bound, bound)
    b = jax.random.uniform(kb, (1, fan_out), jnp.float32, -bound, bound)
    return w, b


def init_params(key, num_users, feature_dim, embedding_dim):
    keys = jax.random.split(key, 1 + NUM_LAYERS * 3)
    # xavier_normal_ for mUser
    std = np.sqrt(2.0 / (num_users + feature_dim))
    m_user = std * jax.random.normal(keys[0], (num_users, feature_dim), jnp.float32)

    aggr_dims = [(feature_dim, feature_dim),
                 (embedding_dim, embedding_dim),
                 (embedding_dim, embedding_dim)]
    m2id_dims = [(feature_dim, embedding_dim),
                 (embedding_dim, embedding_dim),
                 (embedding_dim, embedding_dim)]
    fusion_h_dims = [feature_dim, embedding_dim, embedding_dim]

    layers = []
    for l in range(NUM_LAYERS):
        k1, k2, k3 = keys[1 + 3 * l: 4 + 3 * l]
        w1, b1 = _init_linear(k1, *aggr_dims[l])
        w2, b2 = _init_linear(k2, *m2id_dims[l])
        fin = fusion_h_dims[l] + embedding_dim
        w3, b3 = _init_linear(k3, fin, embedding_dim)
        w3h = w3[: fusion_h_dims[l], :]
        w3x = w3[fusion_h_dims[l]:, :]
        layers.append(dict(w1=w1, b1=b1, w2=w2, b2=b2, w3h=w3h, w3x=w3x, b3=b3))
    return dict(mUser=m_user, layers=layers)


# ----------------------------- pure-JAX reference -----------------------------

def reference_forward(params, m_item, id_embds, A):
    hp = jax.lax.Precision.HIGHEST
    dot = lambda a, b: jnp.dot(a, b, precision=hp)
    x = jnp.concatenate([params["mUser"], m_item], axis=0)
    nrm = jnp.sqrt(jnp.sum(x * x, axis=-1, keepdims=True))
    x = x / jnp.maximum(nrm, EPS)
    for l in range(NUM_LAYERS):
        p = params["layers"][l]
        h = _leaky(dot(A, dot(x, p["w1"]) + p["b1"]))
        x_hat = _leaky(dot(x, p["w2"]) + p["b2"]) + id_embds
        x = _leaky(dot(h, p["w3h"]) + dot(x_hat, p["w3x"]) + p["b3"])
    return x


# ----------------------------- main --------------------------------------------

if __name__ == "__main__":
    # Small but non-trivial: N = 512 -> 2x2 grid of 256-row/col tiles (the even
    # parallel extent also load-balances the two v7x TensorCores).
    num_users, num_items = 160, 352
    feature_dim, embedding_dim = 32, 64
    N = num_users + num_items

    key = jax.random.PRNGKey(0)
    k_params, k_item, k_id, k_adj = jax.random.split(key, 4)

    params = init_params(k_params, num_users, feature_dim, embedding_dim)
    m_item = jax.random.normal(k_item, (num_items, feature_dim), jnp.float32)
    id_embds = jax.random.normal(k_id, (N, embedding_dim), jnp.float32)
    # Symmetric, row-normalized dense adjacency.
    adj_raw = (jax.random.uniform(k_adj, (N, N)) > 0.5).astype(jnp.float32)
    adj_raw = jnp.maximum(adj_raw, adj_raw.T) + jnp.eye(N, dtype=jnp.float32)
    A = adj_raw / jnp.sum(adj_raw, axis=-1, keepdims=True)

    fwd = jax.jit(functools.partial(graph_conv_net_forward, ti=256, tk=256))
    out = jax.block_until_ready(fwd(params, m_item, id_embds, A))

    ref = jax.block_until_ready(reference_forward(params, m_item, id_embds, A))
    # Tolerance accounts for the end-to-end bf16 streams (A, Y1, X_hat, weights,
    # bf16 inter-layer outputs) with f32 MXU accumulation.
    np.testing.assert_allclose(np.asarray(out), np.asarray(ref),
                               rtol=5e-2, atol=3e-2)
    print("KERNEL_OK")
</pallas_src>

<mosaic_0001>
module attributes {stable_mosaic.version = 11 : i64} {
  func.func @gcn_aggr_kernel(%arg0: i32, %arg1: i32, %arg2: memref<256x128xbf16, #tpu.memory_space<vmem>>, %arg3: memref<256x256xbf16, #tpu.memory_space<vmem>>, %arg4: memref<256x128xbf16, #tpu.memory_space<vmem>>, %arg5: memref<128x128xbf16, #tpu.memory_space<vmem>>, %arg6: memref<128x128xbf16, #tpu.memory_space<vmem>>, %arg7: memref<1x128xf32, #tpu.memory_space<vmem>>, %arg8: memref<256x128xbf16, #tpu.memory_space<vmem>>, %arg9: memref<256x128xf32, #tpu.memory_space<vmem>>) attributes {dimension_semantics = [#tpu.dimension_semantics<parallel>, #tpu.dimension_semantics<arbitrary>], iteration_bounds = array<i64: 2, 2>, scalar_prefetch = 0 : i64, scratch_operands = 1 : i64, tpu.core_type = #tpu.core_type<tc>, window_params = [{transform_indices = @transform_0, window_bounds = array<i64: 256, 128>}, {transform_indices = @transform_1, window_bounds = array<i64: 256, 256>}, {transform_indices = @transform_2, window_bounds = array<i64: 256, 128>}, {pipeline_mode = #tpu.pipeline_mode<synchronous>, transform_indices = @transform_3, window_bounds = array<i64: 128, 128>}, {pipeline_mode = #tpu.pipeline_mode<synchronous>, transform_indices = @transform_4, window_bounds = array<i64: 128, 128>}, {pipeline_mode = #tpu.pipeline_mode<synchronous>, transform_indices = @transform_5, window_bounds = array<i64: 1, 128>}, {transform_indices = @transform_6, window_bounds = array<i64: 256, 128>}]} {
    %c0_i32 = arith.constant 0 : i32
    %0 = arith.cmpi eq, %arg1, %c0_i32 : i32
    %1 = arith.extui %0 : i1 to i32
    %c0_i32_0 = arith.constant 0 : i32
    %2 = arith.cmpi ne, %1, %c0_i32_0 : i32
    scf.if %2 {
      %cst_9 = arith.constant 0.000000e+00 : f32
      %12 = vector.broadcast %cst_9 : f32 to vector<256x128xf32>
      %c0_10 = arith.constant 0 : index
      %c0_11 = arith.constant 0 : index
      %13 = vector.load %arg9[%c0_10, %c0_11] : memref<256x128xf32, #tpu.memory_space<vmem>>, vector<256x128xf32>
      tpu.vector_store %arg9[%c0_10, %c0_11], %12 {strides = array<i32>} : memref<256x128xf32, #tpu.memory_space<vmem>>, vector<256x128xf32>,
    } else {
    }
    %c0 = arith.constant 0 : index
    %c0_1 = arith.constant 0 : index
    %3 = vector.load %arg9[%c0, %c0_1] : memref<256x128xf32, #tpu.memory_space<vmem>>, vector<256x128xf32>
    %c0_2 = arith.constant 0 : index
    %c0_3 = arith.constant 0 : index
    %4 = vector.load %arg3[%c0_2, %c0_3] : memref<256x256xbf16, #tpu.memory_space<vmem>>, vector<256x256xbf16>
    %c0_4 = arith.constant 0 : index
    %c0_5 = arith.constant 0 : index
    %5 = vector.load %arg2[%c0_4, %c0_5] : memref<256x128xbf16, #tpu.memory_space<vmem>>, vector<256x128xbf16>
    %cst = arith.constant dense<0.000000e+00> : vector<256x128xf32>
    %6 = tpu.matmul %4, %5, %cst {dimension_numbers = #tpu.dot_dimension_numbers<[1], [0], [0], [1], [0, 0, 1, 1], [], []>} : vector<256x256xbf16>, vector<256x128xbf16>, vector<256x128xf32> -> vector<256x128xf32>
    %7 = arith.addf %3, %6 : vector<256x128xf32>
    %c0_6 = arith.constant 0 : index
    %c0_7 = arith.constant 0 : index
    %8 = vector.load %arg9[%c0_6, %c0_7] : memref<256x128xf32, #tpu.memory_space<vmem>>, vector<256x128xf32>
    tpu.vector_store %arg9[%c0_6, %c0_7], %7 {strides = array<i32>} : memref<256x128xf32, #tpu.memory_space<vmem>>, vector<256x128xf32>,
    %c1_i32 = arith.constant 1 : i32
    %9 = arith.cmpi eq, %arg1, %c1_i32 : i32
    %10 = arith.extui %9 : i1 to i32
    %c0_i32_8 = arith.constant 0 : i32
    %11 = arith.cmpi ne, %10, %c0_i32_8 : i32
    scf.if %11 {
      %c0_9 = arith.constant 0 : index
      %c0_10 = arith.constant 0 : index
      %12 = vector.load %arg9[%c0_9, %c0_10] : memref<256x128xf32, #tpu.memory_space<vmem>>, vector<256x128xf32>
      %cst_11 = arith.constant 0.000000e+00 : f32
      %13 = vector.broadcast %cst_11 : f32 to vector<256x128xf32>
      %14 = arith.cmpf oge, %12, %13 : vector<256x128xf32>
      %cst_12 = arith.constant 0.00999999977 : f32
      %15 = vector.broadcast %cst_12 : f32 to vector<256x128xf32>
      %16 = arith.mulf %15, %12 : vector<256x128xf32>
      %17 = arith.select %14, %12, %16 : vector<256x128xi1>, vector<256x128xf32>
      %18 = arith.truncf %17 : vector<256x128xf32> to vector<256x128xbf16>
      %c0_13 = arith.constant 0 : index
      %c0_14 = arith.constant 0 : index
      %19 = vector.load %arg5[%c0_13, %c0_14] : memref<128x128xbf16, #tpu.memory_space<vmem>>, vector<128x128xbf16>
      %cst_15 = arith.constant dense<0.000000e+00> : vector<256x128xf32>
      %20 = tpu.matmul %18, %19, %cst_15 {dimension_numbers = #tpu.dot_dimension_numbers<[1], [0], [0], [1], [0, 0, 1, 1], [], []>} : vector<256x128xbf16>, vector<128x128xbf16>, vector<256x128xf32> -> vector<256x128xf32>
      %c0_16 = arith.constant 0 : index
      %c0_17 = arith.constant 0 : index
      %21 = vector.load %arg4[%c0_16, %c0_17] : memref<256x128xbf16, #tpu.memory_space<vmem>>, vector<256x128xbf16>
      %c0_18 = arith.constant 0 : index
      %c0_19 = arith.constant 0 : index
      %22 = vector.load %arg6[%c0_18, %c0_19] : memref<128x128xbf16, #tpu.memory_space<vmem>>, vector<128x128xbf16>
      %cst_20 = arith.constant dense<0.000000e+00> : vector<256x128xf32>
      %23 = tpu.matmul %21, %22, %cst_20 {dimension_numbers = #tpu.dot_dimension_numbers<[1], [0], [0], [1], [0, 0, 1, 1], [], []>} : vector<256x128xbf16>, vector<128x128xbf16>, vector<256x128xf32> -> vector<256x128xf32>
      %24 = arith.addf %20, %23 : vector<256x128xf32>
      %c0_21 = arith.constant 0 : index
      %c0_22 = arith.constant 0 : index
      %25 = vector.load %arg7[%c0_21, %c0_22] : memref<1x128xf32, #tpu.memory_space<vmem>>, vector<1x128xf32>
      %26 = vector.broadcast %25 : vector<1x128xf32> to vector<256x128xf32>
      %27 = arith.addf %24, %26 : vector<256x128xf32>
      %cst_23 = arith.constant 0.000000e+00 : f32
      %28 = vector.broadcast %cst_23 : f32 to vector<256x128xf32>
      %29 = arith.cmpf oge, %27, %28 : vector<256x128xf32>
      %cst_24 = arith.constant 0.00999999977 : f32
      %30 = vector.broadcast %cst_24 : f32 to vector<256x128xf32>
      %31 = arith.mulf %30, %27 : vector<256x128xf32>
      %32 = arith.select %29, %27, %31 : vector<256x128xi1>, vector<256x128xf32>
      %33 = arith.truncf %32 : vector<256x128xf32> to vector<256x128xbf16>
      %c0_25 = arith.constant 0 : index
      %c0_26 = arith.constant 0 : index
      %34 = vector.load %arg8[%c0_25, %c0_26] : memref<256x128xbf16, #tpu.memory_space<vmem>>, vector<256x128xbf16>
      tpu.vector_store %arg8[%c0_25, %c0_26], %33 {strides = array<i32>} : memref<256x128xbf16, #tpu.memory_space<vmem>>, vector<256x128xbf16>,
    } else {
    }
    return
  }
  func.func @transform_0(%arg0: i32, %arg1: i32) -> (i32, i32) {
    %c0_i32 = arith.constant 0 : i32
    %c0_i32_0 = arith.constant 0 : i32
    return %arg1, %c0_i32 : i32, i32
  }
  func.func @transform_1(%arg0: i32, %arg1: i32) -> (i32, i32) {
    %c0_i32 = arith.constant 0 : i32
    return %arg0, %arg1 : i32, i32
  }
  func.func @transform_2(%arg0: i32, %arg1: i32) -> (i32, i32) {
    %c0_i32 = arith.constant 0 : i32
    %c0_i32_0 = arith.constant 0 : i32
    return %arg0, %c0_i32 : i32, i32
  }
  func.func @transform_3(%arg0: i32, %arg1: i32) -> (i32, i32) {
    %c0_i32 = arith.constant 0 : i32
    %c0_i32_0 = arith.constant 0 : i32
    %c0_i32_1 = arith.constant 0 : i32
    return %c0_i32, %c0_i32_0 : i32, i32
  }
  func.func @transform_4(%arg0: i32, %arg1: i32) -> (i32, i32) {
    %c0_i32 = arith.constant 0 : i32
    %c0_i32_0 = arith.constant 0 : i32
    %c0_i32_1 = arith.constant 0 : i32
    return %c0_i32, %c0_i32_0 : i32, i32
  }
  func.func @transform_5(%arg0: i32, %arg1: i32) -> (i32, i32) {
    %c0_i32 = arith.constant 0 : i32
    %c0_i32_0 = arith.constant 0 : i32
    %c0_i32_1 = arith.constant 0 : i32
    return %c0_i32, %c0_i32_0 : i32, i32
  }
  func.func @transform_6(%arg0: i32, %arg1: i32) -> (i32, i32) {
    %c0_i32 = arith.constant 0 : i32
    %c0_i32_0 = arith.constant 0 : i32
    return %arg0, %c0_i32 : i32, i32
  }
}

module attributes {stable_mosaic.version = 11 : i64} {
  func.func @gcn_prepass_kernel(%arg0: i32, %arg1: memref<256x128xf32, #tpu.memory_space<vmem>>, %arg2: memref<256x128xf32, #tpu.memory_space<vmem>>, %arg3: memref<128x128xbf16, #tpu.memory_space<vmem>>, %arg4: memref<1x128xf32, #tpu.memory_space<vmem>>, %arg5: memref<128x128xbf16, #tpu.memory_space<vmem>>, %arg6: memref<1x128xf32, #tpu.memory_space<vmem>>, %arg7: memref<256x128xbf16, #tpu.memory_space<vmem>>, %arg8: memref<256x128xbf16, #tpu.memory_space<vmem>>) attributes {dimension_semantics = [#tpu.dimension_semantics<parallel>], iteration_bounds = array<i64: 2>, scalar_prefetch = 0 : i64, scratch_operands = 0 : i64, tpu.core_type = #tpu.core_type<tc>, window_params = [{transform_indices = @transform_0, window_bounds = array<i64: 256, 128>}, {transform_indices = @transform_1, window_bounds = array<i64: 256, 128>}, {pipeline_mode = #tpu.pipeline_mode<synchronous>, transform_indices = @transform_2, window_bounds = array<i64: 128, 128>}, {pipeline_mode = #tpu.pipeline_mode<synchronous>, transform_indices = @transform_3, window_bounds = array<i64: 1, 128>}, {pipeline_mode = #tpu.pipeline_mode<synchronous>, transform_indices = @transform_4, window_bounds = array<i64: 128, 128>}, {pipeline_mode = #tpu.pipeline_mode<synchronous>, transform_indices = @transform_5, window_bounds = array<i64: 1, 128>}, {transform_indices = @transform_6, window_bounds = array<i64: 256, 128>}, {transform_indices = @transform_7, window_bounds = array<i64: 256, 128>}]} {
    %c0 = arith.constant 0 : index
    %c0_0 = arith.constant 0 : index
    %0 = vector.load %arg1[%c0, %c0_0] : memref<256x128xf32, #tpu.memory_space<vmem>>, vector<256x128xf32>
    %1 = arith.mulf %0, %0 : vector<256x128xf32>
    %cst = arith.constant dense<0.000000e+00> : vector<256xf32>
    %2 = vector.multi_reduction <add>, %1, %cst [1] : vector<256x128xf32> to vector<256xf32>
    %3 = vector.shape_cast %2 : vector<256xf32> to vector<256x1xf32>
    %cst_1 = arith.constant 1.000000e-24 : f32
    %4 = vector.broadcast %cst_1 : f32 to vector<256x1xf32>
    %5 = arith.maximumf %3, %4 : vector<256x1xf32>
    %6 = math.rsqrt %5 : vector<256x1xf32>
    %7 = vector.broadcast %6 : vector<256x1xf32> to vector<256x128xf32>
    %8 = arith.mulf %0, %7 : vector<256x128xf32>
    %9 = arith.truncf %8 : vector<256x128xf32> to vector<256x128xbf16>
    %c0_2 = arith.constant 0 : index
    %c0_3 = arith.constant 0 : index
    %10 = vector.load %arg3[%c0_2, %c0_3] : memref<128x128xbf16, #tpu.memory_space<vmem>>, vector<128x128xbf16>
    %cst_4 = arith.constant dense<0.000000e+00> : vector<256x128xf32>
    %11 = tpu.matmul %9, %10, %cst_4 {dimension_numbers = #tpu.dot_dimension_numbers<[1], [0], [0], [1], [0, 0, 1, 1], [], []>} : vector<256x128xbf16>, vector<128x128xbf16>, vector<256x128xf32> -> vector<256x128xf32>
    %c0_5 = arith.constant 0 : index
    %c0_6 = arith.constant 0 : index
    %12 = vector.load %arg4[%c0_5, %c0_6] : memref<1x128xf32, #tpu.memory_space<vmem>>, vector<1x128xf32>
    %13 = vector.broadcast %12 : vector<1x128xf32> to vector<256x128xf32>
    %14 = arith.addf %11, %13 : vector<256x128xf32>
    %15 = arith.truncf %14 : vector<256x128xf32> to vector<256x128xbf16>
    %c0_7 = arith.constant 0 : index
    %c0_8 = arith.constant 0 : index
    %16 = vector.load %arg7[%c0_7, %c0_8] : memref<256x128xbf16, #tpu.memory_space<vmem>>, vector<256x128xbf16>
    tpu.vector_store %arg7[%c0_7, %c0_8], %15 {strides = array<i32>} : memref<256x128xbf16, #tpu.memory_space<vmem>>, vector<256x128xbf16>,
    %c0_9 = arith.constant 0 : index
    %c0_10 = arith.constant 0 : index
    %17 = vector.load %arg5[%c0_9, %c0_10] : memref<128x128xbf16, #tpu.memory_space<vmem>>, vector<128x128xbf16>
    %cst_11 = arith.constant dense<0.000000e+00> : vector<256x128xf32>
    %18 = tpu.matmul %9, %17, %cst_11 {dimension_numbers = #tpu.dot_dimension_numbers<[1], [0], [0], [1], [0, 0, 1, 1], [], []>} : vector<256x128xbf16>, vector<128x128xbf16>, vector<256x128xf32> -> vector<256x128xf32>
    %c0_12 = arith.constant 0 : index
    %c0_13 = arith.constant 0 : index
    %19 = vector.load %arg6[%c0_12, %c0_13] : memref<1x128xf32, #tpu.memory_space<vmem>>, vector<1x128xf32>
    %20 = vector.broadcast %19 : vector<1x128xf32> to vector<256x128xf32>
    %21 = arith.addf %18, %20 : vector<256x128xf32>
    %cst_14 = arith.constant 0.000000e+00 : f32
    %22 = vector.broadcast %cst_14 : f32 to vector<256x128xf32>
    %23 = arith.cmpf oge, %21, %22 : vector<256x128xf32>
    %cst_15 = arith.constant 0.00999999977 : f32
    %24 = vector.broadcast %cst_15 : f32 to vector<256x128xf32>
    %25 = arith.mulf %24, %21 : vector<256x128xf32>
    %26 = arith.select %23, %21, %25 : vector<256x128xi1>, vector<256x128xf32>
    %c0_16 = arith.constant 0 : index
    %c0_17 = arith.constant 0 : index
    %27 = vector.load %arg2[%c0_16, %c0_17] : memref<256x128xf32, #tpu.memory_space<vmem>>, vector<256x128xf32>
    %28 = arith.addf %26, %27 : vector<256x128xf32>
    %29 = arith.truncf %28 : vector<256x128xf32> to vector<256x128xbf16>
    %c0_18 = arith.constant 0 : index
    %c0_19 = arith.constant 0 : index
    %30 = vector.load %arg8[%c0_18, %c0_19] : memref<256x128xbf16, #tpu.memory_space<vmem>>, vector<256x128xbf16>
    tpu.vector_store %arg8[%c0_18, %c0_19], %29 {strides = array<i32>} : memref<256x128xbf16, #tpu.memory_space<vmem>>, vector<256x128xbf16>,
    return
  }
  func.func @transform_0(%arg0: i32) -> (i32, i32) {
    %c0_i32 = arith.constant 0 : i32
    %c0_i32_0 = arith.constant 0 : i32
    return %arg0, %c0_i32 : i32, i32
  }
  func.func @transform_1(%arg0: i32) -> (i32, i32) {
    %c0_i32 = arith.constant 0 : i32
    %c0_i32_0 = arith.constant 0 : i32
    return %arg0, %c0_i32 : i32, i32
  }
  func.func @transform_2(%arg0: i32) -> (i32, i32) {
    %c0_i32 = arith.constant 0 : i32
    %c0_i32_0 = arith.constant 0 : i32
    %c0_i32_1 = arith.constant 0 : i32
    return %c0_i32, %c0_i32_0 : i32, i32
  }
  func.func @transform_3(%arg0: i32) -> (i32, i32) {
    %c0_i32 = arith.constant 0 : i32
    %c0_i32_0 = arith.constant 0 : i32
    %c0_i32_1 = arith.constant 0 : i32
    return %c0_i32, %c0_i32_0 : i32, i32
  }
  func.func @transform_4(%arg0: i32) -> (i32, i32) {
    %c0_i32 = arith.constant 0 : i32
    %c0_i32_0 = arith.constant 0 : i32
    %c0_i32_1 = arith.constant 0 : i32
    return %c0_i32, %c0_i32_0 : i32, i32
  }
  func.func @transform_5(%arg0: i32) -> (i32, i32) {
    %c0_i32 = arith.constant 0 : i32
    %c0_i32_0 = arith.constant 0 : i32
    %c0_i32_1 = arith.constant 0 : i32
    return %c0_i32, %c0_i32_0 : i32, i32
  }
  func.func @transform_6(%arg0: i32) -> (i32, i32) {
    %c0_i32 = arith.constant 0 : i32
    %c0_i32_0 = arith.constant 0 : i32
    return %arg0, %c0_i32 : i32, i32
  }
  func.func @transform_7(%arg0: i32) -> (i32, i32) {
    %c0_i32 = arith.constant 0 : i32
    %c0_i32_0 = arith.constant 0 : i32
    return %arg0, %c0_i32 : i32, i32
  }
}

module attributes {stable_mosaic.version = 11 : i64} {
  func.func @gcn_prepass_kernel(%arg0: i32, %arg1: memref<256x128xbf16, #tpu.memory_space<vmem>>, %arg2: memref<256x128xf32, #tpu.memory_space<vmem>>, %arg3: memref<128x128xbf16, #tpu.memory_space<vmem>>, %arg4: memref<1x128xf32, #tpu.memory_space<vmem>>, %arg5: memref<128x128xbf16, #tpu.memory_space<vmem>>, %arg6: memref<1x128xf32, #tpu.memory_space<vmem>>, %arg7: memref<256x128xbf16, #tpu.memory_space<vmem>>, %arg8: memref<256x128xbf16, #tpu.memory_space<vmem>>) attributes {dimension_semantics = [#tpu.dimension_semantics<parallel>], iteration_bounds = array<i64: 2>, scalar_prefetch = 0 : i64, scratch_operands = 0 : i64, tpu.core_type = #tpu.core_type<tc>, window_params = [{transform_indices = @transform_0, window_bounds = array<i64: 256, 128>}, {transform_indices = @transform_1, window_bounds = array<i64: 256, 128>}, {pipeline_mode = #tpu.pipeline_mode<synchronous>, transform_indices = @transform_2, window_bounds = array<i64: 128, 128>}, {pipeline_mode = #tpu.pipeline_mode<synchronous>, transform_indices = @transform_3, window_bounds = array<i64: 1, 128>}, {pipeline_mode = #tpu.pipeline_mode<synchronous>, transform_indices = @transform_4, window_bounds = array<i64: 128, 128>}, {pipeline_mode = #tpu.pipeline_mode<synchronous>, transform_indices = @transform_5, window_bounds = array<i64: 1, 128>}, {transform_indices = @transform_6, window_bounds = array<i64: 256, 128>}, {transform_indices = @transform_7, window_bounds = array<i64: 256, 128>}]} {
    %c0 = arith.constant 0 : index
    %c0_0 = arith.constant 0 : index
    %0 = vector.load %arg1[%c0, %c0_0] : memref<256x128xbf16, #tpu.memory_space<vmem>>, vector<256x128xbf16>
    %c0_1 = arith.constant 0 : index
    %c0_2 = arith.constant 0 : index
    %1 = vector.load %arg3[%c0_1, %c0_2] : memref<128x128xbf16, #tpu.memory_space<vmem>>, vector<128x128xbf16>
    %cst = arith.constant dense<0.000000e+00> : vector<256x128xf32>
    %2 = tpu.matmul %0, %1, %cst {dimension_numbers = #tpu.dot_dimension_numbers<[1], [0], [0], [1], [0, 0, 1, 1], [], []>} : vector<256x128xbf16>, vector<128x128xbf16>, vector<256x128xf32> -> vector<256x128xf32>
    %c0_3 = arith.constant 0 : index
    %c0_4 = arith.constant 0 : index
    %3 = vector.load %arg4[%c0_3, %c0_4] : memref<1x128xf32, #tpu.memory_space<vmem>>, vector<1x128xf32>
    %4 = vector.broadcast %3 : vector<1x128xf32> to vector<256x128xf32>
    %5 = arith.addf %2, %4 : vector<256x128xf32>
    %6 = arith.truncf %5 : vector<256x128xf32> to vector<256x128xbf16>
    %c0_5 = arith.constant 0 : index
    %c0_6 = arith.constant 0 : index
    %7 = vector.load %arg7[%c0_5, %c0_6] : memref<256x128xbf16, #tpu.memory_space<vmem>>, vector<256x128xbf16>
    tpu.vector_store %arg7[%c0_5, %c0_6], %6 {strides = array<i32>} : memref<256x128xbf16, #tpu.memory_space<vmem>>, vector<256x128xbf16>,
    %c0_7 = arith.constant 0 : index
    %c0_8 = arith.constant 0 : index
    %8 = vector.load %arg5[%c0_7, %c0_8] : memref<128x128xbf16, #tpu.memory_space<vmem>>, vector<128x128xbf16>
    %cst_9 = arith.constant dense<0.000000e+00> : vector<256x128xf32>
    %9 = tpu.matmul %0, %8, %cst_9 {dimension_numbers = #tpu.dot_dimension_numbers<[1], [0], [0], [1], [0, 0, 1, 1], [], []>} : vector<256x128xbf16>, vector<128x128xbf16>, vector<256x128xf32> -> vector<256x128xf32>
    %c0_10 = arith.constant 0 : index
    %c0_11 = arith.constant 0 : index
    %10 = vector.load %arg6[%c0_10, %c0_11] : memref<1x128xf32, #tpu.memory_space<vmem>>, vector<1x128xf32>
    %11 = vector.broadcast %10 : vector<1x128xf32> to vector<256x128xf32>
    %12 = arith.addf %9, %11 : vector<256x128xf32>
    %cst_12 = arith.constant 0.000000e+00 : f32
    %13 = vector.broadcast %cst_12 : f32 to vector<256x128xf32>
    %14 = arith.cmpf oge, %12, %13 : vector<256x128xf32>
    %cst_13 = arith.constant 0.00999999977 : f32
    %15 = vector.broadcast %cst_13 : f32 to vector<256x128xf32>
    %16 = arith.mulf %15, %12 : vector<256x128xf32>
    %17 = arith.select %14, %12, %16 : vector<256x128xi1>, vector<256x128xf32>
    %c0_14 = arith.constant 0 : index
    %c0_15 = arith.constant 0 : index
    %18 = vector.load %arg2[%c0_14, %c0_15] : memref<256x128xf32, #tpu.memory_space<vmem>>, vector<256x128xf32>
    %19 = arith.addf %17, %18 : vector<256x128xf32>
    %20 = arith.truncf %19 : vector<256x128xf32> to vector<256x128xbf16>
    %c0_16 = arith.constant 0 : index
    %c0_17 = arith.constant 0 : index
    %21 = vector.load %arg8[%c0_16, %c0_17] : memref<256x128xbf16, #tpu.memory_space<vmem>>, vector<256x128xbf16>
    tpu.vector_store %arg8[%c0_16, %c0_17], %20 {strides = array<i32>} : memref<256x128xbf16, #tpu.memory_space<vmem>>, vector<256x128xbf16>,
    return
  }
  func.func @transform_0(%arg0: i32) -> (i32, i32) {
    %c0_i32 = arith.constant 0 : i32
    %c0_i32_0 = arith.constant 0 : i32
    return %arg0, %c0_i32 : i32, i32
  }
  func.func @transform_1(%arg0: i32) -> (i32, i32) {
    %c0_i32 = arith.constant 0 : i32
    %c0_i32_0 = arith.constant 0 : i32
    return %arg0, %c0_i32 : i32, i32
  }
  func.func @transform_2(%arg0: i32) -> (i32, i32) {
    %c0_i32 = arith.constant 0 : i32
    %c0_i32_0 = arith.constant 0 : i32
    %c0_i32_1 = arith.constant 0 : i32
    return %c0_i32, %c0_i32_0 : i32, i32
  }
  func.func @transform_3(%arg0: i32) -> (i32, i32) {
    %c0_i32 = arith.constant 0 : i32
    %c0_i32_0 = arith.constant 0 : i32
    %c0_i32_1 = arith.constant 0 : i32
    return %c0_i32, %c0_i32_0 : i32, i32
  }
  func.func @transform_4(%arg0: i32) -> (i32, i32) {
    %c0_i32 = arith.constant 0 : i32
    %c0_i32_0 = arith.constant 0 : i32
    %c0_i32_1 = arith.constant 0 : i32
    return %c0_i32, %c0_i32_0 : i32, i32
  }
  func.func @transform_5(%arg0: i32) -> (i32, i32) {
    %c0_i32 = arith.constant 0 : i32
    %c0_i32_0 = arith.constant 0 : i32
    %c0_i32_1 = arith.constant 0 : i32
    return %c0_i32, %c0_i32_0 : i32, i32
  }
  func.func @transform_6(%arg0: i32) -> (i32, i32) {
    %c0_i32 = arith.constant 0 : i32
    %c0_i32_0 = arith.constant 0 : i32
    return %arg0, %c0_i32 : i32, i32
  }
  func.func @transform_7(%arg0: i32) -> (i32, i32) {
    %c0_i32 = arith.constant 0 : i32
    %c0_i32_0 = arith.constant 0 : i32
    return %arg0, %c0_i32 : i32, i32
  }
}

module attributes {stable_mosaic.version = 11 : i64} {
  func.func @gcn_aggr_kernel(%arg0: i32, %arg1: i32, %arg2: memref<256x128xbf16, #tpu.memory_space<vmem>>, %arg3: memref<256x256xbf16, #tpu.memory_space<vmem>>, %arg4: memref<256x128xbf16, #tpu.memory_space<vmem>>, %arg5: memref<128x128xbf16, #tpu.memory_space<vmem>>, %arg6: memref<128x128xbf16, #tpu.memory_space<vmem>>, %arg7: memref<1x128xf32, #tpu.memory_space<vmem>>, %arg8: memref<256x128xf32, #tpu.memory_space<vmem>>, %arg9: memref<256x128xf32, #tpu.memory_space<vmem>>) attributes {dimension_semantics = [#tpu.dimension_semantics<parallel>, #tpu.dimension_semantics<arbitrary>], iteration_bounds = array<i64: 2, 2>, scalar_prefetch = 0 : i64, scratch_operands = 1 : i64, tpu.core_type = #tpu.core_type<tc>, window_params = [{transform_indices = @transform_0, window_bounds = array<i64: 256, 128>}, {transform_indices = @transform_1, window_bounds = array<i64: 256, 256>}, {transform_indices = @transform_2, window_bounds = array<i64: 256, 128>}, {pipeline_mode = #tpu.pipeline_mode<synchronous>, transform_indices = @transform_3, window_bounds = array<i64: 128, 128>}, {pipeline_mode = #tpu.pipeline_mode<synchronous>, transform_indices = @transform_4, window_bounds = array<i64: 128, 128>}, {pipeline_mode = #tpu.pipeline_mode<synchronous>, transform_indices = @transform_5, window_bounds = array<i64: 1, 128>}, {transform_indices = @transform_6, window_bounds = array<i64: 256, 128>}]} {
    %c0_i32 = arith.constant 0 : i32
    %0 = arith.cmpi eq, %arg1, %c0_i32 : i32
    %1 = arith.extui %0 : i1 to i32
    %c0_i32_0 = arith.constant 0 : i32
    %2 = arith.cmpi ne, %1, %c0_i32_0 : i32
    scf.if %2 {
      %cst_9 = arith.constant 0.000000e+00 : f32
      %12 = vector.broadcast %cst_9 : f32 to vector<256x128xf32>
      %c0_10 = arith.constant 0 : index
      %c0_11 = arith.constant 0 : index
      %13 = vector.load %arg9[%c0_10, %c0_11] : memref<256x128xf32, #tpu.memory_space<vmem>>, vector<256x128xf32>
      tpu.vector_store %arg9[%c0_10, %c0_11], %12 {strides = array<i32>} : memref<256x128xf32, #tpu.memory_space<vmem>>, vector<256x128xf32>,
    } else {
    }
    %c0 = arith.constant 0 : index
    %c0_1 = arith.constant 0 : index
    %3 = vector.load %arg9[%c0, %c0_1] : memref<256x128xf32, #tpu.memory_space<vmem>>, vector<256x128xf32>
    %c0_2 = arith.constant 0 : index
    %c0_3 = arith.constant 0 : index
    %4 = vector.load %arg3[%c0_2, %c0_3] : memref<256x256xbf16, #tpu.memory_space<vmem>>, vector<256x256xbf16>
    %c0_4 = arith.constant 0 : index
    %c0_5 = arith.constant 0 : index
    %5 = vector.load %arg2[%c0_4, %c0_5] : memref<256x128xbf16, #tpu.memory_space<vmem>>, vector<256x128xbf16>
    %cst = arith.constant dense<0.000000e+00> : vector<256x128xf32>
    %6 = tpu.matmul %4, %5, %cst {dimension_numbers = #tpu.dot_dimension_numbers<[1], [0], [0], [1], [0, 0, 1, 1], [], []>} : vector<256x256xbf16>, vector<256x128xbf16>, vector<256x128xf32> -> vector<256x128xf32>
    %7 = arith.addf %3, %6 : vector<256x128xf32>
    %c0_6 = arith.constant 0 : index
    %c0_7 = arith.constant 0 : index
    %8 = vector.load %arg9[%c0_6, %c0_7] : memref<256x128xf32, #tpu.memory_space<vmem>>, vector<256x128xf32>
    tpu.vector_store %arg9[%c0_6, %c0_7], %7 {strides = array<i32>} : memref<256x128xf32, #tpu.memory_space<vmem>>, vector<256x128xf32>,
    %c1_i32 = arith.constant 1 : i32
    %9 = arith.cmpi eq, %arg1, %c1_i32 : i32
    %10 = arith.extui %9 : i1 to i32
    %c0_i32_8 = arith.constant 0 : i32
    %11 = arith.cmpi ne, %10, %c0_i32_8 : i32
    scf.if %11 {
      %c0_9 = arith.constant 0 : index
      %c0_10 = arith.constant 0 : index
      %12 = vector.load %arg9[%c0_9, %c0_10] : memref<256x128xf32, #tpu.memory_space<vmem>>, vector<256x128xf32>
      %cst_11 = arith.constant 0.000000e+00 : f32
      %13 = vector.broadcast %cst_11 : f32 to vector<256x128xf32>
      %14 = arith.cmpf oge, %12, %13 : vector<256x128xf32>
      %cst_12 = arith.constant 0.00999999977 : f32
      %15 = vector.broadcast %cst_12 : f32 to vector<256x128xf32>
      %16 = arith.mulf %15, %12 : vector<256x128xf32>
      %17 = arith.select %14, %12, %16 : vector<256x128xi1>, vector<256x128xf32>
      %18 = arith.truncf %17 : vector<256x128xf32> to vector<256x128xbf16>
      %c0_13 = arith.constant 0 : index
      %c0_14 = arith.constant 0 : index
      %19 = vector.load %arg5[%c0_13, %c0_14] : memref<128x128xbf16, #tpu.memory_space<vmem>>, vector<128x128xbf16>
      %cst_15 = arith.constant dense<0.000000e+00> : vector<256x128xf32>
      %20 = tpu.matmul %18, %19, %cst_15 {dimension_numbers = #tpu.dot_dimension_numbers<[1], [0], [0], [1], [0, 0, 1, 1], [], []>} : vector<256x128xbf16>, vector<128x128xbf16>, vector<256x128xf32> -> vector<256x128xf32>
      %c0_16 = arith.constant 0 : index
      %c0_17 = arith.constant 0 : index
      %21 = vector.load %arg4[%c0_16, %c0_17] : memref<256x128xbf16, #tpu.memory_space<vmem>>, vector<256x128xbf16>
      %c0_18 = arith.constant 0 : index
      %c0_19 = arith.constant 0 : index
      %22 = vector.load %arg6[%c0_18, %c0_19] : memref<128x128xbf16, #tpu.memory_space<vmem>>, vector<128x128xbf16>
      %cst_20 = arith.constant dense<0.000000e+00> : vector<256x128xf32>
      %23 = tpu.matmul %21, %22, %cst_20 {dimension_numbers = #tpu.dot_dimension_numbers<[1], [0], [0], [1], [0, 0, 1, 1], [], []>} : vector<256x128xbf16>, vector<128x128xbf16>, vector<256x128xf32> -> vector<256x128xf32>
      %24 = arith.addf %20, %23 : vector<256x128xf32>
      %c0_21 = arith.constant 0 : index
      %c0_22 = arith.constant 0 : index
      %25 = vector.load %arg7[%c0_21, %c0_22] : memref<1x128xf32, #tpu.memory_space<vmem>>, vector<1x128xf32>
      %26 = vector.broadcast %25 : vector<1x128xf32> to vector<256x128xf32>
      %27 = arith.addf %24, %26 : vector<256x128xf32>
      %cst_23 = arith.constant 0.000000e+00 : f32
      %28 = vector.broadcast %cst_23 : f32 to vector<256x128xf32>
      %29 = arith.cmpf oge, %27, %28 : vector<256x128xf32>
      %cst_24 = arith.constant 0.00999999977 : f32
      %30 = vector.broadcast %cst_24 : f32 to vector<256x128xf32>
      %31 = arith.mulf %30, %27 : vector<256x128xf32>
      %32 = arith.select %29, %27, %31 : vector<256x128xi1>, vector<256x128xf32>
      %c0_25 = arith.constant 0 : index
      %c0_26 = arith.constant 0 : index
      %33 = vector.load %arg8[%c0_25, %c0_26] : memref<256x128xf32, #tpu.memory_space<vmem>>, vector<256x128xf32>
      tpu.vector_store %arg8[%c0_25, %c0_26], %32 {strides = array<i32>} : memref<256x128xf32, #tpu.memory_space<vmem>>, vector<256x128xf32>,
    } else {
    }
    return
  }
  func.func @transform_0(%arg0: i32, %arg1: i32) -> (i32, i32) {
    %c0_i32 = arith.constant 0 : i32
    %c0_i32_0 = arith.constant 0 : i32
    return %arg1, %c0_i32 : i32, i32
  }
  func.func @transform_1(%arg0: i32, %arg1: i32) -> (i32, i32) {
    %c0_i32 = arith.constant 0 : i32
    return %arg0, %arg1 : i32, i32
  }
  func.func @transform_2(%arg0: i32, %arg1: i32) -> (i32, i32) {
    %c0_i32 = arith.constant 0 : i32
    %c0_i32_0 = arith.constant 0 : i32
    return %arg0, %c0_i32 : i32, i32
  }
  func.func @transform_3(%arg0: i32, %arg1: i32) -> (i32, i32) {
    %c0_i32 = arith.constant 0 : i32
    %c0_i32_0 = arith.constant 0 : i32
    %c0_i32_1 = arith.constant 0 : i32
    return %c0_i32, %c0_i32_0 : i32, i32
  }
  func.func @transform_4(%arg0: i32, %arg1: i32) -> (i32, i32) {
    %c0_i32 = arith.constant 0 : i32
    %c0_i32_0 = arith.constant 0 : i32
    %c0_i32_1 = arith.constant 0 : i32
    return %c0_i32, %c0_i32_0 : i32, i32
  }
  func.func @transform_5(%arg0: i32, %arg1: i32) -> (i32, i32) {
    %c0_i32 = arith.constant 0 : i32
    %c0_i32_0 = arith.constant 0 : i32
    %c0_i32_1 = arith.constant 0 : i32
    return %c0_i32, %c0_i32_0 : i32, i32
  }
  func.func @transform_6(%arg0: i32, %arg1: i32) -> (i32, i32) {
    %c0_i32 = arith.constant 0 : i32
    %c0_i32_0 = arith.constant 0 : i32
    return %arg0, %c0_i32 : i32, i32
  }
}

</mosaic_0001>

<bundles_post_ra>
// kernel: graph_conv_net_forward.6
= control target key start
LH: loop header
LB: loop body
LE: loop exit
PB: predicated region body
PF: predicated region fallthrough
CT: control target
= control target key end

     0   :  { %s1981_s24 = smov 0   ;;  %s3009_s0 = inlined_call_operand.vmem [shape: f32[512,128], index: 0, kind: input, shape index: {}]   ;;  %s3010_s1 = inlined_call_operand.vmem [shape: f32[512,128], index: 1, kind: input, shape index: {}]   ;;  %s3011_s2 = inlined_call_operand.vmem [shape: bf16[128,128], index: 2, kind: input, shape index: {}]   ;;  %s3012_s3 = inlined_call_operand.vmem [shape: f32[1,128], index: 3, kind: input, shape index: {}]   ;;  %s3013_s4 = inlined_call_operand.vmem [shape: bf16[128,128], index: 4, kind: input, shape index: {}]   ;;  %s3014_s5 = inlined_call_operand.vmem [shape: f32[1,128], index: 5, kind: input, shape index: {}]   ;;  %s3015_s6 = inlined_call_operand.vmem [shape: bf16[512,128], index: 6, kind: output, shape index: {0}]   ;;  %s3016_s7 = inlined_call_operand.vmem [shape: bf16[512,128], index: 7, kind: output, shape index: {1}]  }
   0x1 LB: > { %s1550_s25 = sadd.s32 4294967295, %s1939_s24   ;;  %p1554_p0 = scmp.ge.s32.totalorder %s1939_s24, 1  ;;  %s1939_s24 = sphi %s1981_s24, %s18_s24  }
   0x2   : > { %p252_p1 = scmp.lt.s32.totalorder %s1939_s24, 3 }
   0x4   : > { %p253_p2 = pnand %p1554_p0, %p252_p1 }
   0x5   : > { %s1555_s26 = sshll.u32 (!%p253_p2), %s1550_s25, 5 }
   0x6   : > { %256 = sbr.rel (%p253_p2) target bundleno = 427 (0x1ab), region = 44  ;;  %p295_p3 = scmp.lt.s32.totalorder (!%p253_p2), %s1555_s26, 63 }
   0xb   : > { %s3076_s26 = smov (!%p295_p3, %s1555_s26), 63 }
   0xc   : > { %s1556_s27 = sshll.u32 %s3076_s26, 3  ;;  %s1560_s25 = sshll.u32 %s3076_s26, 2 }
   0xd   : > { %s1997_s30 = scalar_lea.vmem %s3009_s0, %s1556_s27  ;;  %s2867_s8 = scalar_lea.vmem %s3010_s1, %s1556_s27 }
   0xe   : > { %v2000_v0 = vld [vmem:[%s1997_s30 + $0x90] sm:$0xff]  ;;  %v2003_v1 = vld [vmem:[%s1997_s30 + $0x80] sm:$0xff]  ;;  %v2015_v6 = vld [vmem:[%s1997_s30 + $0x98] sm:$0xff]  ;;  %s2875_s26 = scalar_lea.vmem %s3015_s6, %s1560_s25  ;;  %s2886_s12 = scalar_lea.vmem %s3016_s7, %s1560_s25 }
   0xf   : > { %v2006_v2 = vld [vmem:[%s1997_s30] sm:$0xff]  ;;  %v368_v3 = vmul.f32 %v2000_v0, %v2000_v0  ;;  %v366_v4 = vmul.f32 %v2003_v1, %v2003_v1  ;;  %v2018_v7 = vld [vmem:[%s1997_s30 + $0x88] sm:$0xff]  ;;  %v369_v9 = vmul.f32 %v2015_v6, %v2015_v6  ;;  %v2030_v12 = vld [vmem:[%s1997_s30 + $0x10] sm:$0xff] }
  0x10   : > { %v350_v5 = vmul.f32 %v2006_v2, %v2006_v2  ;;  %v2021_v8 = vld [vmem:[%s1997_s30 + $0x8] sm:$0xff]  ;;  %v367_v10 = vmul.f32 %v2018_v7, %v2018_v7  ;;  %v2033_v13 = vld [vmem:[%s1997_s30 + $0xa0] sm:$0xff]  ;;  %v2036_v14 = vld [vmem:[%s1997_s30 + $0x18] sm:$0xff]  ;;  %v352_v15 = vmul.f32 %v2030_v12, %v2030_v12 }
  0x11   : > { %418 = vadd.xlane.f32.xlu2 %v368_v3  ;;  %414 = vadd.xlane.f32.xlu0 %v366_v4  ;;  %v351_v11 = vmul.f32 %v2021_v8, %v2021_v8  ;;  %v370_v16 = vmul.f32 %v2033_v13, %v2033_v13  ;;  %v353_v17 = vmul.f32 %v2036_v14, %v2036_v14  ;;  %v2045_v18 = vld [vmem:[%s1997_s30 + $0xa8] sm:$0xff]  ;;  %v2051_v20 = vld [vmem:[%s1997_s30 + $0x20] sm:$0xff]  ;;  %v2060_v24 = vld [vmem:[%s1997_s30 + $0xb0] sm:$0xff] }
  0x12   : > { %382 = vadd.xlane.f32.xlu1 %v350_v5  ;;  %v2048_v19 = vld [vmem:[%s1997_s30 + $0x28] sm:$0xff]  ;;  %v371_v21 = vmul.f32 %v2045_v18, %v2045_v18  ;;  %v354_v23 = vmul.f32 %v2051_v20, %v2051_v20  ;;  %v2063_v25 = vld [vmem:[%s1997_s30 + $0x30] sm:$0xff]  ;;  %v2066_v26 = vld [vmem:[%s1997_s30 + $0xb8] sm:$0xff]  ;;  %v372_v27 = vmul.f32 %v2060_v24, %v2060_v24 }
  0x13   : > { %v355_v22 = vmul.f32 %v2048_v19, %v2048_v19  ;;  %v356_v28 = vmul.f32 %v2063_v25, %v2063_v25  ;;  %v373_v29 = vmul.f32 %v2066_v26, %v2066_v26  ;;  %v2075_v30 = vld [vmem:[%s1997_s30 + $0x38] sm:$0xff]  ;;  %v2078_v31 = vld [vmem:[%s1997_s30 + $0xc8] sm:$0xff]  ;;  %v2081_v32 = vld [vmem:[%s1997_s30 + $0xc0] sm:$0xff] }
  0x14   : > { %v357_v33 = vmul.f32 %v2075_v30, %v2075_v30  ;;  %v375_v34 = vmul.f32 %v2078_v31, %v2078_v31  ;;  %v374_v35 = vmul.f32 %v2081_v32, %v2081_v32  ;;  %v2090_v36 = vld [vmem:[%s1997_s30 + $0x40] sm:$0xff]  ;;  %v2093_v37 = vld [vmem:[%s1997_s30 + $0xd0] sm:$0xff]  ;;  %v2096_v38 = vld [vmem:[%s1997_s30 + $0x48] sm:$0xff] }
  0x15   : > { %v358_v39 = vmul.f32 %v2090_v36, %v2090_v36  ;;  %v376_v40 = vmul.f32 %v2093_v37, %v2093_v37  ;;  %v359_v41 = vmul.f32 %v2096_v38, %v2096_v38  ;;  %v2105_v42 = vld [vmem:[%s1997_s30 + $0xd8] sm:$0xff]  ;;  %v2111_v44 = vld [vmem:[%s1997_s30 + $0x50] sm:$0xff]  ;;  %v346_v48 = vld [vmem:[%s1997_s30 + $0xe0] sm:$0xff] }
  0x16   : > { %v2108_v43 = vld [vmem:[%s1997_s30 + $0x58] sm:$0xff]  ;;  %v377_v45 = vmul.f32 %v2105_v42, %v2105_v42  ;;  %v360_v47 = vmul.f32 %v2111_v44, %v2111_v44  ;;  %v330_v49 = vld [vmem:[%s1997_s30 + $0x60] sm:$0xff]  ;;  %v347_v50 = vld [vmem:[%s1997_s30 + $0xe8] sm:$0xff]  ;;  %v378_v51 = vmul.f32 %v346_v48, %v346_v48 }
  0x17   : > { %v361_v46 = vmul.f32 %v2108_v43, %v2108_v43  ;;  %v362_v52 = vmul.f32 %v330_v49, %v330_v49  ;;  %v379_v53 = vmul.f32 %v347_v50, %v347_v50  ;;  %v331_v54 = vld [vmem:[%s1997_s30 + $0x68] sm:$0xff]  ;;  %v349_v55 = vld [vmem:[%s1997_s30 + $0xf8] sm:$0xff]  ;;  %v348_v56 = vld [vmem:[%s1997_s30 + $0xf0] sm:$0xff] }
  0x18   : > { %v363_v57 = vmul.f32 %v331_v54, %v331_v54  ;;  %v381_v58 = vmul.f32 %v349_v55, %v349_v55  ;;  %v380_v59 = vmul.f32 %v348_v56, %v348_v56  ;;  %v332_v60 = vld [vmem:[%s1997_s30 + $0x70] sm:$0xff]  ;;  %v333_v61 = vld [vmem:[%s1997_s30 + $0x78] sm:$0xff] }
  0x19   : > { %420 = vadd.xlane.f32.xlu2 %v369_v9  ;;  %416 = vadd.xlane.f32.xlu0 %v367_v10  ;;  %v364_v62 = vmul.f32 %v332_v60, %v332_v60  ;;  %v365_v63 = vmul.f32 %v333_v61, %v333_v61  ;;  %v1636_v3 = vld [vmem:[%s3011_s2 + $0x38] sm:$0xff]  ;;  %v1635_v5 = vld [vmem:[%s3011_s2 + $0x30] sm:$0xff]  ;;  %v1634_v10 = vld [vmem:[%s3011_s2 + $0x28] sm:$0xff] }
  0x1a   : > { %384 = vadd.xlane.f32.xlu1 %v351_v11  ;;  %v1644_v4 = vld [vmem:[%s3013_s4 + $0x38] sm:$0xff]  ;;  %914 = vmatpush.bf16.msra.mxu0 %v1636_v3  ;;  %v1643_v9 = vld [vmem:[%s3013_s4 + $0x30] sm:$0xff]  ;;  %v1642_v11 = vld [vmem:[%s3013_s4 + $0x28] sm:$0xff] }
  0x1b   : > { %1835 = vmatpush.bf16.msra.mxu2 %v1636_v3  ;;  %1135 = vmatpush.bf16.msra.mxu1 %v1644_v4 }
  0x1c   : > { %1843 = vmatpush.bf16.msra.mxu3 %v1644_v4 }
  0x1e   : > { %915 = vmatpush.bf16.msra.mxu0 %v1635_v5 }
  0x1f   : > { %1836 = vmatpush.bf16.msra.mxu2 %v1635_v5  ;;  %1136 = vmatpush.bf16.msra.mxu1 %v1643_v9 }
  0x20   : > { %1844 = vmatpush.bf16.msra.mxu3 %v1643_v9 }
  0x21   : > { %386 = vadd.xlane.f32.xlu0 %v352_v15  ;;  %422 = vadd.xlane.f32.xlu2 %v370_v16  ;;  %v1633_v15 = vld [vmem:[%s3011_s2 + $0x20] sm:$0xff] }
  0x22   : > { %388 = vadd.xlane.f32.xlu1 %v353_v17  ;;  %916 = vmatpush.bf16.msra.mxu0 %v1634_v10  ;;  %v1641_v16 = vld [vmem:[%s3013_s4 + $0x20] sm:$0xff]  ;;  %v1632_v17 = vld [vmem:[%s3011_s2 + $0x18] sm:$0xff] }
  0x23   : > { %1837 = vmatpush.bf16.msra.mxu2 %v1634_v10  ;;  %1137 = vmatpush.bf16.msra.mxu1 %v1642_v11 }
  0x24   : > { %1845 = vmatpush.bf16.msra.mxu3 %v1642_v11 }
  0x26   : > { %917 = vmatpush.bf16.msra.mxu0 %v1633_v15 }
  0x27   : > { %1838 = vmatpush.bf16.msra.mxu2 %v1633_v15  ;;  %1138 = vmatpush.bf16.msra.mxu1 %v1641_v16 }
  0x28   : > { %1846 = vmatpush.bf16.msra.mxu3 %v1641_v16 }
  0x29   : > { %424 = vadd.xlane.f32.xlu0 %v371_v21  ;;  %392 = vadd.xlane.f32.xlu2 %v355_v22  ;;  %v1640_v21 = vld [vmem:[%s3013_s4 + $0x18] sm:$0xff]  ;;  %v1631_v22 = vld [vmem:[%s3011_s2 + $0x10] sm:$0xff] }
  0x2a   : > { %390 = vadd.xlane.f32.xlu1 %v354_v23  ;;  %918 = vmatpush.bf16.msra.mxu0 %v1632_v17  ;;  %v1639_v23 = vld [vmem:[%s3013_s4 + $0x10] sm:$0xff] }
  0x2b   : > { %1839 = vmatpush.bf16.msra.mxu2 %v1632_v17  ;;  %1139 = vmatpush.bf16.msra.mxu1 %v1640_v21 }
  0x2c   : > { %1847 = vmatpush.bf16.msra.mxu3 %v1640_v21 }
  0x2e   : > { %919 = vmatpush.bf16.msra.mxu0 %v1631_v22 }
  0x2f   : > { %1840 = vmatpush.bf16.msra.mxu2 %v1631_v22  ;;  %1140 = vmatpush.bf16.msra.mxu1 %v1639_v23 }
  0x30   : > { %1848 = vmatpush.bf16.msra.mxu3 %v1639_v23 }
  0x31   : > { %426 = vadd.xlane.f32.xlu0 %v372_v27  ;;  %394 = vadd.xlane.f32.xlu2 %v356_v28  ;;  %v1630_v27 = vld [vmem:[%s3011_s2 + $0x8] sm:$0xff] }
  0x32   : > { %428 = vadd.xlane.f32.xlu1 %v373_v29  ;;  %v1638_v28 = vld [vmem:[%s3013_s4 + $0x8] sm:$0xff]  ;;  %920 = vmatpush.bf16.msra.mxu0 %v1630_v27  ;;  %v1629_v29 = vld [vmem:[%s3011_s2] sm:$0xff] }
  0x33   : > { %1841 = vmatpush.bf16.msra.mxu2 %v1630_v27  ;;  %1141 = vmatpush.bf16.msra.mxu1 %v1638_v28 }
  0x34   : > { %1849 = vmatpush.bf16.msra.mxu3 %v1638_v28 }
  0x36   : > { %921 = vmatpush.bf16.msra.mxu0 %v1629_v29 }
  0x37   : > { %1842 = vmatpush.bf16.msra.mxu2 %v1629_v29 }
  0x39   : > { %396 = vadd.xlane.f32.xlu0 %v357_v33  ;;  %432 = vadd.xlane.f32.xlu2 %v375_v34  ;;  %v1637_v33 = vld [vmem:[%s3013_s4] sm:$0xff] }
  0x3a   : > { %430 = vadd.xlane.f32.xlu1 %v374_v35  ;;  %1142 = vmatpush.bf16.msra.mxu1 %v1637_v33 }
  0x3b   : > { %1850 = vmatpush.bf16.msra.mxu3 %v1637_v33 }
  0x41   : > { %398 = vadd.xlane.f32.xlu0 %v358_v39  ;;  %434 = vadd.xlane.f32.xlu2 %v376_v40 }
  0x42   : > { %400 = vadd.xlane.f32.xlu1 %v359_v41 }
  0x49   : > { %436 = vadd.xlane.f32.xlu0 %v377_v45  ;;  %404 = vadd.xlane.f32.xlu2 %v361_v46 }
  0x4a   : > { %402 = vadd.xlane.f32.xlu1 %v360_v47 }
  0x51   : > { %438 = vadd.xlane.f32.xlu0 %v378_v51  ;;  %406 = vadd.xlane.f32.xlu2 %v362_v52 }
  0x52   : > { %440 = vadd.xlane.f32.xlu1 %v379_v53 }
  0x59   : > { %408 = vadd.xlane.f32.xlu0 %v363_v57  ;;  %444 = vadd.xlane.f32.xlu2 %v381_v58 }
  0x5a   : > { %442 = vadd.xlane.f32.xlu1 %v380_v59 }
  0x61   : > { %410 = vadd.xlane.f32.xlu0 %v364_v62 }
  0x62   : > { %412 = vadd.xlane.f32.xlu1 %v365_v63 }
  0x84   : > { %v419_v34 = vpop.xlane.xlu2 %418  ;;  %v415_v35 = vpop.xlane.xlu0 %414 }
  0x85   : > { %v2175_v39 = vmax.f32 %v415_v35, 1e-24  ;;  %v383_v40 = vpop.xlane.xlu1 %382  ;;  %v2181_v45 = vmax.f32 %v419_v34, 1e-24 }
  0x86   : > { %v2177_v41 = vmax.f32 %v383_v40, 1e-24 }
  0x87   : > { %1861 = vrsqrt.f32 %v2175_v39  ;;  %vm644_vm0 = vweird.f32 %v2175_v39  ;;  %vm664_vm14 = vweird.f32 %v2181_v45 }
  0x88   : > { %1863 = vrsqrt.f32 %v2177_v41  ;;  %vm484_vm1 = vweird.f32 %v2177_v41 }
  0x89   : > { %1865 = vrsqrt.f32 %v2181_v45 }
  0x8c   : > { %v421_v46 = vpop.xlane.xlu2 %420  ;;  %v417_v47 = vpop.xlane.xlu0 %416 }
  0x8d   : > { %v2183_v48 = vmax.f32 %v417_v47, 1e-24  ;;  %v385_v49 = vpop.xlane.xlu1 %384  ;;  %v2185_v50 = vpop.eup %1861  ;;  %v2187_v51 = vmax.f32 %v421_v46, 1e-24 }
  0x8e   : > { %v2189_v52 = vmax.f32 %v385_v49, 1e-24  ;;  %v2191_v53 = vpop.eup %1863  ;;  %v639_v54 = vmul.f32 %v2185_v50, %v2175_v39  ;;  %vm645_vm2 = vweird.f32 %v2185_v50 }
  0x8f   : > { %v479_v55 = vmul.f32 %v2191_v53, %v2177_v41  ;;  %1867 = vrsqrt.f32 %v2183_v48  ;;  %v2203_v60 = vpop.eup %1865  ;;  %vm485_vm3 = vweird.f32 %v2191_v53  ;;  %vm2261_vm8 = vmor %vm644_vm0, %vm645_vm2  ;;  %vm654_vm9 = vweird.f32 %v2183_v48 }
  0x90   : > { %v640_v56 = vmul.f32 %v2185_v50, %v639_v54  ;;  %1869 = vrsqrt.f32 %v2189_v52  ;;  %v659_v15 = vmul.f32 %v2203_v60, %v2181_v45  ;;  %vm2250_vm5 = vmor %vm484_vm1, %vm485_vm3  ;;  %vm494_vm6 = vweird.f32 %v2189_v52 }
  0x91   : > { %v480_v57 = vmul.f32 %v2191_v53, %v479_v55  ;;  %1871 = vrsqrt.f32 %v2187_v51  ;;  %vm674_vm12 = vweird.f32 %v2187_v51  ;;  %vm665_vm3 = vweird.f32 %v2203_v60 }
  0x92   : > { %v641_v61 = vmul.f32 0.5, %v640_v56  ;;  %v660_v29 = vmul.f32 %v2203_v60, %v659_v15 }
  0x93   : > { %v481_v62 = vmul.f32 0.5, %v480_v57 }
  0x94   : > { %v387_v58 = vpop.xlane.xlu0 %386  ;;  %v423_v59 = vpop.xlane.xlu2 %422  ;;  %v642_v17 = vsub.f32 1.5, %v641_v61 }
  0x95   : > { %v2205_v63 = vmax.f32 %v387_v58, 1e-24  ;;  %v389_v3 = vpop.xlane.xlu1 %388  ;;  %v2207_v4 = vpop.eup %1867  ;;  %v482_v21 = vsub.f32 1.5, %v481_v62  ;;  %v2227_v34 = vmax.f32 %v423_v59, 1e-24 }
  0x96   : > { %v2209_v5 = vmax.f32 %v389_v3, 1e-24  ;;  %v1870_v9 = vpop.eup %1869  ;;  %v649_v10 = vmul.f32 %v2207_v4, %v2183_v48  ;;  %v643_v55 = vmul.f32 %v2185_v50, %v642_v17  ;;  %vm655_vm4 = vweird.f32 %v2207_v4 }
  0x97   : > { %1873 = vrsqrt.f32 %v2205_v63  ;;  %v2214_v11 = vpop.eup %1871  ;;  %v489_v16 = vmul.f32 %v1870_v9, %v2189_v52  ;;  %v483_v54 = vmul.f32 %v2191_v53, %v482_v21  ;;  %vm495_vm7 = vweird.f32 %v1870_v9  ;;  %vm2271_vm10 = vmor %vm654_vm9, %vm655_vm4 }
  0x98   : > { %1875 = vrsqrt.f32 %v2209_v5  ;;  %v650_v22 = vmul.f32 %v2207_v4, %v649_v10  ;;  %v669_v27 = vmul.f32 %v2214_v11, %v2187_v51  ;;  %vm496_vm11 = vmor %vm494_vm6, %vm495_vm7  ;;  %vm675_vm13 = vweird.f32 %v2214_v11 }
  0x99   : > { %v490_v23 = vmul.f32 %v1870_v9, %v489_v16  ;;  %1877 = vrsqrt.f32 %v2227_v34  ;;  %v487_v21 = vsel %vm2250_vm5, %v2191_v53, %v483_v54  ;;  %vm504_vm15 = vweird.f32 %v2205_v63  ;;  %vm2312_vm4 = vmor %vm674_vm12, %vm675_vm13 }
  0x9a   : > { %v651_v28 = vmul.f32 0.5, %v650_v22  ;;  %v670_v62 = vmul.f32 %v2214_v11, %v669_v27  ;;  %vm514_vm1 = vweird.f32 %v2209_v5  ;;  %vm2353_vm7 = vmor %vm664_vm14, %vm665_vm3 }
  0x9b   : > { %v491_v33 = vmul.f32 0.5, %v490_v23  ;;  %v647_v23 = vsel %vm2261_vm8, %v2185_v50, %v643_v55  ;;  %v661_v55 = vmul.f32 0.5, %v660_v29  ;;  %vm684_vm8 = vweird.f32 %v2227_v34 }
  0x9c   : > { %v425_v35 = vpop.xlane.xlu0 %424  ;;  %v393_v40 = vpop.xlane.xlu2 %392  ;;  %v652_v47 = vsub.f32 1.5, %v651_v28  ;;  %v671_v27 = vmul.f32 0.5, %v670_v62 }
  0x9d   : > { %v2229_v46 = vpop.eup %1873  ;;  %v391_v49 = vpop.xlane.xlu1 %390  ;;  %v492_v57 = vsub.f32 1.5, %v491_v33  ;;  %v2238_v59 = vmax.f32 %v425_v35, 1e-24  ;;  %v2246_v10 = vmax.f32 %v393_v40, 1e-24 }
  0x9e   : > { %v2234_v56 = vpop.eup %1875  ;;  %v499_v58 = vmul.f32 %v2229_v46, %v2205_v63  ;;  %v2240_v61 = vmax.f32 %v391_v49, 1e-24  ;;  %v653_v48 = vmul.f32 %v2207_v4, %v652_v47  ;;  %v798_v49 = vmul.f32 %v487_v21, %v2006_v2 }
  0x9f   : > { %v509_v3 = vmul.f32 %v2234_v56, %v2209_v5  ;;  %v493_v39 = vmul.f32 %v1870_v9, %v492_v57  ;;  %v814_v47 = vmul.f32 %v647_v23, %v2003_v1  ;;  %v2290_v52 = vpop.eup %1877  ;;  %vm505_vm0 = vweird.f32 %v2229_v46 }
  0xa0   : > { %v500_v16 = vmul.f32 %v2229_v46, %v499_v58  ;;  %1879 = vrsqrt.f32 %v2240_v61  ;;  %v657_v35 = vsel %vm2271_vm10, %v2207_v4, %v653_v48  ;;  %v672_v4 = vsub.f32 1.5, %v671_v27  ;;  %vm2326_vm5 = vmor %vm504_vm15, %vm505_vm0 }
  0xa1   : > { %v510_v41 = vmul.f32 %v2234_v56, %v509_v3  ;;  %1881 = vrsqrt.f32 %v2238_v59  ;;  %v497_v33 = vsel %vm496_vm11, %v1870_v9, %v493_v39  ;;  %v815_v54 = vmul.f32 %v657_v35, %v2018_v7 }
  0xa2   : > { %1883 = vrsqrt.f32 %v2246_v10  ;;  %v501_v53 = vmul.f32 0.5, %v500_v16  ;;  %v799_v50 = vmul.f32 %v497_v33, %v2021_v8  ;;  %v662_v7 = vsub.f32 1.5, %v661_v55 }
  0xa3   : > { %v511_v28 = vmul.f32 0.5, %v510_v41  ;;  %v838_v58 = vpack.c.bf16 %v815_v54, %v814_v47  ;;  %vm515_vm2 = vweird.f32 %v2234_v56  ;;  %v679_v16 = vmul.f32 %v2290_v52, %v2227_v34 }
  0xa4   : > { %v427_v40 = vpop.xlane.xlu0 %426  ;;  %v830_v9 = vpack.c.bf16 %v799_v50, %v798_v49  ;;  %v502_v2 = vsub.f32 1.5, %v501_v53  ;;  %v395_v21 = vpop.xlane.xlu2 %394  ;;  %v673_v27 = vmul.f32 %v2214_v11, %v672_v4  ;;  %vm2339_vm6 = vmor %vm514_vm1, %vm515_vm2  ;;  %v663_v35 = vmul.f32 %v2203_v60, %v662_v7 }
  0xa5   : > { %v512_v8 = vsub.f32 1.5, %v511_v28  ;;  %962 = vmatmul.bf16.vlgmr.msra.gmra.mxu2 %v838_v58  ;;  %v429_v1 = vpop.xlane.xlu1 %428  ;;  %1183 = vmatmul.bf16.vlgmr.msra.gmra.mxu3 %v838_v58  ;;  %v2320_v41 = vmax.f32 %v427_v40, 1e-24  ;;  %v2346_v33 = vmax.f32 %v395_v21, 1e-24  ;;  %v680_v5 = vmul.f32 %v2290_v52, %v679_v16 }
  0xa6   : > { %v2292_v57 = vpop.eup %1879  ;;  %922 = vmatmul.bf16.vlgmr.msra.gmra.mxu0 %v830_v9  ;;  %1143 = vmatmul.bf16.vlgmr.msra.gmra.mxu1 %v830_v9  ;;  %v503_v23 = vmul.f32 %v2229_v46, %v502_v2  ;;  %v2343_v53 = vmax.f32 %v429_v1, 1e-24  ;;  %v677_v55 = vsel %vm2312_vm4, %v2214_v11, %v673_v27  ;;  %v667_v4 = vsel %vm2353_vm7, %v2203_v60, %v663_v35 }
  0xa7   : > { %v2295_v62 = vpop.eup %1881  ;;  %v519_v29 = vmul.f32 %v2292_v57, %v2240_v61  ;;  %v513_v48 = vmul.f32 %v2234_v56, %v512_v8  ;;  %1885 = vrsqrt.f32 %v2320_v41  ;;  %v817_v2 = vmul.f32 %v677_v55, %v2015_v6 }
  0xa8   : > { %v2298_v3 = vpop.eup %1883  ;;  %v689_v17 = vmul.f32 %v2295_v62, %v2238_v59  ;;  %v507_v54 = vsel %vm2326_vm5, %v2229_v46, %v503_v23  ;;  %1887 = vrsqrt.f32 %v2343_v53  ;;  %v681_v8 = vmul.f32 0.5, %v680_v5 }
  0xa9   : > { %v529_v51 = vmul.f32 %v2298_v3, %v2246_v10  ;;  %v520_v28 = vmul.f32 %v2292_v57, %v519_v29  ;;  %v517_v45 = vsel %vm2339_vm6, %v2234_v56, %v513_v48  ;;  %1889 = vrsqrt.f32 %v2346_v33 }
  0xaa   : > { %v690_v49 = vmul.f32 %v2295_v62, %v689_v17  ;;  %v800_v46 = vmul.f32 %v507_v54, %v2030_v12  ;;  %v801_v56 = vmul.f32 %v517_v45, %v2036_v14  ;;  %v816_v29 = vmul.f32 %v667_v4, %v2000_v0 }
  0xab   : > { %v530_v47 = vmul.f32 %v2298_v3, %v529_v51  ;;  %v521_v58 = vmul.f32 0.5, %v520_v28  ;;  %vm694_vm9 = vweird.f32 %v2238_v59  ;;  %vm685_vm10 = vweird.f32 %v2290_v52 }
  0xac   : > { %v397_v39 = vpop.xlane.xlu0 %396  ;;  %v691_v11 = vmul.f32 0.5, %v690_v49  ;;  %v831_v15 = vpack.c.bf16 %v801_v56, %v800_v46  ;;  %v839_v14 = vpack.c.bf16 %v817_v2, %v816_v29  ;;  %v433_v16 = vpop.xlane.xlu2 %432  ;;  %v682_v17 = vsub.f32 1.5, %v681_v8  ;;  %vm2400_vm14 = vmor %vm684_vm8, %vm685_vm10 }
  0xad   : > { %v2360_v50 = vmax.f32 %v397_v39, 1e-24  ;;  %v431_v9 = vpop.xlane.xlu1 %430  ;;  %v531_v1 = vmul.f32 0.5, %v530_v47  ;;  %v2381_v7 = vpop.eup %1885  ;;  %v522_v12 = vsub.f32 1.5, %v521_v58  ;;  %vm695_vm11 = vweird.f32 %v2295_v62 }
  0xae   : > { %v2386_v60 = vpop.eup %1887  ;;  %v692_v21 = vsub.f32 1.5, %v691_v11  ;;  %vm524_vm12 = vweird.f32 %v2240_v61  ;;  %vm525_vm13 = vweird.f32 %v2292_v57  ;;  %vm534_vm15 = vweird.f32 %v2246_v10  ;;  %vm2414_vm1 = vmor %vm694_vm9, %vm695_vm11 }
  0xaf   : > { %1891 = vrsqrt.f32 %v2360_v50  ;;  %v2389_v6 = vpop.eup %1889  ;;  %v532_v22 = vsub.f32 1.5, %v531_v1  ;;  %vm535_vm0 = vweird.f32 %v2298_v3  ;;  %v699_v39 = vmul.f32 %v2381_v7, %v2320_v41  ;;  %vm2429_vm2 = vmor %vm524_vm12, %vm525_vm13 }
  0xb0   : > { %v2408_v23 = vmax.f32 %v433_v16, 1e-24  ;;  %v709_v27 = vmul.f32 %v2386_v60, %v2343_v53  ;;  %v539_v63 = vmul.f32 %v2389_v6, %v2346_v33  ;;  %v2422_v28 = vmax.f32 %v431_v9, 1e-24  ;;  %vm2442_vm3 = vmor %vm534_vm15, %vm535_vm0 }
  0xb1   : > { %v523_v40 = vmul.f32 %v2292_v57, %v522_v12  ;;  %v533_v49 = vmul.f32 %v2298_v3, %v532_v22  ;;  %v683_v47 = vmul.f32 %v2290_v52, %v682_v17  ;;  %v693_v54 = vmul.f32 %v2295_v62, %v692_v21 }
  0xb2   : > { %v700_v55 = vmul.f32 %v2381_v7, %v699_v39  ;;  %1893 = vrsqrt.f32 %v2408_v23  ;;  %v710_v58 = vmul.f32 %v2386_v60, %v709_v27  ;;  %v540_v4 = vmul.f32 %v2389_v6, %v539_v63 }
  0xb3   : > { %1895 = vrsqrt.f32 %v2422_v28  ;;  %v527_v10 = vsel %vm2429_vm2, %v2292_v57, %v523_v40  ;;  %v537_v56 = vsel %vm2442_vm3, %v2298_v3, %v533_v49  ;;  %v687_v2 = vsel %vm2400_vm14, %v2290_v52, %v683_v47 }
  0xb4   : > { %v399_v48 = vpop.xlane.xlu0 %398  ;;  %v697_v8 = vsel %vm2414_vm1, %v2295_v62, %v693_v54  ;;  %v435_v11 = vpop.xlane.xlu2 %434  ;;  %v802_v57 = vmul.f32 %v527_v10, %v2051_v20  ;;  %v803_v1 = vmul.f32 %v537_v56, %v2048_v19  ;;  %v818_v29 = vmul.f32 %v687_v2, %v2033_v13 }
  0xb5   : > { %v2392_v0 = vpop.eup %1891  ;;  %967 = vmatmul.bf16.gmra.mxu2 %v839_v14  ;;  %1188 = vmatmul.bf16.gmra.mxu3 %v839_v14  ;;  %v401_v35 = vpop.xlane.xlu1 %400  ;;  %v2446_v61 = vmax.f32 %v399_v48, 1e-24  ;;  %v819_v3 = vmul.f32 %v697_v8, %v2045_v18  ;;  %v701_v52 = vmul.f32 0.5, %v700_v55  ;;  %v541_v14 = vmul.f32 0.5, %v540_v4 }
  0xb6   : > { %927 = vmatmul.bf16.gmra.mxu0 %v831_v15  ;;  %1148 = vmatmul.bf16.gmra.mxu1 %v831_v15  ;;  %v549_v5 = vmul.f32 %v2392_v0, %v2360_v50  ;;  %v2450_v9 = vmax.f32 %v401_v35, 1e-24  ;;  %v711_v15 = vmul.f32 0.5, %v710_v58  ;;  %vm704_vm4 = vweird.f32 %v2320_v41 }
  0xb7   : > { %1897 = vrsqrt.f32 %v2446_v61  ;;  %vm714_vm5 = vweird.f32 %v2343_v53  ;;  %vm705_vm6 = vweird.f32 %v2381_v7  ;;  %vm715_vm7 = vweird.f32 %v2386_v60 }
  0xb8   : > { %v550_v46 = vmul.f32 %v2392_v0, %v549_v5  ;;  %1899 = vrsqrt.f32 %v2450_v9  ;;  %v2474_v12 = vpop.eup %1893  ;;  %v832_v13 = vpack.c.bf16 %v803_v1, %v802_v57  ;;  %v840_v18 = vpack.c.bf16 %v819_v3, %v818_v29  ;;  %vm2490_vm10 = vmor %vm704_vm4, %vm705_vm6 }
  0xb9   : > { %v2476_v62 = vpop.eup %1895  ;;  %v702_v20 = vsub.f32 1.5, %v701_v52  ;;  %v712_v21 = vsub.f32 1.5, %v711_v15  ;;  %v542_v22 = vsub.f32 1.5, %v541_v14  ;;  %vm544_vm8 = vweird.f32 %v2346_v33  ;;  %vm2504_vm13 = vmor %vm714_vm5, %vm715_vm7 }
  0xba   : > { %v551_v16 = vmul.f32 0.5, %v550_v46  ;;  %vm545_vm9 = vweird.f32 %v2389_v6  ;;  %vm554_vm11 = vweird.f32 %v2360_v50  ;;  %vm555_vm12 = vweird.f32 %v2392_v0 }
  0xbb   : > { %v729_v34 = vmul.f32 %v2474_v12, %v2408_v23  ;;  %v2498_v27 = vmax.f32 %v435_v11, 1e-24  ;;  %v719_v35 = vmul.f32 %v2476_v62, %v2422_v28  ;;  %vm2520_vm14 = vmor %vm544_vm8, %vm545_vm9  ;;  %v543_v47 = vmul.f32 %v2389_v6, %v542_v22 }
  0xbc   : > { %v552_v51 = vsub.f32 1.5, %v551_v16  ;;  %v437_v39 = vpop.xlane.xlu0 %436  ;;  %v405_v49 = vpop.xlane.xlu2 %404  ;;  %v703_v45 = vmul.f32 %v2381_v7, %v702_v20  ;;  %v713_v55 = vmul.f32 %v2386_v60, %v712_v21  ;;  %vm2532_vm15 = vmor %vm554_vm11, %vm555_vm12  ;;  %vm734_vm0 = vweird.f32 %v2408_v23 }
  0xbd   : > { %v2480_v17 = vpop.eup %1897  ;;  %v403_v63 = vpop.xlane.xlu1 %402  ;;  %v2514_v5 = vmax.f32 %v437_v39, 1e-24  ;;  %v730_v4 = vmul.f32 %v2474_v12, %v729_v34  ;;  %1901 = vrsqrt.f32 %v2498_v27  ;;  %v2540_v10 = vmax.f32 %v405_v49, 1e-24 }
  0xbe   : > { %v2484_v19 = vpop.eup %1899  ;;  %v559_v40 = vmul.f32 %v2480_v17, %v2446_v61  ;;  %v553_v54 = vmul.f32 %v2392_v0, %v552_v51  ;;  %v2536_v33 = vmax.f32 %v403_v63, 1e-24  ;;  %v720_v46 = vmul.f32 %v2476_v62, %v719_v35 }
  0xbf   : > { %v569_v59 = vmul.f32 %v2484_v19, %v2450_v9  ;;  %1903 = vrsqrt.f32 %v2514_v5  ;;  %v547_v50 = vsel %vm2520_vm14, %v2389_v6, %v543_v47  ;;  %v707_v11 = vsel %vm2490_vm10, %v2381_v7, %v703_v45 }
  0xc0   : > { %v560_v56 = vmul.f32 %v2480_v17, %v559_v40  ;;  %v557_v8 = vsel %vm2532_vm15, %v2392_v0, %v553_v54  ;;  %v717_v57 = vsel %vm2504_vm13, %v2386_v60, %v713_v55  ;;  %1905 = vrsqrt.f32 %v2536_v33 }
  0xc1   : > { %v570_v2 = vmul.f32 %v2484_v19, %v569_v59  ;;  %1907 = vrsqrt.f32 %v2540_v10  ;;  %v804_v29 = vmul.f32 %v547_v50, %v2063_v25  ;;  %v805_v6 = vmul.f32 %v557_v8, %v2075_v30 }
  0xc2   : > { %v820_v3 = vmul.f32 %v707_v11, %v2060_v24  ;;  %v821_v0 = vmul.f32 %v717_v57, %v2066_v26  ;;  %v731_v7 = vmul.f32 0.5, %v730_v4  ;;  %v721_v15 = vmul.f32 0.5, %v720_v46 }
  0xc3   : > { %v2564_v52 = vpop.eup %1901  ;;  %v561_v14 = vmul.f32 0.5, %v560_v56  ;;  %v571_v16 = vmul.f32 0.5, %v570_v2  ;;  %vm724_vm1 = vweird.f32 %v2422_v28  ;;  %vm735_vm2 = vweird.f32 %v2474_v12 }
  0xc4   : > { %v439_v1 = vpop.xlane.xlu0 %438  ;;  %vm725_vm3 = vweird.f32 %v2476_v62  ;;  %v833_v24 = vpack.c.bf16 %v805_v6, %v804_v29  ;;  %v841_v25 = vpack.c.bf16 %v821_v0, %v820_v3  ;;  %v732_v30 = vsub.f32 1.5, %v731_v7  ;;  %v407_v22 = vpop.xlane.xlu2 %406  ;;  %vm2580_vm6 = vmor %vm734_vm0, %vm735_vm2 }
  0xc5   : > { %972 = vmatmul.bf16.gmra.mxu2 %v840_v18  ;;  %1193 = vmatmul.bf16.gmra.mxu3 %v840_v18  ;;  %v2566_v60 = vpop.eup %1903  ;;  %v722_v18 = vsub.f32 1.5, %v721_v15  ;;  %v562_v20 = vsub.f32 1.5, %v561_v14  ;;  %v572_v21 = vsub.f32 1.5, %v571_v16  ;;  %vm564_vm4 = vweird.f32 %v2446_v61  ;;  %v441_v34 = vpop.xlane.xlu1 %440  ;;  %vm2594_vm9 = vmor %vm724_vm1, %vm725_vm3 }
  0xc6   : > { %932 = vmatmul.bf16.gmra.mxu0 %v832_v13  ;;  %1153 = vmatmul.bf16.gmra.mxu1 %v832_v13  ;;  %v2570_v13 = vpop.eup %1905  ;;  %vm565_vm5 = vweird.f32 %v2480_v17  ;;  %vm574_vm7 = vweird.f32 %v2450_v9  ;;  %vm575_vm8 = vweird.f32 %v2484_v19  ;;  %v2588_v48 = vmax.f32 %v439_v1, 1e-24 }
  0xc7   : > { %v2574_v26 = vpop.eup %1907  ;;  %v579_v39 = vmul.f32 %v2570_v13, %v2536_v33  ;;  %v739_v41 = vmul.f32 %v2564_v52, %v2498_v27  ;;  %v749_v35 = vmul.f32 %v2566_v60, %v2514_v5  ;;  %v2604_v59 = vmax.f32 %v407_v22, 1e-24  ;;  %vm2610_vm10 = vmor %vm564_vm4, %vm565_vm5 }
  0xc8   : > { %v589_v40 = vmul.f32 %v2574_v26, %v2540_v10  ;;  %v563_v49 = vmul.f32 %v2480_v17, %v562_v20  ;;  %v573_v53 = vmul.f32 %v2484_v19, %v572_v21  ;;  %v723_v47 = vmul.f32 %v2476_v62, %v722_v18  ;;  %vm2622_vm11 = vmor %vm574_vm7, %vm575_vm8 }
  0xc9   : > { %v733_v54 = vmul.f32 %v2474_v12, %v732_v30  ;;  %v580_v55 = vmul.f32 %v2570_v13, %v579_v39  ;;  %1909 = vrsqrt.f32 %v2588_v48  ;;  %v2630_v58 = vmax.f32 %v441_v34, 1e-24  ;;  %v1928_v39 = vld [vmem:[%s1997_s30 + $0xe8] sm:$0xff] }
  0xca   : > { %v740_v4 = vmul.f32 %v2564_v52, %v739_v41  ;;  %v750_v46 = vmul.f32 %v2566_v60, %v749_v35  ;;  %v590_v56 = vmul.f32 %v2574_v26, %v589_v40  ;;  %1911 = vrsqrt.f32 %v2604_v59 }
  0xcb   : > { %v567_v9 = vsel %vm2610_vm10, %v2480_v17, %v563_v49  ;;  %v577_v2 = vsel %vm2622_vm11, %v2484_v19, %v573_v53  ;;  %v727_v50 = vsel %vm2594_vm9, %v2476_v62, %v723_v47  ;;  %v737_v8 = vsel %vm2580_vm6, %v2474_v12, %v733_v54 }
  0xcc   : > { %v409_v63 = vpop.xlane.xlu0 %408  ;;  %v581_v11 = vmul.f32 0.5, %v580_v55  ;;  %v806_v17 = vmul.f32 %v567_v9, %v2090_v36  ;;  %v807_v1 = vmul.f32 %v577_v2, %v2096_v38  ;;  %v822_v19 = vmul.f32 %v727_v50, %v2081_v32 }
  0xcd   : > { %v2626_v61 = vmax.f32 %v409_v63, 1e-24  ;;  %v443_v57 = vpop.xlane.xlu1 %442  ;;  %v823_v29 = vmul.f32 %v737_v8, %v2078_v31  ;;  %v741_v62 = vmul.f32 0.5, %v740_v4  ;;  %v751_v3 = vmul.f32 0.5, %v750_v46 }
  0xce   : > { %v591_v0 = vmul.f32 0.5, %v590_v56  ;;  %vm744_vm12 = vweird.f32 %v2498_v27  ;;  %vm754_vm13 = vweird.f32 %v2514_v5  ;;  %vm745_vm14 = vweird.f32 %v2564_v52  ;;  %v1925_v27 = vld [vmem:[%s1997_s30 + $0x60] sm:$0xff] }
  0xcf   : > { %1913 = vrsqrt.f32 %v2626_v61  ;;  %v2654_v6 = vpop.eup %1909  ;;  %v582_v36 = vsub.f32 1.5, %v581_v11  ;;  %v834_v38 = vpack.c.bf16 %v807_v1, %v806_v17  ;;  %v842_v32 = vpack.c.bf16 %v823_v29, %v822_v19  ;;  %vm2674_vm2 = vmor %vm744_vm12, %vm745_vm14 }
  0xd0   : > { %1915 = vrsqrt.f32 %v2630_v58  ;;  %v2656_v12 = vpop.eup %1911  ;;  %v742_v31 = vsub.f32 1.5, %v741_v62  ;;  %v752_v14 = vsub.f32 1.5, %v751_v3  ;;  %vm755_vm15 = vweird.f32 %v2566_v60 }
  0xd1   : > { %v592_v16 = vsub.f32 1.5, %v591_v0  ;;  %vm584_vm0 = vweird.f32 %v2536_v33  ;;  %vm585_vm1 = vweird.f32 %v2570_v13  ;;  %vm594_vm3 = vweird.f32 %v2540_v10  ;;  %vm2688_vm5 = vmor %vm754_vm13, %vm755_vm15 }
  0xd2   : > { %vm595_vm4 = vweird.f32 %v2574_v26  ;;  %v599_v18 = vmul.f32 %v2656_v12, %v2604_v59  ;;  %v583_v51 = vmul.f32 %v2570_v13, %v582_v36  ;;  %vm2699_vm6 = vmor %vm584_vm0, %vm585_vm1  ;;  %v743_v23 = vmul.f32 %v2564_v52, %v742_v31 }
  0xd3   : > { %v593_v63 = vmul.f32 %v2574_v26, %v592_v16  ;;  %v753_v41 = vmul.f32 %v2566_v60, %v752_v14  ;;  %vm2712_vm7 = vmor %vm594_vm3, %vm595_vm4  ;;  %v2717_v40 = vmax.f32 %v443_v57, 1e-24  ;;  %vm764_vm8 = vweird.f32 %v2588_v48 }
  0xd4   : > { %v411_v22 = vpop.xlane.xlu0 %410  ;;  %v600_v28 = vmul.f32 %v2656_v12, %v599_v18  ;;  %v587_v10 = vsel %vm2699_vm6, %v2570_v13, %v583_v51  ;;  %v747_v55 = vsel %vm2674_vm2, %v2564_v52, %v743_v23  ;;  %vm765_vm9 = vweird.f32 %v2654_v6  ;;  %v1927_v51 = vld [vmem:[%s1997_s30 + $0xe0] sm:$0xff] }
  0xd5   : > { %977 = vmatmul.bf16.gmra.mxu2 %v841_v25  ;;  %1198 = vmatmul.bf16.gmra.mxu3 %v841_v25  ;;  %v2660_v7 = vpop.eup %1913  ;;  %v445_v25 = vpop.xlane.xlu2 %444  ;;  %v2721_v53 = vmax.f32 %v411_v22, 1e-24  ;;  %v597_v45 = vsel %vm2712_vm7, %v2574_v26, %v593_v63  ;;  %v757_v4 = vsel %vm2688_vm5, %v2566_v60, %v753_v41  ;;  %v808_v13 = vmul.f32 %v587_v10, %v2111_v44  ;;  %vm2764_vm14 = vmor %vm764_vm8, %vm765_vm9 }
  0xd6   : > { %937 = vmatmul.bf16.gmra.mxu0 %v833_v24  ;;  %1158 = vmatmul.bf16.gmra.mxu1 %v833_v24  ;;  %v2663_v15 = vpop.eup %1915  ;;  %v759_v24 = vmul.f32 %v2654_v6, %v2588_v48  ;;  %v609_v20 = vmul.f32 %v2660_v7, %v2626_v61  ;;  %v2703_v34 = vmax.f32 %v445_v25, 1e-24  ;;  %v413_v5 = vpop.xlane.xlu1 %412  ;;  %v601_v56 = vmul.f32 0.5, %v600_v28 }
  0xd7   : > { %v769_v21 = vmul.f32 %v2663_v15, %v2630_v58  ;;  %v2724_v54 = vmax.f32 %v413_v5, 1e-24  ;;  %v809_v26 = vmul.f32 %v597_v45, %v2108_v43  ;;  %v824_v2 = vmul.f32 %v747_v55, %v2093_v37 }
  0xd8   : > { %v760_v33 = vmul.f32 %v2654_v6, %v759_v24  ;;  %v610_v49 = vmul.f32 %v2660_v7, %v609_v20  ;;  %1917 = vrsqrt.f32 %v2703_v34  ;;  %v825_v52 = vmul.f32 %v757_v4, %v2105_v42 }
  0xd9   : > { %v770_v47 = vmul.f32 %v2663_v15, %v769_v21  ;;  %1919 = vrsqrt.f32 %v2717_v40  ;;  %v602_v57 = vsub.f32 1.5, %v601_v56  ;;  %v835_v17 = vpack.c.bf16 %v809_v26, %v808_v13  ;;  %v1926_v21 = vld [vmem:[%s1997_s30 + $0x68] sm:$0xff]  ;;  %v1930_v26 = vld [vmem:[%s1997_s30 + $0x78] sm:$0xff] }
  0xda   : > { %v761_v46 = vmul.f32 0.5, %v760_v33  ;;  %v611_v9 = vmul.f32 0.5, %v610_v49  ;;  %1921 = vrsqrt.f32 %v2721_v53  ;;  %v843_v1 = vpack.c.bf16 %v825_v52, %v824_v2  ;;  %v1931_v52 = vld [vmem:[%s1997_s30 + $0xf0] sm:$0xff] }
  0xdb   : > { %1923 = vrsqrt.f32 %v2724_v54  ;;  %v771_v50 = vmul.f32 0.5, %v770_v47  ;;  %vm604_vm10 = vweird.f32 %v2604_v59  ;;  %vm605_vm11 = vweird.f32 %v2656_v12 }
  0xdc   : > { %v762_v60 = vsub.f32 1.5, %v761_v46  ;;  %v612_v44 = vsub.f32 1.5, %v611_v9  ;;  %vm614_vm12 = vweird.f32 %v2626_v61  ;;  %vm615_vm13 = vweird.f32 %v2660_v7  ;;  %vm2770_vm1 = vmor %vm604_vm10, %vm605_vm11  ;;  %v1929_v9 = vld [vmem:[%s1997_s30 + $0x70] sm:$0xff] }
  0xdd   : > { %v772_v43 = vsub.f32 1.5, %v771_v50  ;;  %vm774_vm15 = vweird.f32 %v2630_v58  ;;  %vm775_vm0 = vweird.f32 %v2663_v15  ;;  %v603_v29 = vmul.f32 %v2656_v12, %v602_v57  ;;  %vm2779_vm2 = vmor %vm614_vm12, %vm615_vm13 }
  0xde   : > { %v2746_v8 = vpop.eup %1917  ;;  %v613_v48 = vmul.f32 %v2660_v7, %v612_v44  ;;  %v763_v62 = vmul.f32 %v2654_v6, %v762_v60  ;;  %vm2790_vm3 = vmor %vm774_vm15, %vm775_vm0  ;;  %vm794_vm4 = vweird.f32 %v2703_v34  ;;  %vm784_vm5 = vweird.f32 %v2717_v40  ;;  %v1932_v60 = vld [vmem:[%s1997_s30 + $0xf8] sm:$0xff] }
  0xdf   : > { %v2750_v11 = vpop.eup %1919  ;;  %v789_v61 = vmul.f32 %v2746_v8, %v2703_v34  ;;  %v607_v14 = vsel %vm2770_vm1, %v2656_v12, %v603_v29  ;;  %vm795_vm6 = vweird.f32 %v2746_v8  ;;  %vm624_vm8 = vweird.f32 %v2721_v53 }
  0xe0   : > { %v2752_v19 = vpop.eup %1921  ;;  %v779_v3 = vmul.f32 %v2750_v11, %v2717_v40  ;;  %v617_v16 = vsel %vm2779_vm2, %v2660_v7, %v613_v48  ;;  %v767_v24 = vsel %vm2764_vm14, %v2654_v6, %v763_v62  ;;  %v810_v12 = vmul.f32 %v1925_v27, %v607_v14  ;;  %vm2820_vm10 = vmor %vm794_vm4, %vm795_vm6 }
  0xe1   : > { %v2756_v37 = vpop.eup %1923  ;;  %v619_v0 = vmul.f32 %v2752_v19, %v2721_v53  ;;  %v790_v31 = vmul.f32 %v2746_v8, %v789_v61  ;;  %v811_v22 = vmul.f32 %v1926_v21, %v617_v16  ;;  %v826_v7 = vmul.f32 %v1927_v51, %v767_v24 }
  0xe2   : > { %v629_v36 = vmul.f32 %v2756_v37, %v2724_v54  ;;  %v780_v25 = vmul.f32 %v2750_v11, %v779_v3  ;;  %vm785_vm7 = vweird.f32 %v2750_v11  ;;  %vm625_vm9 = vweird.f32 %v2752_v19 }
  0xe3   : > { %v620_v30 = vmul.f32 %v2752_v19, %v619_v0  ;;  %v791_v63 = vmul.f32 0.5, %v790_v31  ;;  %vm634_vm11 = vweird.f32 %v2724_v54  ;;  %vm635_vm12 = vweird.f32 %v2756_v37  ;;  %vm2830_vm13 = vmor %vm784_vm5, %vm785_vm7  ;;  %v1321_v31 = vld [vmem:[%s2867_s8 + $0x8] sm:$0xff] }
  0xe4   : > { %v630_v18 = vmul.f32 %v2756_v37, %v629_v36  ;;  %v781_v6 = vmul.f32 0.5, %v780_v25  ;;  %vm626_vm14 = vmor %vm624_vm8, %vm625_vm9  ;;  %v1320_v36 = vld [vmem:[%s2867_s8] sm:$0xff] }
  0xe5   : > { %982 = vmatmul.bf16.gmra.mxu2 %v842_v32  ;;  %1203 = vmatmul.bf16.gmra.mxu3 %v842_v32  ;;  %v621_v23 = vmul.f32 0.5, %v620_v30  ;;  %v792_v33 = vsub.f32 1.5, %v791_v63  ;;  %vm636_vm15 = vmor %vm634_vm11, %vm635_vm12 }
  0xe6   : > { %942 = vmatmul.bf16.gmra.mxu0 %v834_v38  ;;  %1163 = vmatmul.bf16.gmra.mxu1 %v834_v38  ;;  %v773_v38 = vmul.f32 %v2663_v15, %v772_v43  ;;  %v631_v41 = vmul.f32 0.5, %v630_v18  ;;  %v782_v28 = vsub.f32 1.5, %v781_v6  ;;  %v2859_v43 = vld [vmem:[%s3012_s3] ss:$0 sm:$0xff]  ;;  %v1337_v6 = vld [vmem:[%s2867_s8 + $0x88] sm:$0xff] }
  0xe7   : > { %v622_v49 = vsub.f32 1.5, %v621_v23  ;;  %v793_v55 = vmul.f32 %v2746_v8, %v792_v33 }
  0xe8   : > { %v777_v20 = vsel %vm2790_vm3, %v2663_v15, %v773_v38  ;;  %v836_v15 = vpack.c.bf16 %v811_v22, %v810_v12  ;;  %v632_v47 = vsub.f32 1.5, %v631_v41  ;;  %v783_v45 = vmul.f32 %v2750_v11, %v782_v28 }
  0xe9   : > { %v827_v5 = vmul.f32 %v1928_v39, %v777_v20  ;;  %v623_v10 = vmul.f32 %v2752_v19, %v622_v49  ;;  %v797_v56 = vsel %vm2820_vm10, %v2746_v8, %v793_v55  ;;  %v2853_v8 = vld [vmem:[%s3014_s5] ss:$0 sm:$0xff] }
  0xea   : > { %v633_v54 = vmul.f32 %v2756_v37, %v632_v47  ;;  %v787_v46 = vsel %vm2830_vm13, %v2750_v11, %v783_v45  ;;  %v829_v57 = vmul.f32 %v1932_v60, %v797_v56 }
  0xeb   : > { %v844_v35 = vpack.c.bf16 %v827_v5, %v826_v7  ;;  %v627_v4 = vsel %vm626_vm14, %v2752_v19, %v623_v10  ;;  %v828_v50 = vmul.f32 %v1931_v52, %v787_v46  ;;  %v1336_v5 = vld [vmem:[%s2867_s8 + $0x80] sm:$0xff] }
  0xec   : > { %v637_v40 = vsel %vm636_vm15, %v2756_v37, %v633_v54  ;;  %v812_v13 = vmul.f32 %v1929_v9, %v627_v4  ;;  %v1323_v9 = vld [vmem:[%s2867_s8 + $0x18] sm:$0xff] }
  0xed   : > { %v813_v2 = vmul.f32 %v1930_v26, %v637_v40  ;;  %v1322_v40 = vld [vmem:[%s2867_s8 + $0x10] sm:$0xff] }
  0xef   : > { %v837_v44 = vpack.c.bf16 %v813_v2, %v812_v13 }
  0xf5   : > { %987 = vmatmul.bf16.gmra.mxu2 %v843_v1  ;;  %1208 = vmatmul.bf16.gmra.mxu3 %v843_v1 }
  0xf6   : > { %947 = vmatmul.bf16.gmra.mxu0 %v835_v17  ;;  %1168 = vmatmul.bf16.gmra.mxu1 %v835_v17  ;;  %v845_v17 = vpack.c.bf16 %v829_v57, %v828_v50 }
 0x105   : > { %992 = vmatmul.bf16.gmra.mxu2 %v844_v35  ;;  %1213 = vmatmul.bf16.gmra.mxu3 %v844_v35 }
 0x106   : > { %952 = vmatmul.bf16.gmra.mxu0 %v836_v15  ;;  %1173 = vmatmul.bf16.gmra.mxu1 %v836_v15 }
 0x115   : > { %997 = vmatmul.bf16.gmra.mxu2 %v845_v17  ;;  %1218 = vmatmul.bf16.gmra.mxu3 %v845_v17 }
 0x116   : > { %957 = vmatmul.bf16.gmra.mxu0 %v837_v44  ;;  %1178 = vmatmul.bf16.gmra.mxu1 %v837_v44 }
 0x123   : > { %v923_v11 = vpop.f32.mrf.mxu0  ;;  %v1144_v1 = vpop.f32.mrf.mxu1 }
 0x124   : > { %v1145_v19 = vadd.f32 %v2853_v8, %v1144_v1  ;;  %v924_v29 = vadd.f32 %v2859_v43, %v923_v11 }
 0x126   : > { %v1256_v42 = vmul.f32 0.01, %v1145_v19  ;;  %vm1224_vm0 = vcmp.ge.f32.partialorder %v1145_v19, 0.0 }
 0x128   : > { %v963_v37 = vpop.f32.mrf.mxu2  ;;  %v1184_v59 = vpop.f32.mrf.mxu3  ;;  %v1288_v0 = vsel %vm1224_vm0, %v1145_v19, %v1256_v42 }
 0x129   : > { %v1185_v58 = vadd.f32 %v2853_v8, %v1184_v59  ;;  %v1352_v14 = vadd.f32 %v1320_v36, %v1288_v0  ;;  %v964_v30 = vadd.f32 %v2859_v43, %v963_v37  ;;  %v1338_v59 = vld [vmem:[%s2867_s8 + $0x90] sm:$0xff] }
 0x12b   : > { %v925_v61 = vpop.f32.mrf.mxu0  ;;  %v1146_v62 = vpop.f32.mrf.mxu1  ;;  %v1272_v16 = vmul.f32 0.01, %v1185_v58  ;;  %vm1240_vm2 = vcmp.ge.f32.partialorder %v1185_v58, 0.0 }
 0x12c   : > { %v926_v48 = vadd.f32 %v2859_v43, %v925_v61  ;;  %v1147_v3 = vadd.f32 %v2853_v8, %v1146_v62 }
 0x12d   : > { %v1304_v39 = vsel %vm1240_vm2, %v1185_v58, %v1272_v16 }
 0x12e   : > { %v1648_v38 = vpack.c.bf16 %v926_v48, %v924_v29  ;;  %vm1225_vm1 = vcmp.ge.f32.partialorder %v1147_v3, 0.0  ;;  %v1257_v32 = vmul.f32 0.01, %v1147_v3  ;;  %v1368_v15 = vadd.f32 %v1336_v5, %v1304_v39  ;;  %v1339_v29 = vld [vmem:[%s2867_s8 + $0x98] sm:$0xff] }
 0x130   : > { %1649 = vst [vmem:[%s2875_s26] sm:$0xff] %v1648_v38   ;;  %v1289_v24 = vsel %vm1225_vm1, %v1147_v3, %v1257_v32  ;;  %v965_v25 = vpop.f32.mrf.mxu2  ;;  %v1186_v27 = vpop.f32.mrf.mxu3 }
 0x131   : > { %v1353_v18 = vadd.f32 %v1321_v31, %v1289_v24  ;;  %v966_v20 = vadd.f32 %v2859_v43, %v965_v25  ;;  %v1187_v12 = vadd.f32 %v2853_v8, %v1186_v27 }
 0x133   : > { %v928_v21 = vpop.f32.mrf.mxu0  ;;  %v1728_v22 = vpack.c.bf16 %v1353_v18, %v1352_v14  ;;  %v1688_v51 = vpack.c.bf16 %v966_v20, %v964_v30  ;;  %v1149_v7 = vpop.f32.mrf.mxu1  ;;  %vm1241_vm3 = vcmp.ge.f32.partialorder %v1187_v12, 0.0  ;;  %v1273_v63 = vmul.f32 0.01, %v1187_v12  ;;  %v1324_v20 = vld [vmem:[%s2867_s8 + $0x20] sm:$0xff] }
 0x134   : > { %v1150_v23 = vadd.f32 %v2853_v8, %v1149_v7  ;;  %v929_v53 = vadd.f32 %v2859_v43, %v928_v21  ;;  %v1325_v21 = vld [vmem:[%s2867_s8 + $0x28] sm:$0xff] }
 0x135   : > { %1729 = vst [vmem:[%s2886_s12] sm:$0xff] %v1728_v22   ;;  %v1305_v41 = vsel %vm1241_vm3, %v1187_v12, %v1273_v63 }
 0x136   : > { %1812 = vst [vmem:[%s2875_s26 + $0x40] sm:$0xff] %v1688_v51   ;;  %v1369_v35 = vadd.f32 %v1337_v6, %v1305_v41  ;;  %v1258_v49 = vmul.f32 0.01, %v1150_v23  ;;  %vm1226_vm4 = vcmp.ge.f32.partialorder %v1150_v23, 0.0 }
 0x138   : > { %v968_v33 = vpop.f32.mrf.mxu2  ;;  %v1768_v28 = vpack.c.bf16 %v1369_v35, %v1368_v15  ;;  %v1189_v47 = vpop.f32.mrf.mxu3  ;;  %v1290_v4 = vsel %vm1226_vm4, %v1150_v23, %v1258_v49 }
 0x139   : > { %v1190_v45 = vadd.f32 %v2853_v8, %v1189_v47  ;;  %v1354_v13 = vadd.f32 %v1322_v40, %v1290_v4  ;;  %v969_v50 = vadd.f32 %v2859_v43, %v968_v33  ;;  %v1340_v47 = vld [vmem:[%s2867_s8 + $0xa0] sm:$0xff] }
 0x13a   : > { %1827 = vst [vmem:[%s2886_s12 + $0x40] sm:$0xff] %v1768_v28  }
 0x13b   : > { %v930_v34 = vpop.f32.mrf.mxu0  ;;  %v1151_v54 = vpop.f32.mrf.mxu1  ;;  %v1274_v26 = vmul.f32 0.01, %v1190_v45  ;;  %vm1242_vm6 = vcmp.ge.f32.partialorder %v1190_v45, 0.0 }
 0x13c   : > { %v931_v10 = vadd.f32 %v2859_v43, %v930_v34  ;;  %v1152_v55 = vadd.f32 %v2853_v8, %v1151_v54 }
 0x13d   : > { %v1306_v42 = vsel %vm1242_vm6, %v1190_v45, %v1274_v26 }
 0x13e   : > { %v1653_v46 = vpack.c.bf16 %v931_v10, %v929_v53  ;;  %vm1227_vm5 = vcmp.ge.f32.partialorder %v1152_v55, 0.0  ;;  %v1259_v56 = vmul.f32 0.01, %v1152_v55  ;;  %v1370_v58 = vadd.f32 %v1338_v59, %v1306_v42  ;;  %v1341_v53 = vld [vmem:[%s2867_s8 + $0xa8] sm:$0xff] }
 0x140   : > { %1805 = vst [vmem:[%s2875_s26 + $0x8] sm:$0xff] %v1653_v46   ;;  %v1291_v2 = vsel %vm1227_vm5, %v1152_v55, %v1259_v56  ;;  %v970_v52 = vpop.f32.mrf.mxu2  ;;  %v1191_v44 = vpop.f32.mrf.mxu3 }
 0x141   : > { %v1355_v60 = vadd.f32 %v1323_v9, %v1291_v2  ;;  %v971_v57 = vadd.f32 %v2859_v43, %v970_v52  ;;  %v1192_v17 = vadd.f32 %v2853_v8, %v1191_v44 }
 0x143   : > { %v933_v11 = vpop.f32.mrf.mxu0  ;;  %v1733_v1 = vpack.c.bf16 %v1355_v60, %v1354_v13  ;;  %v1693_v19 = vpack.c.bf16 %v971_v57, %v969_v50  ;;  %v1154_v37 = vpop.f32.mrf.mxu1  ;;  %vm1243_vm7 = vcmp.ge.f32.partialorder %v1192_v17, 0.0  ;;  %v1275_v61 = vmul.f32 0.01, %v1192_v17  ;;  %v1326_v57 = vld [vmem:[%s2867_s8 + $0x30] sm:$0xff] }
 0x144   : > { %v1155_v48 = vadd.f32 %v2853_v8, %v1154_v37  ;;  %v934_v14 = vadd.f32 %v2859_v43, %v933_v11  ;;  %v1327_v11 = vld [vmem:[%s2867_s8 + $0x38] sm:$0xff] }
 0x145   : > { %1820 = vst [vmem:[%s2886_s12 + $0x8] sm:$0xff] %v1733_v1   ;;  %v1307_v62 = vsel %vm1243_vm7, %v1192_v17, %v1275_v61 }
 0x146   : > { %1813 = vst [vmem:[%s2875_s26 + $0x48] sm:$0xff] %v1693_v19   ;;  %v1371_v3 = vadd.f32 %v1339_v29, %v1307_v62  ;;  %v1260_v38 = vmul.f32 0.01, %v1155_v48  ;;  %vm1228_vm8 = vcmp.ge.f32.partialorder %v1155_v48, 0.0 }
 0x148   : > { %v973_v0 = vpop.f32.mrf.mxu2  ;;  %v1773_v36 = vpack.c.bf16 %v1371_v3, %v1370_v58  ;;  %v1194_v32 = vpop.f32.mrf.mxu3  ;;  %v1292_v18 = vsel %vm1228_vm8, %v1155_v48, %v1260_v38 }
 0x149   : > { %v1195_v25 = vadd.f32 %v2853_v8, %v1194_v32  ;;  %v1356_v22 = vadd.f32 %v1324_v20, %v1292_v18  ;;  %v974_v5 = vadd.f32 %v2859_v43, %v973_v0  ;;  %v1342_v32 = vld [vmem:[%s2867_s8 + $0xb0] sm:$0xff] }
 0x14a   : > { %1828 = vst [vmem:[%s2886_s12 + $0x48] sm:$0xff] %v1773_v36  }
 0x14b   : > { %v935_v31 = vpop.f32.mrf.mxu0  ;;  %v1156_v24 = vpop.f32.mrf.mxu1  ;;  %v1276_v51 = vmul.f32 0.01, %v1195_v25  ;;  %vm1244_vm10 = vcmp.ge.f32.partialorder %v1195_v25, 0.0 }
 0x14c   : > { %v936_v16 = vadd.f32 %v2859_v43, %v935_v31  ;;  %v1157_v30 = vadd.f32 %v2853_v8, %v1156_v24 }
 0x14d   : > { %v1308_v49 = vsel %vm1244_vm10, %v1195_v25, %v1276_v51 }
 0x14e   : > { %v1658_v27 = vpack.c.bf16 %v936_v16, %v934_v14  ;;  %vm1229_vm9 = vcmp.ge.f32.partialorder %v1157_v30, 0.0  ;;  %v1261_v12 = vmul.f32 0.01, %v1157_v30  ;;  %v1372_v45 = vadd.f32 %v1340_v47, %v1308_v49  ;;  %v1343_v14 = vld [vmem:[%s2867_s8 + $0xb8] sm:$0xff] }
 0x150   : > { %1806 = vst [vmem:[%s2875_s26 + $0x10] sm:$0xff] %v1658_v27   ;;  %v1293_v7 = vsel %vm1229_vm9, %v1157_v30, %v1261_v12  ;;  %v975_v39 = vpop.f32.mrf.mxu2  ;;  %v1196_v23 = vpop.f32.mrf.mxu3 }
 0x151   : > { %v1357_v63 = vadd.f32 %v1325_v21, %v1293_v7  ;;  %v976_v6 = vadd.f32 %v2859_v43, %v975_v39  ;;  %v1197_v41 = vadd.f32 %v2853_v8, %v1196_v23 }
 0x153   : > { %v938_v15 = vpop.f32.mrf.mxu0  ;;  %v1738_v35 = vpack.c.bf16 %v1357_v63, %v1356_v22  ;;  %v1698_v33 = vpack.c.bf16 %v976_v6, %v974_v5  ;;  %v1159_v28 = vpop.f32.mrf.mxu1  ;;  %vm1245_vm11 = vcmp.ge.f32.partialorder %v1197_v41, 0.0  ;;  %v1277_v34 = vmul.f32 0.01, %v1197_v41  ;;  %v1328_v6 = vld [vmem:[%s2867_s8 + $0x40] sm:$0xff] }
 0x154   : > { %v1160_v10 = vadd.f32 %v2853_v8, %v1159_v28  ;;  %v939_v13 = vadd.f32 %v2859_v43, %v938_v15  ;;  %v1329_v15 = vld [vmem:[%s2867_s8 + $0x48] sm:$0xff] }
 0x155   : > { %1821 = vst [vmem:[%s2886_s12 + $0x10] sm:$0xff] %v1738_v35   ;;  %v1309_v54 = vsel %vm1245_vm11, %v1197_v41, %v1277_v34 }
 0x156   : > { %1814 = vst [vmem:[%s2875_s26 + $0x50] sm:$0xff] %v1698_v33   ;;  %v1373_v55 = vadd.f32 %v1341_v53, %v1309_v54  ;;  %v1262_v46 = vmul.f32 0.01, %v1160_v10  ;;  %vm1230_vm12 = vcmp.ge.f32.partialorder %v1160_v10, 0.0 }
 0x158   : > { %v978_v4 = vpop.f32.mrf.mxu2  ;;  %v1778_v40 = vpack.c.bf16 %v1373_v55, %v1372_v45  ;;  %v1199_v56 = vpop.f32.mrf.mxu3  ;;  %v1294_v60 = vsel %vm1230_vm12, %v1160_v10, %v1262_v46 }
 0x159   : > { %v1200_v52 = vadd.f32 %v2853_v8, %v1199_v56  ;;  %v1358_v1 = vadd.f32 %v1326_v57, %v1294_v60  ;;  %v979_v59 = vadd.f32 %v2859_v43, %v978_v4  ;;  %v1344_v56 = vld [vmem:[%s2867_s8 + $0xc0] sm:$0xff] }
 0x15a   : > { %1829 = vst [vmem:[%s2886_s12 + $0x50] sm:$0xff] %v1778_v40  }
 0x15b   : > { %v940_v9 = vpop.f32.mrf.mxu0  ;;  %v1161_v2 = vpop.f32.mrf.mxu1  ;;  %v1278_v19 = vmul.f32 0.01, %v1200_v52  ;;  %vm1246_vm14 = vcmp.ge.f32.partialorder %v1200_v52, 0.0 }
 0x15c   : > { %v941_v26 = vadd.f32 %v2859_v43, %v940_v9  ;;  %v1162_v50 = vadd.f32 %v2853_v8, %v1161_v2 }
 0x15d   : > { %v1310_v38 = vsel %vm1246_vm14, %v1200_v52, %v1278_v19 }
 0x15e   : > { %v1663_v44 = vpack.c.bf16 %v941_v26, %v939_v13  ;;  %vm1231_vm13 = vcmp.ge.f32.partialorder %v1162_v50, 0.0  ;;  %v1263_v17 = vmul.f32 0.01, %v1162_v50  ;;  %v1374_v25 = vadd.f32 %v1342_v32, %v1310_v38  ;;  %v1345_v13 = vld [vmem:[%s2867_s8 + $0xc8] sm:$0xff] }
 0x160   : > { %1807 = vst [vmem:[%s2875_s26 + $0x18] sm:$0xff] %v1663_v44   ;;  %v1295_v37 = vsel %vm1231_vm13, %v1162_v50, %v1263_v17  ;;  %v980_v42 = vpop.f32.mrf.mxu2  ;;  %v1201_v48 = vpop.f32.mrf.mxu3 }
 0x161   : > { %v1359_v61 = vadd.f32 %v1327_v11, %v1295_v37  ;;  %v981_v29 = vadd.f32 %v2859_v43, %v980_v42  ;;  %v1202_v62 = vadd.f32 %v2853_v8, %v1201_v48 }
 0x163   : > { %v943_v58 = vpop.f32.mrf.mxu0  ;;  %v1743_v3 = vpack.c.bf16 %v1359_v61, %v1358_v1  ;;  %v1703_v0 = vpack.c.bf16 %v981_v29, %v979_v59  ;;  %v1164_v36 = vpop.f32.mrf.mxu1  ;;  %vm1247_vm15 = vcmp.ge.f32.partialorder %v1202_v62, 0.0  ;;  %v1279_v31 = vmul.f32 0.01, %v1202_v62  ;;  %v1330_v29 = vld [vmem:[%s2867_s8 + $0x50] sm:$0xff] }
 0x164   : > { %v1165_v16 = vadd.f32 %v2853_v8, %v1164_v36  ;;  %v944_v22 = vadd.f32 %v2859_v43, %v943_v58  ;;  %v1331_v58 = vld [vmem:[%s2867_s8 + $0x58] sm:$0xff] }
 0x165   : > { %1822 = vst [vmem:[%s2886_s12 + $0x18] sm:$0xff] %v1743_v3   ;;  %v1311_v24 = vsel %vm1247_vm15, %v1202_v62, %v1279_v31 }
 0x166   : > { %1815 = vst [vmem:[%s2875_s26 + $0x58] sm:$0xff] %v1703_v0   ;;  %v1375_v30 = vadd.f32 %v1343_v14, %v1311_v24  ;;  %v1264_v27 = vmul.f32 0.01, %v1165_v16  ;;  %vm1232_vm0 = vcmp.ge.f32.partialorder %v1165_v16, 0.0 }
 0x168   : > { %v983_v18 = vpop.f32.mrf.mxu2  ;;  %v1783_v20 = vpack.c.bf16 %v1375_v30, %v1374_v25  ;;  %v1204_v12 = vpop.f32.mrf.mxu3  ;;  %v1296_v63 = vsel %vm1232_vm0, %v1165_v16, %v1264_v27 }
 0x169   : > { %v1205_v39 = vadd.f32 %v2853_v8, %v1204_v12  ;;  %v1360_v35 = vadd.f32 %v1328_v6, %v1296_v63  ;;  %v984_v47 = vadd.f32 %v2859_v43, %v983_v18  ;;  %v1346_v12 = vld [vmem:[%s2867_s8 + $0xd0] sm:$0xff] }
 0x16a   : > { %1830 = vst [vmem:[%s2886_s12 + $0x58] sm:$0xff] %v1783_v20  }
 0x16b   : > { %v945_v21 = vpop.f32.mrf.mxu0  ;;  %v1166_v7 = vpop.f32.mrf.mxu1  ;;  %v1280_v33 = vmul.f32 0.01, %v1205_v39  ;;  %vm1248_vm2 = vcmp.ge.f32.partialorder %v1205_v39, 0.0 }
 0x16c   : > { %v946_v51 = vadd.f32 %v2859_v43, %v945_v21  ;;  %v1167_v5 = vadd.f32 %v2853_v8, %v1166_v7 }
 0x16d   : > { %v1312_v46 = vsel %vm1248_vm2, %v1205_v39, %v1280_v33 }
 0x16e   : > { %v1668_v23 = vpack.c.bf16 %v946_v51, %v944_v22  ;;  %vm1233_vm1 = vcmp.ge.f32.partialorder %v1167_v5, 0.0  ;;  %v1265_v41 = vmul.f32 0.01, %v1167_v5  ;;  %v1376_v52 = vadd.f32 %v1344_v56, %v1312_v46  ;;  %v1347_v22 = vld [vmem:[%s2867_s8 + $0xd8] sm:$0xff] }
 0x170   : > { %1808 = vst [vmem:[%s2875_s26 + $0x20] sm:$0xff] %v1668_v23   ;;  %v1297_v28 = vsel %vm1233_vm1, %v1167_v5, %v1265_v41  ;;  %v985_v49 = vpop.f32.mrf.mxu2  ;;  %v1206_v10 = vpop.f32.mrf.mxu3 }
 0x171   : > { %v1361_v34 = vadd.f32 %v1329_v15, %v1297_v28  ;;  %v986_v53 = vadd.f32 %v2859_v43, %v985_v49  ;;  %v1207_v54 = vadd.f32 %v2853_v8, %v1206_v10 }
 0x173   : > { %v948_v45 = vpop.f32.mrf.mxu0  ;;  %v1748_v55 = vpack.c.bf16 %v1361_v34, %v1360_v35  ;;  %v1708_v4 = vpack.c.bf16 %v986_v53, %v984_v47  ;;  %v1169_v40 = vpop.f32.mrf.mxu1  ;;  %vm1249_vm3 = vcmp.ge.f32.partialorder %v1207_v54, 0.0  ;;  %v1281_v9 = vmul.f32 0.01, %v1207_v54  ;;  %v1332_v53 = vld [vmem:[%s2867_s8 + $0x60] sm:$0xff] }
 0x174   : > { %v1170_v26 = vadd.f32 %v2853_v8, %v1169_v40  ;;  %v949_v1 = vadd.f32 %v2859_v43, %v948_v45  ;;  %v1333_v45 = vld [vmem:[%s2867_s8 + $0x68] sm:$0xff] }
 0x175   : > { %1823 = vst [vmem:[%s2886_s12 + $0x20] sm:$0xff] %v1748_v55   ;;  %v1313_v2 = vsel %vm1249_vm3, %v1207_v54, %v1281_v9 }
 0x176   : > { %1816 = vst [vmem:[%s2875_s26 + $0x60] sm:$0xff] %v1708_v4   ;;  %v1377_v50 = vadd.f32 %v1345_v13, %v1313_v2  ;;  %v1266_v44 = vmul.f32 0.01, %v1170_v26  ;;  %vm1234_vm4 = vcmp.ge.f32.partialorder %v1170_v26, 0.0 }
 0x178   : > { %v988_v60 = vpop.f32.mrf.mxu2  ;;  %v1788_v57 = vpack.c.bf16 %v1377_v50, %v1376_v52  ;;  %v1209_v17 = vpop.f32.mrf.mxu3  ;;  %v1298_v61 = vsel %vm1234_vm4, %v1170_v26, %v1266_v44 }
 0x179   : > { %v1210_v42 = vadd.f32 %v2853_v8, %v1209_v17  ;;  %v1362_v3 = vadd.f32 %v1330_v29, %v1298_v61  ;;  %v989_v32 = vadd.f32 %v2859_v43, %v988_v60  ;;  %v1348_v17 = vld [vmem:[%s2867_s8 + $0xe0] sm:$0xff] }
 0x17a   : > { %1831 = vst [vmem:[%s2886_s12 + $0x60] sm:$0xff] %v1788_v57  }
 0x17b   : > { %v950_v11 = vpop.f32.mrf.mxu0  ;;  %v1171_v37 = vpop.f32.mrf.mxu1  ;;  %v1282_v0 = vmul.f32 0.01, %v1210_v42  ;;  %vm1250_vm6 = vcmp.ge.f32.partialorder %v1210_v42, 0.0 }
 0x17c   : > { %v951_v19 = vadd.f32 %v2859_v43, %v950_v11  ;;  %v1172_v59 = vadd.f32 %v2853_v8, %v1171_v37 }
 0x17d   : > { %v1314_v27 = vsel %vm1250_vm6, %v1210_v42, %v1282_v0 }
 0x17e   : > { %v1673_v48 = vpack.c.bf16 %v951_v19, %v949_v1  ;;  %vm1235_vm5 = vcmp.ge.f32.partialorder %v1172_v59, 0.0  ;;  %v1267_v62 = vmul.f32 0.01, %v1172_v59  ;;  %v1378_v39 = vadd.f32 %v1346_v12, %v1314_v27  ;;  %v1349_v1 = vld [vmem:[%s2867_s8 + $0xe8] sm:$0xff] }
 0x180   : > { %1809 = vst [vmem:[%s2875_s26 + $0x28] sm:$0xff] %v1673_v48   ;;  %v1299_v36 = vsel %vm1235_vm5, %v1172_v59, %v1267_v62  ;;  %v990_v38 = vpop.f32.mrf.mxu2  ;;  %v1211_v16 = vpop.f32.mrf.mxu3 }
 0x181   : > { %v1363_v31 = vadd.f32 %v1331_v58, %v1299_v36  ;;  %v991_v14 = vadd.f32 %v2859_v43, %v990_v38  ;;  %v1212_v24 = vadd.f32 %v2853_v8, %v1211_v16 }
 0x183   : > { %v953_v25 = vpop.f32.mrf.mxu0  ;;  %v1753_v30 = vpack.c.bf16 %v1363_v31, %v1362_v3  ;;  %v1713_v18 = vpack.c.bf16 %v991_v14, %v989_v32  ;;  %v1174_v20 = vpop.f32.mrf.mxu1  ;;  %vm1251_vm7 = vcmp.ge.f32.partialorder %v1212_v24, 0.0  ;;  %v1283_v21 = vmul.f32 0.01, %v1212_v24  ;;  %v1334_v14 = vld [vmem:[%s2867_s8 + $0x70] sm:$0xff] }
 0x184   : > { %v1175_v51 = vadd.f32 %v2853_v8, %v1174_v20  ;;  %v954_v35 = vadd.f32 %v2859_v43, %v953_v25  ;;  %v1335_v25 = vld [vmem:[%s2867_s8 + $0x78] sm:$0xff] }
 0x185   : > { %1824 = vst [vmem:[%s2886_s12 + $0x28] sm:$0xff] %v1753_v30   ;;  %v1315_v7 = vsel %vm1251_vm7, %v1212_v24, %v1283_v21 }
 0x186   : > { %1817 = vst [vmem:[%s2875_s26 + $0x68] sm:$0xff] %v1713_v18   ;;  %v1379_v5 = vadd.f32 %v1347_v22, %v1315_v7  ;;  %v1268_v23 = vmul.f32 0.01, %v1175_v51  ;;  %vm1236_vm8 = vcmp.ge.f32.partialorder %v1175_v51, 0.0 }
 0x188   : > { %v993_v63 = vpop.f32.mrf.mxu2  ;;  %v1793_v6 = vpack.c.bf16 %v1379_v5, %v1378_v39  ;;  %v1214_v41 = vpop.f32.mrf.mxu3  ;;  %v1300_v34 = vsel %vm1236_vm8, %v1175_v51, %v1268_v23 }
 0x189   : > { %v1215_v49 = vadd.f32 %v2853_v8, %v1214_v41  ;;  %v1364_v55 = vadd.f32 %v1332_v53, %v1300_v34  ;;  %v994_v56 = vadd.f32 %v2859_v43, %v993_v63  ;;  %v1351_v41 = vld [vmem:[%s2867_s8 + $0xf8] sm:$0xff] }
 0x18a   : > { %1832 = vst [vmem:[%s2886_s12 + $0x68] sm:$0xff] %v1793_v6   ;;  %v1350_v6 = vld [vmem:[%s2867_s8 + $0xf0] sm:$0xff] }
 0x18b   : > { %v955_v15 = vpop.f32.mrf.mxu0  ;;  %v1176_v28 = vpop.f32.mrf.mxu1  ;;  %v1284_v4 = vmul.f32 0.01, %v1215_v49  ;;  %vm1252_vm10 = vcmp.ge.f32.partialorder %v1215_v49, 0.0 }
 0x18c   : > { %v956_v33 = vadd.f32 %v2859_v43, %v955_v15  ;;  %v1177_v47 = vadd.f32 %v2853_v8, %v1176_v28 }
 0x18d   : > { %v1316_v44 = vsel %vm1252_vm10, %v1215_v49, %v1284_v4 }
 0x18e   : > { %v1678_v10 = vpack.c.bf16 %v956_v33, %v954_v35  ;;  %vm1237_vm9 = vcmp.ge.f32.partialorder %v1177_v47, 0.0  ;;  %v1269_v54 = vmul.f32 0.01, %v1177_v47  ;;  %v1380_v42 = vadd.f32 %v1348_v17, %v1316_v44 }
 0x190   : > { %1810 = vst [vmem:[%s2875_s26 + $0x30] sm:$0xff] %v1678_v10   ;;  %v1301_v40 = vsel %vm1237_vm9, %v1177_v47, %v1269_v54  ;;  %v995_v46 = vpop.f32.mrf.mxu2  ;;  %v1216_v26 = vpop.f32.mrf.mxu3 }
 0x191   : > { %v1365_v9 = vadd.f32 %v1333_v45, %v1301_v40  ;;  %v996_v13 = vadd.f32 %v2859_v43, %v995_v46  ;;  %v1217_v2 = vadd.f32 %v2853_v8, %v1216_v26 }
 0x193   : > { %v958_v52 = vpop.f32.mrf.mxu0  ;;  %v1758_v50 = vpack.c.bf16 %v1365_v9, %v1364_v55  ;;  %v1718_v60 = vpack.c.bf16 %v996_v13, %v994_v56  ;;  %v1179_v57 = vpop.f32.mrf.mxu1  ;;  %vm1253_vm11 = vcmp.ge.f32.partialorder %v1217_v2, 0.0  ;;  %v1285_v11 = vmul.f32 0.01, %v1217_v2 }
 0x194   : > { %v1180_v19 = vadd.f32 %v2853_v8, %v1179_v57  ;;  %v959_v3 = vadd.f32 %v2859_v43, %v958_v52 }
 0x195   : > { %1825 = vst [vmem:[%s2886_s12 + $0x30] sm:$0xff] %v1758_v50   ;;  %v1317_v37 = vsel %vm1253_vm11, %v1217_v2, %v1285_v11 }
 0x196   : > { %1818 = vst [vmem:[%s2875_s26 + $0x70] sm:$0xff] %v1718_v60   ;;  %v1381_v59 = vadd.f32 %v1349_v1, %v1317_v37  ;;  %v1270_v48 = vmul.f32 0.01, %v1180_v19  ;;  %vm1238_vm12 = vcmp.ge.f32.partialorder %v1180_v19, 0.0 }
 0x198   : > { %v998_v61 = vpop.f32.mrf.mxu2  ;;  %v1798_v29 = vpack.c.bf16 %v1381_v59, %v1380_v42  ;;  %v1219_v62 = vpop.f32.mrf.mxu3  ;;  %v1302_v31 = vsel %vm1238_vm12, %v1180_v19, %v1270_v48 }
 0x199   : > { %v1220_v38 = vadd.f32 %v2853_v8, %v1219_v62  ;;  %v1366_v30 = vadd.f32 %v1334_v14, %v1302_v31  ;;  %v999_v12 = vadd.f32 %v2859_v43, %v998_v61 }
 0x19a   : > { %1833 = vst [vmem:[%s2886_s12 + $0x70] sm:$0xff] %v1798_v29  }
 0x19b   : > { %v960_v58 = vpop.f32.mrf.mxu0  ;;  %v1181_v36 = vpop.f32.mrf.mxu1  ;;  %v1286_v18 = vmul.f32 0.01, %v1220_v38  ;;  %vm1254_vm14 = vcmp.ge.f32.partialorder %v1220_v38, 0.0 }
 0x19c   : > { %v961_v0 = vadd.f32 %v2859_v43, %v960_v58  ;;  %v1182_v32 = vadd.f32 %v2853_v8, %v1181_v36 }
 0x19d   : > { %v1318_v63 = vsel %vm1254_vm14, %v1220_v38, %v1286_v18 }
 0x19e   : > { %v1683_v16 = vpack.c.bf16 %v961_v0, %v959_v3  ;;  %vm1239_vm13 = vcmp.ge.f32.partialorder %v1182_v32, 0.0  ;;  %v1271_v24 = vmul.f32 0.01, %v1182_v32  ;;  %v1382_v35 = vadd.f32 %v1350_v6, %v1318_v63 }
 0x1a0   : > { %1811 = vst [vmem:[%s2875_s26 + $0x38] sm:$0xff] %v1683_v16   ;;  %v1303_v20 = vsel %vm1239_vm13, %v1182_v32, %v1271_v24  ;;  %v1000_v27 = vpop.f32.mrf.mxu2  ;;  %v1221_v51 = vpop.f32.mrf.mxu3 }
 0x1a1   : > { %v1367_v21 = vadd.f32 %v1335_v25, %v1303_v20  ;;  %v1001_v22 = vadd.f32 %v2859_v43, %v1000_v27  ;;  %v1222_v7 = vadd.f32 %v2853_v8, %v1221_v51 }
 0x1a3   : > { %v1763_v39 = vpack.c.bf16 %v1367_v21, %v1366_v30  ;;  %v1723_v5 = vpack.c.bf16 %v1001_v22, %v999_v12  ;;  %vm1255_vm15 = vcmp.ge.f32.partialorder %v1222_v7, 0.0  ;;  %v1287_v23 = vmul.f32 0.01, %v1222_v7 }
 0x1a5   : > { %1826 = vst [vmem:[%s2886_s12 + $0x38] sm:$0xff] %v1763_v39   ;;  %v1319_v15 = vsel %vm1255_vm15, %v1222_v7, %v1287_v23 }
 0x1a6   : > { %1819 = vst [vmem:[%s2875_s26 + $0x78] sm:$0xff] %v1723_v5   ;;  %v1383_v33 = vadd.f32 %v1351_v41, %v1319_v15 }
 0x1a8   : > { %v1803_v28 = vpack.c.bf16 %v1383_v33, %v1382_v35 }
 0x1aa   : > { %1834 = vst [vmem:[%s2886_s12 + $0x78] sm:$0xff] %v1803_v28  }
 0x1ab PF: > { %s18_s24 = sadd.s32 1, %s1939_s24  }
 0x1ac   : > { %p15_p4 = scmp.ge.s32.totalorder %s18_s24, 4  }
 0x1ae   :  { %17 = sbr.rel (!%p15_p4) target bundleno = 1 (0x1), region = 89 }

// kernel: graph_conv_net_forward.8
= control target key start
LH: loop header
LB: loop body
LE: loop exit
PB: predicated region body
PF: predicated region fallthrough
CT: control target
= control target key end

     0   :  { %s1589_s24 = smov 0   ;;  %s1831_s0 = inlined_call_operand.vmem [shape: bf16[512,128], index: 0, kind: input, shape index: {}]   ;;  %s1832_s1 = inlined_call_operand.vmem [shape: f32[512,128], index: 1, kind: input, shape index: {}]   ;;  %s1833_s2 = inlined_call_operand.vmem [shape: bf16[128,128], index: 2, kind: input, shape index: {}]   ;;  %s1834_s3 = inlined_call_operand.vmem [shape: f32[1,128], index: 3, kind: input, shape index: {}]   ;;  %s1835_s4 = inlined_call_operand.vmem [shape: bf16[128,128], index: 4, kind: input, shape index: {}]   ;;  %s1836_s5 = inlined_call_operand.vmem [shape: f32[1,128], index: 5, kind: input, shape index: {}]   ;;  %s1837_s6 = inlined_call_operand.vmem [shape: bf16[512,128], index: 6, kind: output, shape index: {0}]   ;;  %s1838_s7 = inlined_call_operand.vmem [shape: bf16[512,128], index: 7, kind: output, shape index: {1}]  }
   0x1 LB: > { %s1150_s25 = sadd.s32 4294967295, %s1547_s24   ;;  %p1154_p0 = scmp.ge.s32.totalorder %s1547_s24, 1  ;;  %s1547_s24 = sphi %s1589_s24, %s18_s24  }
   0x2   : > { %p252_p1 = scmp.lt.s32.totalorder %s1547_s24, 3 }
   0x4   : > { %p253_p2 = pnand %p1154_p0, %p252_p1 }
   0x5   : > { %s1155_s19 = sshll.u32 (!%p253_p2), %s1150_s25, 5 }
   0x6   : > { %256 = sbr.rel (%p253_p2) target bundleno = 306 (0x132), region = 44  ;;  %p295_p3 = scmp.lt.s32.totalorder (!%p253_p2), %s1155_s19, 63 }
   0xb   : > { %v1316_v0 = vld [vmem:[%s1833_s2 + $0x38] sm:$0xff]  ;;  %v1315_v2 = vld [vmem:[%s1833_s2 + $0x30] sm:$0xff]  ;;  %v1314_v4 = vld [vmem:[%s1833_s2 + $0x28] sm:$0xff]  ;;  %s1840_s19 = smov (!%p295_p3, %s1155_s19), 63 }
   0xc   : > { %v1324_v1 = vld [vmem:[%s1835_s4 + $0x38] sm:$0xff]  ;;  %1515 = vmatpush.bf16.msra.mxu2 %v1316_v0  ;;  %v1323_v3 = vld [vmem:[%s1835_s4 + $0x30] sm:$0xff]  ;;  %514 = vmatpush.bf16.msra.mxu0 %v1316_v0  ;;  %v1322_v5 = vld [vmem:[%s1835_s4 + $0x28] sm:$0xff]  ;;  %s1642_s10 = sshll.u32 %s1840_s19, 2  ;;  %s1158_s23 = sshll.u32 %s1840_s19, 3 }
   0xd   : > { %735 = vmatpush.bf16.msra.mxu1 %v1324_v1  ;;  %1523 = vmatpush.bf16.msra.mxu3 %v1324_v1  ;;  %v1313_v6 = vld [vmem:[%s1833_s2 + $0x20] sm:$0xff]  ;;  %v1312_v8 = vld [vmem:[%s1833_s2 + $0x18] sm:$0xff]  ;;  %v1311_v10 = vld [vmem:[%s1833_s2 + $0x10] sm:$0xff]  ;;  %s1654_s17 = scalar_lea.vmem %s1831_s0, %s1642_s10  ;;  %s1687_s25 = scalar_lea.vmem %s1832_s1, %s1158_s23 }
   0xe   : > { %v1321_v7 = vld [vmem:[%s1835_s4 + $0x20] sm:$0xff]  ;;  %v1320_v9 = vld [vmem:[%s1835_s4 + $0x18] sm:$0xff]  ;;  %v1319_v11 = vld [vmem:[%s1835_s4 + $0x10] sm:$0xff]  ;;  %s1699_s29 = scalar_lea.vmem %s1837_s6, %s1642_s10  ;;  %s1707_s9 = scalar_lea.vmem %s1838_s7, %s1642_s10 }
   0xf   : > { %v1310_v12 = vld [vmem:[%s1833_s2 + $0x8] sm:$0xff]  ;;  %v1309_v14 = vld [vmem:[%s1833_s2] sm:$0xff]  ;;  %v1303_v20 = vld [vmem:[%s1654_s17 + $0x50] sm:$0xff] }
  0x10   : > { %1516 = vmatpush.bf16.msra.mxu2 %v1315_v2  ;;  %515 = vmatpush.bf16.msra.mxu0 %v1315_v2  ;;  %v1318_v13 = vld [vmem:[%s1835_s4 + $0x8] sm:$0xff]  ;;  %v1317_v15 = vld [vmem:[%s1835_s4] sm:$0xff]  ;;  %v1295_v21 = vld [vmem:[%s1654_s17 + $0x10] sm:$0xff] }
  0x11   : > { %736 = vmatpush.bf16.msra.mxu1 %v1323_v3  ;;  %1524 = vmatpush.bf16.msra.mxu3 %v1323_v3  ;;  %v1301_v16 = vld [vmem:[%s1654_s17 + $0x40] sm:$0xff]  ;;  %v1302_v18 = vld [vmem:[%s1654_s17 + $0x48] sm:$0xff]  ;;  %v1304_v22 = vld [vmem:[%s1654_s17 + $0x58] sm:$0xff] }
  0x12   : > { %v1293_v17 = vld [vmem:[%s1654_s17] sm:$0xff]  ;;  %v1294_v19 = vld [vmem:[%s1654_s17 + $0x8] sm:$0xff]  ;;  %v1296_v23 = vld [vmem:[%s1654_s17 + $0x18] sm:$0xff] }
  0x13   : > { %v1305_v24 = vld [vmem:[%s1654_s17 + $0x60] sm:$0xff]  ;;  %v1306_v26 = vld [vmem:[%s1654_s17 + $0x68] sm:$0xff]  ;;  %v1307_v28 = vld [vmem:[%s1654_s17 + $0x70] sm:$0xff] }
  0x14   : > { %1517 = vmatpush.bf16.msra.mxu2 %v1314_v4  ;;  %516 = vmatpush.bf16.msra.mxu0 %v1314_v4  ;;  %v1297_v25 = vld [vmem:[%s1654_s17 + $0x20] sm:$0xff]  ;;  %v1298_v27 = vld [vmem:[%s1654_s17 + $0x28] sm:$0xff]  ;;  %v1299_v29 = vld [vmem:[%s1654_s17 + $0x30] sm:$0xff] }
  0x15   : > { %737 = vmatpush.bf16.msra.mxu1 %v1322_v5  ;;  %1525 = vmatpush.bf16.msra.mxu3 %v1322_v5  ;;  %v1308_v30 = vld [vmem:[%s1654_s17 + $0x78] sm:$0xff]  ;;  %v1675_v32 = vld [vmem:[%s1836_s5] ss:$0 sm:$0xff]  ;;  %v921_v49 = vld [vmem:[%s1687_s25 + $0x8] sm:$0xff] }
  0x16   : > { %v1300_v31 = vld [vmem:[%s1654_s17 + $0x38] sm:$0xff]  ;;  %v1681_v36 = vld [vmem:[%s1834_s3] ss:$0 sm:$0xff]  ;;  %v937_v3 = vld [vmem:[%s1687_s25 + $0x88] sm:$0xff] }
  0x17   : > { %v920_v47 = vld [vmem:[%s1687_s25] sm:$0xff] }
  0x18   : > { %1518 = vmatpush.bf16.msra.mxu2 %v1313_v6  ;;  %517 = vmatpush.bf16.msra.mxu0 %v1313_v6  ;;  %v936_v1 = vld [vmem:[%s1687_s25 + $0x80] sm:$0xff] }
  0x19   : > { %738 = vmatpush.bf16.msra.mxu1 %v1321_v7  ;;  %1526 = vmatpush.bf16.msra.mxu3 %v1321_v7 }
  0x1c   : > { %1519 = vmatpush.bf16.msra.mxu2 %v1312_v8  ;;  %518 = vmatpush.bf16.msra.mxu0 %v1312_v8 }
  0x1d   : > { %739 = vmatpush.bf16.msra.mxu1 %v1320_v9  ;;  %1527 = vmatpush.bf16.msra.mxu3 %v1320_v9 }
  0x20   : > { %1520 = vmatpush.bf16.msra.mxu2 %v1311_v10  ;;  %519 = vmatpush.bf16.msra.mxu0 %v1311_v10 }
  0x21   : > { %740 = vmatpush.bf16.msra.mxu1 %v1319_v11  ;;  %1528 = vmatpush.bf16.msra.mxu3 %v1319_v11 }
  0x24   : > { %1521 = vmatpush.bf16.msra.mxu2 %v1310_v12  ;;  %520 = vmatpush.bf16.msra.mxu0 %v1310_v12 }
  0x25   : > { %741 = vmatpush.bf16.msra.mxu1 %v1318_v13  ;;  %1529 = vmatpush.bf16.msra.mxu3 %v1318_v13 }
  0x28   : > { %1522 = vmatpush.bf16.msra.mxu2 %v1309_v14  ;;  %521 = vmatpush.bf16.msra.mxu0 %v1309_v14 }
  0x29   : > { %742 = vmatpush.bf16.msra.mxu1 %v1317_v15  ;;  %1530 = vmatpush.bf16.msra.mxu3 %v1317_v15 }
  0x2b   : > { %562 = vmatmul.bf16.vlgmr.msra.gmra.mxu2 %v1301_v16  ;;  %522 = vmatmul.bf16.vlgmr.msra.gmra.mxu0 %v1293_v17 }
  0x2c   : > { %743 = vmatmul.bf16.vlgmr.msra.gmra.mxu1 %v1293_v17  ;;  %783 = vmatmul.bf16.vlgmr.msra.gmra.mxu3 %v1301_v16 }
  0x3b   : > { %567 = vmatmul.bf16.gmra.mxu2 %v1302_v18  ;;  %527 = vmatmul.bf16.gmra.mxu0 %v1294_v19 }
  0x3c   : > { %748 = vmatmul.bf16.gmra.mxu1 %v1294_v19  ;;  %788 = vmatmul.bf16.gmra.mxu3 %v1302_v18  ;;  %v922_v19 = vld [vmem:[%s1687_s25 + $0x10] sm:$0xff] }
  0x4b   : > { %572 = vmatmul.bf16.gmra.mxu2 %v1303_v20  ;;  %532 = vmatmul.bf16.gmra.mxu0 %v1295_v21 }
  0x4c   : > { %753 = vmatmul.bf16.gmra.mxu1 %v1295_v21  ;;  %793 = vmatmul.bf16.gmra.mxu3 %v1303_v20  ;;  %v923_v21 = vld [vmem:[%s1687_s25 + $0x18] sm:$0xff] }
  0x5b   : > { %577 = vmatmul.bf16.gmra.mxu2 %v1304_v22  ;;  %537 = vmatmul.bf16.gmra.mxu0 %v1296_v23 }
  0x5c   : > { %758 = vmatmul.bf16.gmra.mxu1 %v1296_v23  ;;  %798 = vmatmul.bf16.gmra.mxu3 %v1304_v22 }
  0x6b   : > { %582 = vmatmul.bf16.gmra.mxu2 %v1305_v24  ;;  %542 = vmatmul.bf16.gmra.mxu0 %v1297_v25 }
  0x6c   : > { %763 = vmatmul.bf16.gmra.mxu1 %v1297_v25  ;;  %803 = vmatmul.bf16.gmra.mxu3 %v1305_v24 }
  0x7b   : > { %587 = vmatmul.bf16.gmra.mxu2 %v1306_v26  ;;  %547 = vmatmul.bf16.gmra.mxu0 %v1298_v27 }
  0x7c   : > { %768 = vmatmul.bf16.gmra.mxu1 %v1298_v27  ;;  %808 = vmatmul.bf16.gmra.mxu3 %v1306_v26 }
  0x8b   : > { %592 = vmatmul.bf16.gmra.mxu2 %v1307_v28  ;;  %552 = vmatmul.bf16.gmra.mxu0 %v1299_v29 }
  0x8c   : > { %773 = vmatmul.bf16.gmra.mxu1 %v1299_v29  ;;  %813 = vmatmul.bf16.gmra.mxu3 %v1307_v28 }
  0x9b   : > { %597 = vmatmul.bf16.gmra.mxu2 %v1308_v30  ;;  %557 = vmatmul.bf16.gmra.mxu0 %v1300_v31 }
  0x9c   : > { %778 = vmatmul.bf16.gmra.mxu1 %v1300_v31  ;;  %818 = vmatmul.bf16.gmra.mxu3 %v1308_v30 }
  0xa8   : > { %v523_v34 = vpop.f32.mrf.mxu0 }
  0xa9   : > { %v744_v33 = vpop.f32.mrf.mxu1  ;;  %v524_v40 = vadd.f32 %v1681_v36, %v523_v34 }
  0xaa   : > { %v745_v35 = vadd.f32 %v1675_v32, %v744_v33 }
  0xac   : > { %v856_v38 = vmul.f32 0.01, %v745_v35  ;;  %vm824_vm0 = vcmp.ge.f32.partialorder %v745_v35, 0.0 }
  0xae   : > { %v563_v37 = vpop.f32.mrf.mxu2  ;;  %v888_v46 = vsel %vm824_vm0, %v745_v35, %v856_v38 }
  0xaf   : > { %v784_v39 = vpop.f32.mrf.mxu3  ;;  %v952_v52 = vadd.f32 %v920_v47, %v888_v46  ;;  %v564_v56 = vadd.f32 %v1681_v36, %v563_v37 }
  0xb0   : > { %v525_v43 = vpop.f32.mrf.mxu0  ;;  %v785_v44 = vadd.f32 %v1675_v32, %v784_v39  ;;  %v938_v39 = vld [vmem:[%s1687_s25 + $0x90] sm:$0xff] }
  0xb1   : > { %v746_v41 = vpop.f32.mrf.mxu1  ;;  %v526_v45 = vadd.f32 %v1681_v36, %v525_v43 }
  0xb2   : > { %v747_v42 = vadd.f32 %v1675_v32, %v746_v41  ;;  %v872_v53 = vmul.f32 0.01, %v785_v44  ;;  %vm840_vm2 = vcmp.ge.f32.partialorder %v785_v44, 0.0  ;;  %v939_v41 = vld [vmem:[%s1687_s25 + $0x98] sm:$0xff] }
  0xb3   : > { %v1328_v50 = vpack.c.bf16 %v526_v45, %v524_v40 }
  0xb4   : > { %vm825_vm1 = vcmp.ge.f32.partialorder %v747_v42, 0.0  ;;  %v857_v48 = vmul.f32 0.01, %v747_v42  ;;  %v904_v0 = vsel %vm840_vm2, %v785_v44, %v872_v53 }
  0xb5   : > { %1329 = vst [vmem:[%s1699_s29] sm:$0xff] %v1328_v50   ;;  %v968_v6 = vadd.f32 %v936_v1, %v904_v0 }
  0xb6   : > { %v889_v51 = vsel %vm825_vm1, %v747_v42, %v857_v48  ;;  %v565_v55 = vpop.f32.mrf.mxu2 }
  0xb7   : > { %v953_v54 = vadd.f32 %v921_v49, %v889_v51  ;;  %v566_v57 = vadd.f32 %v1681_v36, %v565_v55  ;;  %v786_v58 = vpop.f32.mrf.mxu3 }
  0xb8   : > { %v787_v60 = vadd.f32 %v1675_v32, %v786_v58  ;;  %v528_v63 = vpop.f32.mrf.mxu0 }
  0xb9   : > { %v1408_v59 = vpack.c.bf16 %v953_v54, %v952_v52  ;;  %v749_v61 = vpop.f32.mrf.mxu1  ;;  %v1368_v62 = vpack.c.bf16 %v566_v57, %v564_v56  ;;  %v529_v12 = vadd.f32 %v1681_v36, %v528_v63  ;;  %v924_v57 = vld [vmem:[%s1687_s25 + $0x20] sm:$0xff] }
  0xba   : > { %vm841_vm3 = vcmp.ge.f32.partialorder %v787_v60, 0.0  ;;  %v873_v2 = vmul.f32 0.01, %v787_v60  ;;  %v750_v4 = vadd.f32 %v1675_v32, %v749_v61 }
  0xbb   : > { %1409 = vst [vmem:[%s1707_s9] sm:$0xff] %v1408_v59   ;;  %v925_v59 = vld [vmem:[%s1687_s25 + $0x28] sm:$0xff] }
  0xbc   : > { %1492 = vst [vmem:[%s1699_s29 + $0x40] sm:$0xff] %v1368_v62   ;;  %v905_v5 = vsel %vm841_vm3, %v787_v60, %v873_v2  ;;  %v858_v10 = vmul.f32 0.01, %v750_v4  ;;  %vm826_vm4 = vcmp.ge.f32.partialorder %v750_v4, 0.0 }
  0xbd   : > { %v969_v7 = vadd.f32 %v937_v3, %v905_v5 }
  0xbe   : > { %v568_v8 = vpop.f32.mrf.mxu2  ;;  %v890_v18 = vsel %vm826_vm4, %v750_v4, %v858_v10 }
  0xbf   : > { %v1448_v9 = vpack.c.bf16 %v969_v7, %v968_v6  ;;  %v789_v11 = vpop.f32.mrf.mxu3  ;;  %v954_v24 = vadd.f32 %v922_v19, %v890_v18  ;;  %v569_v28 = vadd.f32 %v1681_v36, %v568_v8 }
  0xc0   : > { %v530_v15 = vpop.f32.mrf.mxu0  ;;  %v790_v16 = vadd.f32 %v1675_v32, %v789_v11  ;;  %v940_v11 = vld [vmem:[%s1687_s25 + $0xa0] sm:$0xff] }
  0xc1   : > { %v751_v13 = vpop.f32.mrf.mxu1  ;;  %1507 = vst [vmem:[%s1707_s9 + $0x40] sm:$0xff] %v1448_v9   ;;  %v531_v17 = vadd.f32 %v1681_v36, %v530_v15 }
  0xc2   : > { %v752_v14 = vadd.f32 %v1675_v32, %v751_v13  ;;  %v874_v25 = vmul.f32 0.01, %v790_v16  ;;  %vm842_vm6 = vcmp.ge.f32.partialorder %v790_v16, 0.0  ;;  %v941_v13 = vld [vmem:[%s1687_s25 + $0xa8] sm:$0xff] }
  0xc3   : > { %v1333_v22 = vpack.c.bf16 %v531_v17, %v529_v12 }
  0xc4   : > { %vm827_vm5 = vcmp.ge.f32.partialorder %v752_v14, 0.0  ;;  %v859_v20 = vmul.f32 0.01, %v752_v14  ;;  %v906_v38 = vsel %vm842_vm6, %v790_v16, %v874_v25 }
  0xc5   : > { %1485 = vst [vmem:[%s1699_s29 + $0x8] sm:$0xff] %v1333_v22   ;;  %v970_v44 = vadd.f32 %v938_v39, %v906_v38 }
  0xc6   : > { %v891_v23 = vsel %vm827_vm5, %v752_v14, %v859_v20  ;;  %v570_v27 = vpop.f32.mrf.mxu2 }
  0xc7   : > { %v955_v26 = vadd.f32 %v923_v21, %v891_v23  ;;  %v571_v29 = vadd.f32 %v1681_v36, %v570_v27  ;;  %v791_v30 = vpop.f32.mrf.mxu3 }
  0xc8   : > { %v792_v33 = vadd.f32 %v1675_v32, %v791_v30  ;;  %v533_v37 = vpop.f32.mrf.mxu0 }
  0xc9   : > { %v1413_v31 = vpack.c.bf16 %v955_v26, %v954_v24  ;;  %v754_v34 = vpop.f32.mrf.mxu1  ;;  %v1373_v35 = vpack.c.bf16 %v571_v29, %v569_v28  ;;  %v534_v50 = vadd.f32 %v1681_v36, %v533_v37  ;;  %v926_v29 = vld [vmem:[%s1687_s25 + $0x30] sm:$0xff] }
  0xca   : > { %vm843_vm7 = vcmp.ge.f32.partialorder %v792_v33, 0.0  ;;  %v875_v40 = vmul.f32 0.01, %v792_v33  ;;  %v755_v42 = vadd.f32 %v1675_v32, %v754_v34 }
  0xcb   : > { %1500 = vst [vmem:[%s1707_s9 + $0x8] sm:$0xff] %v1413_v31   ;;  %v927_v31 = vld [vmem:[%s1687_s25 + $0x38] sm:$0xff] }
  0xcc   : > { %1493 = vst [vmem:[%s1699_s29 + $0x48] sm:$0xff] %v1373_v35   ;;  %v907_v43 = vsel %vm843_vm7, %v792_v33, %v875_v40  ;;  %v860_v48 = vmul.f32 0.01, %v755_v42  ;;  %vm828_vm8 = vcmp.ge.f32.partialorder %v755_v42, 0.0 }
  0xcd   : > { %v971_v45 = vadd.f32 %v939_v41, %v907_v43 }
  0xce   : > { %v573_v46 = vpop.f32.mrf.mxu2  ;;  %v892_v56 = vsel %vm828_vm8, %v755_v42, %v860_v48 }
  0xcf   : > { %v1453_v47 = vpack.c.bf16 %v971_v45, %v970_v44  ;;  %v794_v49 = vpop.f32.mrf.mxu3  ;;  %v956_v62 = vadd.f32 %v924_v57, %v892_v56  ;;  %v574_v2 = vadd.f32 %v1681_v36, %v573_v46 }
  0xd0   : > { %v535_v53 = vpop.f32.mrf.mxu0  ;;  %v795_v54 = vadd.f32 %v1675_v32, %v794_v49  ;;  %v942_v49 = vld [vmem:[%s1687_s25 + $0xb0] sm:$0xff] }
  0xd1   : > { %v756_v51 = vpop.f32.mrf.mxu1  ;;  %1508 = vst [vmem:[%s1707_s9 + $0x48] sm:$0xff] %v1453_v47   ;;  %v536_v55 = vadd.f32 %v1681_v36, %v535_v53 }
  0xd2   : > { %v757_v52 = vadd.f32 %v1675_v32, %v756_v51  ;;  %v876_v63 = vmul.f32 0.01, %v795_v54  ;;  %vm844_vm10 = vcmp.ge.f32.partialorder %v795_v54, 0.0  ;;  %v943_v51 = vld [vmem:[%s1687_s25 + $0xb8] sm:$0xff] }
  0xd3   : > { %v1338_v60 = vpack.c.bf16 %v536_v55, %v534_v50 }
  0xd4   : > { %vm829_vm9 = vcmp.ge.f32.partialorder %v757_v52, 0.0  ;;  %v861_v58 = vmul.f32 0.01, %v757_v52  ;;  %v908_v10 = vsel %vm844_vm10, %v795_v54, %v876_v63 }
  0xd5   : > { %1486 = vst [vmem:[%s1699_s29 + $0x10] sm:$0xff] %v1338_v60   ;;  %v972_v16 = vadd.f32 %v940_v11, %v908_v10 }
  0xd6   : > { %v893_v61 = vsel %vm829_vm9, %v757_v52, %v861_v58  ;;  %v575_v1 = vpop.f32.mrf.mxu2 }
  0xd7   : > { %v957_v0 = vadd.f32 %v925_v59, %v893_v61  ;;  %v576_v3 = vadd.f32 %v1681_v36, %v575_v1  ;;  %v796_v4 = vpop.f32.mrf.mxu3 }
  0xd8   : > { %v797_v6 = vadd.f32 %v1675_v32, %v796_v4  ;;  %v538_v9 = vpop.f32.mrf.mxu0 }
  0xd9   : > { %v1418_v5 = vpack.c.bf16 %v957_v0, %v956_v62  ;;  %v759_v7 = vpop.f32.mrf.mxu1  ;;  %v1378_v8 = vpack.c.bf16 %v576_v3, %v574_v2  ;;  %v539_v22 = vadd.f32 %v1681_v36, %v538_v9  ;;  %v928_v3 = vld [vmem:[%s1687_s25 + $0x40] sm:$0xff] }
  0xda   : > { %vm845_vm11 = vcmp.ge.f32.partialorder %v797_v6, 0.0  ;;  %v877_v12 = vmul.f32 0.01, %v797_v6  ;;  %v760_v14 = vadd.f32 %v1675_v32, %v759_v7 }
  0xdb   : > { %1501 = vst [vmem:[%s1707_s9 + $0x10] sm:$0xff] %v1418_v5   ;;  %v929_v5 = vld [vmem:[%s1687_s25 + $0x48] sm:$0xff] }
  0xdc   : > { %1494 = vst [vmem:[%s1699_s29 + $0x50] sm:$0xff] %v1378_v8   ;;  %v909_v15 = vsel %vm845_vm11, %v797_v6, %v877_v12  ;;  %v862_v20 = vmul.f32 0.01, %v760_v14  ;;  %vm830_vm12 = vcmp.ge.f32.partialorder %v760_v14, 0.0 }
  0xdd   : > { %v973_v17 = vadd.f32 %v941_v13, %v909_v15 }
  0xde   : > { %v578_v18 = vpop.f32.mrf.mxu2  ;;  %v894_v28 = vsel %vm830_vm12, %v760_v14, %v862_v20 }
  0xdf   : > { %v1458_v19 = vpack.c.bf16 %v973_v17, %v972_v16  ;;  %v799_v21 = vpop.f32.mrf.mxu3  ;;  %v958_v35 = vadd.f32 %v926_v29, %v894_v28  ;;  %v579_v40 = vadd.f32 %v1681_v36, %v578_v18 }
  0xe0   : > { %v540_v25 = vpop.f32.mrf.mxu0  ;;  %v800_v26 = vadd.f32 %v1675_v32, %v799_v21  ;;  %v944_v21 = vld [vmem:[%s1687_s25 + $0xc0] sm:$0xff] }
  0xe1   : > { %v761_v23 = vpop.f32.mrf.mxu1  ;;  %1509 = vst [vmem:[%s1707_s9 + $0x50] sm:$0xff] %v1458_v19   ;;  %v541_v27 = vadd.f32 %v1681_v36, %v540_v25 }
  0xe2   : > { %v762_v24 = vadd.f32 %v1675_v32, %v761_v23  ;;  %v878_v37 = vmul.f32 0.01, %v800_v26  ;;  %vm846_vm14 = vcmp.ge.f32.partialorder %v800_v26, 0.0  ;;  %v945_v23 = vld [vmem:[%s1687_s25 + $0xc8] sm:$0xff] }
  0xe3   : > { %v1343_v33 = vpack.c.bf16 %v541_v27, %v539_v22 }
  0xe4   : > { %vm831_vm13 = vcmp.ge.f32.partialorder %v762_v24, 0.0  ;;  %v863_v30 = vmul.f32 0.01, %v762_v24  ;;  %v910_v48 = vsel %vm846_vm14, %v800_v26, %v878_v37 }
  0xe5   : > { %1487 = vst [vmem:[%s1699_s29 + $0x18] sm:$0xff] %v1343_v33   ;;  %v974_v54 = vadd.f32 %v942_v49, %v910_v48 }
  0xe6   : > { %v895_v34 = vsel %vm831_vm13, %v762_v24, %v863_v30  ;;  %v580_v39 = vpop.f32.mrf.mxu2 }
  0xe7   : > { %v959_v38 = vadd.f32 %v927_v31, %v895_v34  ;;  %v581_v41 = vadd.f32 %v1681_v36, %v580_v39  ;;  %v801_v42 = vpop.f32.mrf.mxu3 }
  0xe8   : > { %v802_v44 = vadd.f32 %v1675_v32, %v801_v42  ;;  %v543_v47 = vpop.f32.mrf.mxu0 }
  0xe9   : > { %v1423_v43 = vpack.c.bf16 %v959_v38, %v958_v35  ;;  %v764_v45 = vpop.f32.mrf.mxu1  ;;  %v1383_v46 = vpack.c.bf16 %v581_v41, %v579_v40  ;;  %v544_v60 = vadd.f32 %v1681_v36, %v543_v47  ;;  %v930_v41 = vld [vmem:[%s1687_s25 + $0x50] sm:$0xff] }
  0xea   : > { %vm847_vm15 = vcmp.ge.f32.partialorder %v802_v44, 0.0  ;;  %v879_v50 = vmul.f32 0.01, %v802_v44  ;;  %v765_v52 = vadd.f32 %v1675_v32, %v764_v45 }
  0xeb   : > { %1502 = vst [vmem:[%s1707_s9 + $0x18] sm:$0xff] %v1423_v43   ;;  %v931_v43 = vld [vmem:[%s1687_s25 + $0x58] sm:$0xff] }
  0xec   : > { %1495 = vst [vmem:[%s1699_s29 + $0x58] sm:$0xff] %v1383_v46   ;;  %v911_v53 = vsel %vm847_vm15, %v802_v44, %v879_v50  ;;  %v864_v58 = vmul.f32 0.01, %v765_v52  ;;  %vm832_vm0 = vcmp.ge.f32.partialorder %v765_v52, 0.0 }
  0xed   : > { %v975_v55 = vadd.f32 %v943_v51, %v911_v53 }
  0xee   : > { %v583_v56 = vpop.f32.mrf.mxu2  ;;  %v896_v2 = vsel %vm832_vm0, %v765_v52, %v864_v58 }
  0xef   : > { %v1463_v57 = vpack.c.bf16 %v975_v55, %v974_v54  ;;  %v804_v59 = vpop.f32.mrf.mxu3  ;;  %v960_v8 = vadd.f32 %v928_v3, %v896_v2  ;;  %v584_v12 = vadd.f32 %v1681_v36, %v583_v56 }
  0xf0   : > { %v545_v63 = vpop.f32.mrf.mxu0  ;;  %v805_v0 = vadd.f32 %v1675_v32, %v804_v59  ;;  %v946_v59 = vld [vmem:[%s1687_s25 + $0xd0] sm:$0xff] }
  0xf1   : > { %v766_v61 = vpop.f32.mrf.mxu1  ;;  %1510 = vst [vmem:[%s1707_s9 + $0x58] sm:$0xff] %v1463_v57   ;;  %v546_v1 = vadd.f32 %v1681_v36, %v545_v63 }
  0xf2   : > { %v767_v62 = vadd.f32 %v1675_v32, %v766_v61  ;;  %v880_v9 = vmul.f32 0.01, %v805_v0  ;;  %vm848_vm2 = vcmp.ge.f32.partialorder %v805_v0, 0.0  ;;  %v947_v61 = vld [vmem:[%s1687_s25 + $0xd8] sm:$0xff] }
  0xf3   : > { %v1348_v6 = vpack.c.bf16 %v546_v1, %v544_v60 }
  0xf4   : > { %vm833_vm1 = vcmp.ge.f32.partialorder %v767_v62, 0.0  ;;  %v865_v4 = vmul.f32 0.01, %v767_v62  ;;  %v912_v20 = vsel %vm848_vm2, %v805_v0, %v880_v9 }
  0xf5   : > { %1488 = vst [vmem:[%s1699_s29 + $0x20] sm:$0xff] %v1348_v6   ;;  %v976_v26 = vadd.f32 %v944_v21, %v912_v20 }
  0xf6   : > { %v897_v7 = vsel %vm833_vm1, %v767_v62, %v865_v4  ;;  %v585_v11 = vpop.f32.mrf.mxu2 }
  0xf7   : > { %v961_v10 = vadd.f32 %v929_v5, %v897_v7  ;;  %v586_v13 = vadd.f32 %v1681_v36, %v585_v11  ;;  %v806_v14 = vpop.f32.mrf.mxu3 }
  0xf8   : > { %v807_v16 = vadd.f32 %v1675_v32, %v806_v14  ;;  %v548_v19 = vpop.f32.mrf.mxu0 }
  0xf9   : > { %v1428_v15 = vpack.c.bf16 %v961_v10, %v960_v8  ;;  %v769_v17 = vpop.f32.mrf.mxu1  ;;  %v1388_v18 = vpack.c.bf16 %v586_v13, %v584_v12  ;;  %v549_v33 = vadd.f32 %v1681_v36, %v548_v19  ;;  %v932_v13 = vld [vmem:[%s1687_s25 + $0x60] sm:$0xff] }
  0xfa   : > { %vm849_vm3 = vcmp.ge.f32.partialorder %v807_v16, 0.0  ;;  %v881_v22 = vmul.f32 0.01, %v807_v16  ;;  %v770_v24 = vadd.f32 %v1675_v32, %v769_v17 }
  0xfb   : > { %1503 = vst [vmem:[%s1707_s9 + $0x20] sm:$0xff] %v1428_v15   ;;  %v933_v15 = vld [vmem:[%s1687_s25 + $0x68] sm:$0xff] }
  0xfc   : > { %1496 = vst [vmem:[%s1699_s29 + $0x60] sm:$0xff] %v1388_v18   ;;  %v913_v25 = vsel %vm849_vm3, %v807_v16, %v881_v22  ;;  %v866_v30 = vmul.f32 0.01, %v770_v24  ;;  %vm834_vm4 = vcmp.ge.f32.partialorder %v770_v24, 0.0 }
  0xfd   : > { %v977_v27 = vadd.f32 %v945_v23, %v913_v25 }
  0xfe   : > { %v588_v28 = vpop.f32.mrf.mxu2  ;;  %v898_v40 = vsel %vm834_vm4, %v770_v24, %v866_v30 }
  0xff   : > { %v1468_v29 = vpack.c.bf16 %v977_v27, %v976_v26  ;;  %v809_v31 = vpop.f32.mrf.mxu3  ;;  %v962_v46 = vadd.f32 %v930_v41, %v898_v40  ;;  %v589_v50 = vadd.f32 %v1681_v36, %v588_v28 }
 0x100   : > { %v550_v37 = vpop.f32.mrf.mxu0  ;;  %v810_v38 = vadd.f32 %v1675_v32, %v809_v31  ;;  %v948_v31 = vld [vmem:[%s1687_s25 + $0xe0] sm:$0xff] }
 0x101   : > { %v771_v34 = vpop.f32.mrf.mxu1  ;;  %1511 = vst [vmem:[%s1707_s9 + $0x60] sm:$0xff] %v1468_v29   ;;  %v551_v39 = vadd.f32 %v1681_v36, %v550_v37 }
 0x102   : > { %v772_v35 = vadd.f32 %v1675_v32, %v771_v34  ;;  %v882_v47 = vmul.f32 0.01, %v810_v38  ;;  %vm850_vm6 = vcmp.ge.f32.partialorder %v810_v38, 0.0  ;;  %v949_v34 = vld [vmem:[%s1687_s25 + $0xe8] sm:$0xff] }
 0x103   : > { %v1353_v44 = vpack.c.bf16 %v551_v39, %v549_v33 }
 0x104   : > { %vm835_vm5 = vcmp.ge.f32.partialorder %v772_v35, 0.0  ;;  %v867_v42 = vmul.f32 0.01, %v772_v35  ;;  %v914_v58 = vsel %vm850_vm6, %v810_v38, %v882_v47 }
 0x105   : > { %1489 = vst [vmem:[%s1699_s29 + $0x28] sm:$0xff] %v1353_v44   ;;  %v978_v0 = vadd.f32 %v946_v59, %v914_v58 }
 0x106   : > { %v899_v45 = vsel %vm835_vm5, %v772_v35, %v867_v42  ;;  %v590_v49 = vpop.f32.mrf.mxu2 }
 0x107   : > { %v963_v48 = vadd.f32 %v931_v43, %v899_v45  ;;  %v591_v51 = vadd.f32 %v1681_v36, %v590_v49  ;;  %v811_v52 = vpop.f32.mrf.mxu3 }
 0x108   : > { %v812_v54 = vadd.f32 %v1675_v32, %v811_v52  ;;  %v553_v57 = vpop.f32.mrf.mxu0 }
 0x109   : > { %v1433_v53 = vpack.c.bf16 %v963_v48, %v962_v46  ;;  %v774_v55 = vpop.f32.mrf.mxu1  ;;  %v1393_v56 = vpack.c.bf16 %v591_v51, %v589_v50  ;;  %v554_v6 = vadd.f32 %v1681_v36, %v553_v57  ;;  %v934_v51 = vld [vmem:[%s1687_s25 + $0x70] sm:$0xff] }
 0x10a   : > { %vm851_vm7 = vcmp.ge.f32.partialorder %v812_v54, 0.0  ;;  %v883_v60 = vmul.f32 0.01, %v812_v54  ;;  %v775_v62 = vadd.f32 %v1675_v32, %v774_v55 }
 0x10b   : > { %1504 = vst [vmem:[%s1707_s9 + $0x28] sm:$0xff] %v1433_v53   ;;  %v935_v53 = vld [vmem:[%s1687_s25 + $0x78] sm:$0xff] }
 0x10c   : > { %1497 = vst [vmem:[%s1699_s29 + $0x68] sm:$0xff] %v1393_v56   ;;  %v915_v63 = vsel %vm851_vm7, %v812_v54, %v883_v60  ;;  %v868_v4 = vmul.f32 0.01, %v775_v62  ;;  %vm836_vm8 = vcmp.ge.f32.partialorder %v775_v62, 0.0 }
 0x10d   : > { %v979_v1 = vadd.f32 %v947_v61, %v915_v63 }
 0x10e   : > { %v593_v2 = vpop.f32.mrf.mxu2  ;;  %v900_v12 = vsel %vm836_vm8, %v775_v62, %v868_v4 }
 0x10f   : > { %v1473_v3 = vpack.c.bf16 %v979_v1, %v978_v0  ;;  %v814_v5 = vpop.f32.mrf.mxu3  ;;  %v964_v18 = vadd.f32 %v932_v13, %v900_v12  ;;  %v594_v22 = vadd.f32 %v1681_v36, %v593_v2 }
 0x110   : > { %v555_v9 = vpop.f32.mrf.mxu0  ;;  %v815_v10 = vadd.f32 %v1675_v32, %v814_v5  ;;  %v951_v5 = vld [vmem:[%s1687_s25 + $0xf8] sm:$0xff] }
 0x111   : > { %v776_v7 = vpop.f32.mrf.mxu1  ;;  %1512 = vst [vmem:[%s1707_s9 + $0x68] sm:$0xff] %v1473_v3   ;;  %v556_v11 = vadd.f32 %v1681_v36, %v555_v9  ;;  %v950_v3 = vld [vmem:[%s1687_s25 + $0xf0] sm:$0xff] }
 0x112   : > { %v777_v8 = vadd.f32 %v1675_v32, %v776_v7  ;;  %v884_v19 = vmul.f32 0.01, %v815_v10  ;;  %vm852_vm10 = vcmp.ge.f32.partialorder %v815_v10, 0.0 }
 0x113   : > { %v1358_v16 = vpack.c.bf16 %v556_v11, %v554_v6 }
 0x114   : > { %vm837_vm9 = vcmp.ge.f32.partialorder %v777_v8, 0.0  ;;  %v869_v14 = vmul.f32 0.01, %v777_v8  ;;  %v916_v30 = vsel %vm852_vm10, %v815_v10, %v884_v19 }
 0x115   : > { %1490 = vst [vmem:[%s1699_s29 + $0x30] sm:$0xff] %v1358_v16   ;;  %v980_v38 = vadd.f32 %v948_v31, %v916_v30 }
 0x116   : > { %v901_v17 = vsel %vm837_vm9, %v777_v8, %v869_v14  ;;  %v595_v21 = vpop.f32.mrf.mxu2 }
 0x117   : > { %v965_v20 = vadd.f32 %v933_v15, %v901_v17  ;;  %v596_v23 = vadd.f32 %v1681_v36, %v595_v21  ;;  %v816_v24 = vpop.f32.mrf.mxu3 }
 0x118   : > { %v817_v26 = vadd.f32 %v1675_v32, %v816_v24  ;;  %v558_v29 = vpop.f32.mrf.mxu0 }
 0x119   : > { %v1438_v25 = vpack.c.bf16 %v965_v20, %v964_v18  ;;  %v779_v27 = vpop.f32.mrf.mxu1  ;;  %v1398_v28 = vpack.c.bf16 %v596_v23, %v594_v22  ;;  %v559_v44 = vadd.f32 %v1681_v36, %v558_v29 }
 0x11a   : > { %vm853_vm11 = vcmp.ge.f32.partialorder %v817_v26, 0.0  ;;  %v885_v33 = vmul.f32 0.01, %v817_v26  ;;  %v780_v35 = vadd.f32 %v1675_v32, %v779_v27 }
 0x11b   : > { %1505 = vst [vmem:[%s1707_s9 + $0x30] sm:$0xff] %v1438_v25  }
 0x11c   : > { %1498 = vst [vmem:[%s1699_s29 + $0x70] sm:$0xff] %v1398_v28   ;;  %v917_v37 = vsel %vm853_vm11, %v817_v26, %v885_v33  ;;  %v870_v42 = vmul.f32 0.01, %v780_v35  ;;  %vm838_vm12 = vcmp.ge.f32.partialorder %v780_v35, 0.0 }
 0x11d   : > { %v981_v39 = vadd.f32 %v949_v34, %v917_v37 }
 0x11e   : > { %v598_v40 = vpop.f32.mrf.mxu2  ;;  %v902_v50 = vsel %vm838_vm12, %v780_v35, %v870_v42 }
 0x11f   : > { %v1478_v41 = vpack.c.bf16 %v981_v39, %v980_v38  ;;  %v819_v43 = vpop.f32.mrf.mxu3  ;;  %v966_v56 = vadd.f32 %v934_v51, %v902_v50  ;;  %v599_v60 = vadd.f32 %v1681_v36, %v598_v40 }
 0x120   : > { %v560_v47 = vpop.f32.mrf.mxu0  ;;  %v820_v48 = vadd.f32 %v1675_v32, %v819_v43 }
 0x121   : > { %v781_v45 = vpop.f32.mrf.mxu1  ;;  %1513 = vst [vmem:[%s1707_s9 + $0x70] sm:$0xff] %v1478_v41   ;;  %v561_v49 = vadd.f32 %v1681_v36, %v560_v47 }
 0x122   : > { %v782_v46 = vadd.f32 %v1675_v32, %v781_v45  ;;  %v886_v57 = vmul.f32 0.01, %v820_v48  ;;  %vm854_vm14 = vcmp.ge.f32.partialorder %v820_v48, 0.0 }
 0x123   : > { %v1363_v54 = vpack.c.bf16 %v561_v49, %v559_v44 }
 0x124   : > { %vm839_vm13 = vcmp.ge.f32.partialorder %v782_v46, 0.0  ;;  %v871_v52 = vmul.f32 0.01, %v782_v46  ;;  %v918_v2 = vsel %vm854_vm14, %v820_v48, %v886_v57 }
 0x125   : > { %1491 = vst [vmem:[%s1699_s29 + $0x38] sm:$0xff] %v1363_v54   ;;  %v982_v7 = vadd.f32 %v950_v3, %v918_v2 }
 0x126   : > { %v903_v55 = vsel %vm839_vm13, %v782_v46, %v871_v52  ;;  %v600_v59 = vpop.f32.mrf.mxu2 }
 0x127   : > { %v967_v58 = vadd.f32 %v935_v53, %v903_v55  ;;  %v601_v61 = vadd.f32 %v1681_v36, %v600_v59  ;;  %v821_v62 = vpop.f32.mrf.mxu3 }
 0x128   : > { %v822_v0 = vadd.f32 %v1675_v32, %v821_v62 }
 0x129   : > { %v1443_v63 = vpack.c.bf16 %v967_v58, %v966_v56  ;;  %v1403_v1 = vpack.c.bf16 %v601_v61, %v599_v60 }
 0x12a   : > { %vm855_vm15 = vcmp.ge.f32.partialorder %v822_v0, 0.0  ;;  %v887_v4 = vmul.f32 0.01, %v822_v0 }
 0x12b   : > { %1506 = vst [vmem:[%s1707_s9 + $0x38] sm:$0xff] %v1443_v63  }
 0x12c   : > { %1499 = vst [vmem:[%s1699_s29 + $0x78] sm:$0xff] %v1403_v1   ;;  %v919_v6 = vsel %vm855_vm15, %v822_v0, %v887_v4 }
 0x12d   : > { %v983_v8 = vadd.f32 %v951_v5, %v919_v6 }
 0x12f   : > { %v1483_v9 = vpack.c.bf16 %v983_v8, %v982_v7 }
 0x131   : > { %1514 = vst [vmem:[%s1707_s9 + $0x78] sm:$0xff] %v1483_v9  }
 0x132 PF: > { %s18_s24 = sadd.s32 1, %s1547_s24  }
 0x133   : > { %p15_p4 = scmp.ge.s32.totalorder %s18_s24, 4  }
 0x135   :  { %17 = sbr.rel (!%p15_p4) target bundleno = 1 (0x1), region = 89 }

// kernel: graph_conv_net_forward.7
= control target key start
LH: loop header
LB: loop body
LE: loop exit
PB: predicated region body
PF: predicated region fallthrough
CT: control target
= control target key end

     0   :  { %s2684_s21 = smov 0   ;;  %s2686_s22 = smov 0   ;;  %s3054_s0 = inlined_call_operand.vmem [shape: bf16[512,128], index: 0, kind: input, shape index: {}]   ;;  %s3055_s1 = inlined_call_operand.vmem [shape: bf16[512,512], index: 1, kind: input, shape index: {}]   ;;  %s3056_s2 = inlined_call_operand.vmem [shape: bf16[512,128], index: 2, kind: input, shape index: {}]   ;;  %s3057_s3 = inlined_call_operand.vmem [shape: bf16[128,128], index: 3, kind: input, shape index: {}]   ;;  %s3058_s4 = inlined_call_operand.vmem [shape: bf16[128,128], index: 4, kind: input, shape index: {}]   ;;  %s3059_s5 = inlined_call_operand.vmem [shape: f32[1,128], index: 5, kind: input, shape index: {}]   ;;  %s3060_s6 = inlined_call_operand.vmem [shape: bf16[512,128], index: 6, kind: output, shape index: {}]  }
   0x1   :  { %s2688_s23 = smov 0   ;;  %s2690_s24 = smov 0  }
   0x2   :  { %s2692_s25 = smov 0   ;;  %s2694_s26 = smov 0  }
   0x3   :  { %s2696_s27 = smov 0  }
   0x4 LB: > { %s25_s28 = sadd.s32 1, %s2638_s25  ;;  %s28_s29 = sadd.s32 1, %s2642_s26  ;;  %s2646_s27 = sphi %s2696_s27, %s16_s27   ;;  %s2642_s26 = sphi %s2694_s26, %s3066_s26   ;;  %s2638_s25 = sphi %s2692_s25, %s3065_s25   ;;  %s2634_s24 = sphi %s2690_s24, %s3064_s24   ;;  %s2630_s23 = sphi %s2688_s23, %s3063_s23   ;;  %s2626_s22 = sphi %s2686_s22, %s3062_s22   ;;  %s2622_s21 = sphi %s2684_s21, %s3061_s21  }
   0x5   : > { %p26_p0 = scmp.ge.s32.totalorder %s25_s28, 2  ;;  %p70_p1 = scmp.ne.s32.totalorder %s2626_s22, %s2622_s21 }
   0x6   : > { %p71_p2 = scmp.eq.s32.totalorder %s2646_s27, 0  ;;  %s63_s9 = sadd.s32 1, %s2626_s22 }
   0x7   : > { %s3068_s28 = smov (%p26_p0, %s25_s28), 0  ;;  %s3070_s29 = smov (!%p26_p0, %s28_s29), %s2642_s26 }
   0x8   : > { %p72_p3 = por %p71_p2, %p70_p1  ;;  %p30_p4 = scmp.ge.s32.totalorder %s3070_s29, 2 }
   0x9   : > { %s59_s30 = ssub.s32 %s2638_s25, %s3068_s28  ;;  %p1988_p6 = scmp.ge.s32.totalorder %s2646_s27, 4 }
   0xa   : > { %s3072_s29 = smov (%p30_p4, %s3070_s29), 0 }
   0xb   : > { %s58_s7 = ssub.s32 %s2642_s26, %s3072_s29  ;;  %220 = sbr.rel (%p1988_p6) target bundleno = 55 (0x37), region = 28 }
   0xc   : > { %s60_s8 = sor.u32 %s59_s30, %s58_s7 }
   0xd   : > { %p61_p5 = scmp.eq.s32.totalorder %s60_s8, 0 }
   0xf   : > { %s2735_s10 = scalar_select %p61_p5, %s2626_s22, %s63_s9  }
  0x10   : > { %232 = sbr.rel (!%p72_p3) target bundleno = 55 (0x37), region = 36  ;;  %s234_s11 = sand.u32 (%p72_p3), 1, %s2626_s22  }
  0x11   : > { %s1991_s12 = sshll.u32 (%p72_p3), %s2638_s25, 1  ;;  %s1989_s13 = sshll.u32 (%p72_p3), %s234_s11, 8 }
  0x12   : > { %s2326_s14 = sshll.u32 (%p72_p3), %s2642_s26, 7  ;;  %s2749_s20 = scalar_lea.vmem (%p72_p3), [#allocation3], %s1989_s13 }
  0x13   : > { %s240_s15 = sadd.s32 (%p72_p3), %s2326_s14, %s1991_s12 }
  0x14   : > { %s1993_s16 = sshll.u32 (%p72_p3), %s240_s15, 2 }
  0x15   : > { %s2744_s19 = scalar_lea.vmem %s3055_s1, %s1993_s16 }
  0x16   : > { %v333_v0 = vld [vmem:[%s2744_s19] sm:$0xff]  ;;  %v335_v1 = vld [vmem:[%s2744_s19 + $0x10] sm:$0xff] }
  0x17   : > { %v337_v2 = vld [vmem:[%s2744_s19 + $0x20] sm:$0xff]  ;;  %334 = vst [vmem:[%s2749_s20] sm:$0xff] %v333_v0  ;;  %v339_v3 = vld [vmem:[%s2744_s19 + $0x30] sm:$0xff] }
  0x18   : > { %336 = vst [vmem:[%s2749_s20 + $0x8] sm:$0xff] %v335_v1  ;;  %v341_v4 = vld [vmem:[%s2744_s19 + $0x40] sm:$0xff]  ;;  %v343_v5 = vld [vmem:[%s2744_s19 + $0x50] sm:$0xff] }
  0x19   : > { %338 = vst [vmem:[%s2749_s20 + $0x10] sm:$0xff] %v337_v2  ;;  %v345_v6 = vld [vmem:[%s2744_s19 + $0x60] sm:$0xff]  ;;  %v347_v7 = vld [vmem:[%s2744_s19 + $0x70] sm:$0xff] }
  0x1a   : > { %340 = vst [vmem:[%s2749_s20 + $0x18] sm:$0xff] %v339_v3  ;;  %v349_v8 = vld [vmem:[%s2744_s19 + $0x80] sm:$0xff]  ;;  %v351_v9 = vld [vmem:[%s2744_s19 + $0x90] sm:$0xff] }
  0x1b   : > { %342 = vst [vmem:[%s2749_s20 + $0x20] sm:$0xff] %v341_v4  ;;  %v353_v10 = vld [vmem:[%s2744_s19 + $0xa0] sm:$0xff]  ;;  %v355_v11 = vld [vmem:[%s2744_s19 + $0xb0] sm:$0xff] }
  0x1c   : > { %344 = vst [vmem:[%s2749_s20 + $0x28] sm:$0xff] %v343_v5  ;;  %v357_v12 = vld [vmem:[%s2744_s19 + $0xc0] sm:$0xff]  ;;  %v359_v13 = vld [vmem:[%s2744_s19 + $0xd0] sm:$0xff] }
  0x1d   : > { %346 = vst [vmem:[%s2749_s20 + $0x30] sm:$0xff] %v345_v6  ;;  %v361_v14 = vld [vmem:[%s2744_s19 + $0xe0] sm:$0xff]  ;;  %v363_v15 = vld [vmem:[%s2744_s19 + $0xf0] sm:$0xff] }
  0x1e   : > { %348 = vst [vmem:[%s2749_s20 + $0x38] sm:$0xff] %v347_v7  ;;  %v365_v16 = vld [vmem:[%s2744_s19 + $0x100] sm:$0xff]  ;;  %v367_v17 = vld [vmem:[%s2744_s19 + $0x110] sm:$0xff] }
  0x1f   : > { %350 = vst [vmem:[%s2749_s20 + $0x40] sm:$0xff] %v349_v8  ;;  %v369_v18 = vld [vmem:[%s2744_s19 + $0x120] sm:$0xff]  ;;  %v371_v19 = vld [vmem:[%s2744_s19 + $0x130] sm:$0xff] }
  0x20   : > { %352 = vst [vmem:[%s2749_s20 + $0x48] sm:$0xff] %v351_v9  ;;  %v373_v20 = vld [vmem:[%s2744_s19 + $0x140] sm:$0xff]  ;;  %v375_v21 = vld [vmem:[%s2744_s19 + $0x150] sm:$0xff] }
  0x21   : > { %354 = vst [vmem:[%s2749_s20 + $0x50] sm:$0xff] %v353_v10  ;;  %v377_v22 = vld [vmem:[%s2744_s19 + $0x160] sm:$0xff]  ;;  %v379_v23 = vld [vmem:[%s2744_s19 + $0x170] sm:$0xff] }
  0x22   : > { %356 = vst [vmem:[%s2749_s20 + $0x58] sm:$0xff] %v355_v11  ;;  %v381_v24 = vld [vmem:[%s2744_s19 + $0x180] sm:$0xff]  ;;  %v383_v25 = vld [vmem:[%s2744_s19 + $0x190] sm:$0xff] }
  0x23   : > { %358 = vst [vmem:[%s2749_s20 + $0x60] sm:$0xff] %v357_v12  ;;  %v385_v26 = vld [vmem:[%s2744_s19 + $0x1a0] sm:$0xff]  ;;  %v387_v27 = vld [vmem:[%s2744_s19 + $0x1b0] sm:$0xff] }
  0x24   : > { %360 = vst [vmem:[%s2749_s20 + $0x68] sm:$0xff] %v359_v13  ;;  %v389_v28 = vld [vmem:[%s2744_s19 + $0x1c0] sm:$0xff]  ;;  %v391_v29 = vld [vmem:[%s2744_s19 + $0x1d0] sm:$0xff] }
  0x25   : > { %362 = vst [vmem:[%s2749_s20 + $0x70] sm:$0xff] %v361_v14  ;;  %v393_v30 = vld [vmem:[%s2744_s19 + $0x1e0] sm:$0xff]  ;;  %v395_v31 = vld [vmem:[%s2744_s19 + $0x1f0] sm:$0xff] }
  0x26   : > { %364 = vst [vmem:[%s2749_s20 + $0x78] sm:$0xff] %v363_v15 }
  0x27   : > { %366 = vst [vmem:[%s2749_s20 + $0x80] sm:$0xff] %v365_v16 }
  0x28   : > { %368 = vst [vmem:[%s2749_s20 + $0x88] sm:$0xff] %v367_v17 }
  0x29   : > { %370 = vst [vmem:[%s2749_s20 + $0x90] sm:$0xff] %v369_v18 }
  0x2a   : > { %372 = vst [vmem:[%s2749_s20 + $0x98] sm:$0xff] %v371_v19 }
  0x2b   : > { %374 = vst [vmem:[%s2749_s20 + $0xa0] sm:$0xff] %v373_v20 }
  0x2c   : > { %376 = vst [vmem:[%s2749_s20 + $0xa8] sm:$0xff] %v375_v21 }
  0x2d   : > { %378 = vst [vmem:[%s2749_s20 + $0xb0] sm:$0xff] %v377_v22 }
  0x2e   : > { %380 = vst [vmem:[%s2749_s20 + $0xb8] sm:$0xff] %v379_v23 }
  0x2f   : > { %382 = vst [vmem:[%s2749_s20 + $0xc0] sm:$0xff] %v381_v24 }
  0x30   : > { %384 = vst [vmem:[%s2749_s20 + $0xc8] sm:$0xff] %v383_v25 }
  0x31   : > { %386 = vst [vmem:[%s2749_s20 + $0xd0] sm:$0xff] %v385_v26 }
  0x32   : > { %388 = vst [vmem:[%s2749_s20 + $0xd8] sm:$0xff] %v387_v27 }
  0x33   : > { %390 = vst [vmem:[%s2749_s20 + $0xe0] sm:$0xff] %v389_v28 }
  0x34   : > { %392 = vst [vmem:[%s2749_s20 + $0xe8] sm:$0xff] %v391_v29 }
  0x35   : > { %394 = vst [vmem:[%s2749_s20 + $0xf0] sm:$0xff] %v393_v30 }
  0x36   : > { %396 = vst [vmem:[%s2749_s20 + $0xf8] sm:$0xff] %v395_v31 }
  0x37 PF: > { %p1994_p7 = scmp.ge.s32.totalorder %s2646_s27, 1  ;;  %p410_p8 = scmp.lt.s32.totalorder %s2646_s27, 5 }
  0x39   : > { %p411_p9 = pnand %p1994_p7, %p410_p8 }
  0x3a   : > { %s417_s30 = sand.u32 (!%p411_p9), 1, %s2622_s21   ;;  %s1996_s7 = sshll.u32 (!%p411_p9), %s2630_s23, 5 }
  0x3b   : > { %414 = sbr.rel (%p411_p9) target bundleno = 690 (0x2b2), region = 78  ;;  %s1995_s8 = sshll.u32 (!%p411_p9), %s417_s30, 8 }
  0x3c   : > { %p457_p10 = scmp.lt.s32.totalorder (!%p411_p9), %s1996_s7, 63  ;;  %s1998_s9 = sshll.u32 (!%p411_p9), %s2634_s24, 5 }
  0x3d   : > { %p465_p11 = scmp.lt.s32.totalorder (!%p411_p9), %s1998_s9, 63  ;;  %s2832_s24 = scalar_lea.vmem (!%p411_p9), [#allocation3], %s1995_s8 }
  0x3e   : > { %p2002_p12 = scmp.ne.s32.totalorder (!%p411_p9), %s2630_s23, 0 }
  0x40   : > { %s3074_s7 = smov (!%p457_p10, %s1996_s7), 63  ;;  %s3076_s9 = smov (!%p465_p11, %s1998_s9), 63 }
  0x41   : > { %s1997_s11 = sshll.u32 %s3074_s7, 2  ;;  %s1999_s15 = sshll.u32 %s3076_s9, 2 }
  0x42   : > { %s2820_s14 = scalar_lea.vmem %s3054_s0, %s1997_s11  ;;  %s2825_s18 = scalar_lea.vmem %s3056_s2, %s1999_s15 }
  0x43   : > { %s2830_s20 = scalar_lea.vmem %s3060_s6, %s1999_s15  ;;  %479 = sbr.rel (%p2002_p12) target bundleno = 105 (0x69), region = 86 }
  0x48   : > { %v2648_v32 = vmov 0.0  }
  0x49   : > { %480 = vst [vmem:[#allocation2 + $0xb0] sm:$0xff] %v2648_v32 }
  0x4a   : > { %481 = vst [vmem:[#allocation2] sm:$0xff] %v2648_v32 }
  0x4b   : > { %482 = vst [vmem:[#allocation2 + $0xd8] sm:$0xff] %v2648_v32 }
  0x4c   : > { %483 = vst [vmem:[#allocation2 + $0x18] sm:$0xff] %v2648_v32 }
  0x4d   : > { %484 = vst [vmem:[#allocation2 + $0x50] sm:$0xff] %v2648_v32 }
  0x4e   : > { %485 = vst [vmem:[#allocation2 + $0x68] sm:$0xff] %v2648_v32 }
  0x4f   : > { %486 = vst [vmem:[#allocation2 + $0x30] sm:$0xff] %v2648_v32 }
  0x50   : > { %487 = vst [vmem:[#allocation2 + $0x48] sm:$0xff] %v2648_v32 }
  0x51   : > { %488 = vst [vmem:[#allocation2 + $0x80] sm:$0xff] %v2648_v32 }
  0x52   : > { %489 = vst [vmem:[#allocation2 + $0x88] sm:$0xff] %v2648_v32 }
  0x53   : > { %490 = vst [vmem:[#allocation2 + $0xe8] sm:$0xff] %v2648_v32 }
  0x54   : > { %491 = vst [vmem:[#allocation2 + $0xb8] sm:$0xff] %v2648_v32 }
  0x55   : > { %492 = vst [vmem:[#allocation2 + $0x60] sm:$0xff] %v2648_v32 }
  0x56   : > { %493 = vst [vmem:[#allocation2 + $0xf0] sm:$0xff] %v2648_v32 }
  0x57   : > { %494 = vst [vmem:[#allocation2 + $0x8] sm:$0xff] %v2648_v32 }
  0x58   : > { %495 = vst [vmem:[#allocation2 + $0x78] sm:$0xff] %v2648_v32 }
  0x59   : > { %496 = vst [vmem:[#allocation2 + $0x38] sm:$0xff] %v2648_v32 }
  0x5a   : > { %497 = vst [vmem:[#allocation2 + $0x58] sm:$0xff] %v2648_v32 }
  0x5b   : > { %498 = vst [vmem:[#allocation2 + $0x40] sm:$0xff] %v2648_v32 }
  0x5c   : > { %499 = vst [vmem:[#allocation2 + $0xc8] sm:$0xff] %v2648_v32 }
  0x5d   : > { %500 = vst [vmem:[#allocation2 + $0xe0] sm:$0xff] %v2648_v32 }
  0x5e   : > { %501 = vst [vmem:[#allocation2 + $0x90] sm:$0xff] %v2648_v32 }
  0x5f   : > { %502 = vst [vmem:[#allocation2 + $0x70] sm:$0xff] %v2648_v32 }
  0x60   : > { %503 = vst [vmem:[#allocation2 + $0xc0] sm:$0xff] %v2648_v32 }
  0x61   : > { %504 = vst [vmem:[#allocation2 + $0xa8] sm:$0xff] %v2648_v32 }
  0x62   : > { %505 = vst [vmem:[#allocation2 + $0xd0] sm:$0xff] %v2648_v32 }
  0x63   : > { %506 = vst [vmem:[#allocation2 + $0x10] sm:$0xff] %v2648_v32 }
  0x64   : > { %507 = vst [vmem:[#allocation2 + $0x28] sm:$0xff] %v2648_v32 }
  0x65   : > { %508 = vst [vmem:[#allocation2 + $0xa0] sm:$0xff] %v2648_v32 }
  0x66   : > { %509 = vst [vmem:[#allocation2 + $0xf8] sm:$0xff] %v2648_v32 }
  0x67   : > { %510 = vst [vmem:[#allocation2 + $0x20] sm:$0xff] %v2648_v32 }
  0x68   : > { %511 = vst [vmem:[#allocation2 + $0x98] sm:$0xff] %v2648_v32 }
  0x69 PF: > { %v2366_v33 = vld [vmem:[%s2820_s14 + $0x38] sm:$0xff]  ;;  %v2365_v35 = vld [vmem:[%s2820_s14 + $0x30] sm:$0xff]  ;;  %v2364_v37 = vld [vmem:[%s2820_s14 + $0x28] sm:$0xff]  ;;  %p2195_p13 = scmp.ne.s32.totalorder %s2630_s23, 1 }
  0x6a   : > { %v2374_v34 = vld [vmem:[%s2820_s14 + $0x78] sm:$0xff]  ;;  %864 = vmatpush.bf16.msra.mxu0 %v2366_v33  ;;  %2502 = vmatpush.bf16.msra.mxu2 %v2366_v33  ;;  %v2373_v36 = vld [vmem:[%s2820_s14 + $0x70] sm:$0xff]  ;;  %v2372_v38 = vld [vmem:[%s2820_s14 + $0x68] sm:$0xff] }
  0x6b   : > { %953 = vmatpush.bf16.msra.mxu1 %v2374_v34  ;;  %2510 = vmatpush.bf16.msra.mxu3 %v2374_v34  ;;  %v2363_v39 = vld [vmem:[%s2820_s14 + $0x20] sm:$0xff]  ;;  %v2362_v41 = vld [vmem:[%s2820_s14 + $0x18] sm:$0xff]  ;;  %v2361_v43 = vld [vmem:[%s2820_s14 + $0x10] sm:$0xff] }
  0x6c   : > { %v2371_v40 = vld [vmem:[%s2820_s14 + $0x60] sm:$0xff]  ;;  %v2370_v42 = vld [vmem:[%s2820_s14 + $0x58] sm:$0xff]  ;;  %v2369_v44 = vld [vmem:[%s2820_s14 + $0x50] sm:$0xff] }
  0x6d   : > { %v2360_v45 = vld [vmem:[%s2820_s14 + $0x8] sm:$0xff]  ;;  %v2359_v47 = vld [vmem:[%s2820_s14] sm:$0xff]  ;;  %v2013_v61 = vld [vmem:[%s2832_s24 + $0x10] sm:$0xf] }
  0x6e   : > { %865 = vmatpush.bf16.msra.mxu0 %v2365_v35  ;;  %2503 = vmatpush.bf16.msra.mxu2 %v2365_v35  ;;  %v2368_v46 = vld [vmem:[%s2820_s14 + $0x48] sm:$0xff]  ;;  %v2367_v48 = vld [vmem:[%s2820_s14 + $0x40] sm:$0xff]  ;;  %v2330_v62 = vld [vmem:[%s2832_s24 + $0x14] sm:$0xf0] }
  0x6f   : > { %954 = vmatpush.bf16.msra.mxu1 %v2373_v36  ;;  %2511 = vmatpush.bf16.msra.mxu3 %v2373_v36  ;;  %v2005_v49 = vld [vmem:[%s2832_s24] sm:$0xf]  ;;  %v2328_v50 = vld [vmem:[%s2832_s24 + $0x4] sm:$0xf0]  ;;  %v2327_v53 = vld [vmem:[%s2832_s24 + $0x4] sm:$0xf]  ;;  %v2014_v5 = vor.u32 %v2330_v62, %v2013_v61 }
  0x70   : > { %v2069_v51 = vld [vmem:[%s2832_s24 + $0x80] sm:$0xf]  ;;  %v2344_v52 = vld [vmem:[%s2832_s24 + $0x84] sm:$0xf0]  ;;  %v2007_v54 = vld [vmem:[%s2832_s24 + $0x8] sm:$0xf0]  ;;  %v2006_v57 = vor.u32 %v2328_v50, %v2005_v49 }
  0x71   : > { %v2343_v55 = vld [vmem:[%s2832_s24 + $0x84] sm:$0xf]  ;;  %v2071_v56 = vld [vmem:[%s2832_s24 + $0x88] sm:$0xf0]  ;;  %v2070_v58 = vor.u32 %v2344_v52, %v2069_v51  ;;  %v2010_v59 = vor.u32 %v2327_v53, %v2007_v54  ;;  %v2077_v63 = vld [vmem:[%s2832_s24 + $0x90] sm:$0xf] }
  0x72   : > { %866 = vmatpush.bf16.msra.mxu0 %v2364_v37  ;;  %2504 = vmatpush.bf16.msra.mxu2 %v2364_v37  ;;  %v2074_v60 = vor.u32 %v2343_v55, %v2071_v56  ;;  %v2346_v0 = vld [vmem:[%s2832_s24 + $0x94] sm:$0xf0]  ;;  %v2329_v1 = vld [vmem:[%s2832_s24 + $0x14] sm:$0xf]  ;;  %v2015_v2 = vld [vmem:[%s2832_s24 + $0x18] sm:$0xf0] }
  0x73   : > { %955 = vmatpush.bf16.msra.mxu1 %v2372_v38  ;;  %2512 = vmatpush.bf16.msra.mxu3 %v2372_v38  ;;  %v2345_v3 = vld [vmem:[%s2832_s24 + $0x94] sm:$0xf]  ;;  %v2079_v4 = vld [vmem:[%s2832_s24 + $0x98] sm:$0xf0]  ;;  %v2078_v6 = vor.u32 %v2346_v0, %v2077_v63  ;;  %v2018_v7 = vor.u32 %v2329_v1, %v2015_v2  ;;  %v2021_v9 = vld [vmem:[%s2832_s24 + $0x20] sm:$0xf] }
  0x74   : > { %v2082_v8 = vor.u32 %v2345_v3, %v2079_v4  ;;  %v2332_v10 = vld [vmem:[%s2832_s24 + $0x24] sm:$0xf0]  ;;  %v2085_v11 = vld [vmem:[%s2832_s24 + $0xa0] sm:$0xf]  ;;  %v2331_v13 = vld [vmem:[%s2832_s24 + $0x24] sm:$0xf] }
  0x75   : > { %v2348_v12 = vld [vmem:[%s2832_s24 + $0xa4] sm:$0xf0]  ;;  %v2023_v14 = vld [vmem:[%s2832_s24 + $0x28] sm:$0xf0]  ;;  %v2347_v15 = vld [vmem:[%s2832_s24 + $0xa4] sm:$0xf]  ;;  %v2022_v17 = vor.u32 %v2332_v10, %v2021_v9 }
  0x76   : > { %867 = vmatpush.bf16.msra.mxu0 %v2363_v39  ;;  %2505 = vmatpush.bf16.msra.mxu2 %v2363_v39  ;;  %v2087_v16 = vld [vmem:[%s2832_s24 + $0xa8] sm:$0xf0]  ;;  %v2086_v18 = vor.u32 %v2348_v12, %v2085_v11  ;;  %v2026_v19 = vor.u32 %v2331_v13, %v2023_v14  ;;  %v2029_v21 = vld [vmem:[%s2832_s24 + $0x30] sm:$0xf]  ;;  %v2334_v22 = vld [vmem:[%s2832_s24 + $0x34] sm:$0xf0] }
  0x77   : > { %956 = vmatpush.bf16.msra.mxu1 %v2371_v40  ;;  %2513 = vmatpush.bf16.msra.mxu3 %v2371_v40  ;;  %v2090_v20 = vor.u32 %v2347_v15, %v2087_v16  ;;  %v2093_v23 = vld [vmem:[%s2832_s24 + $0xb0] sm:$0xf]  ;;  %v2350_v24 = vld [vmem:[%s2832_s24 + $0xb4] sm:$0xf0]  ;;  %v2333_v25 = vld [vmem:[%s2832_s24 + $0x34] sm:$0xf]  ;;  %v2030_v29 = vor.u32 %v2334_v22, %v2029_v21 }
  0x78   : > { %v2031_v26 = vld [vmem:[%s2832_s24 + $0x38] sm:$0xf0]  ;;  %v2349_v27 = vld [vmem:[%s2832_s24 + $0xb4] sm:$0xf]  ;;  %v2094_v30 = vor.u32 %v2350_v24, %v2093_v23  ;;  %v2037_v33 = vld [vmem:[%s2832_s24 + $0x40] sm:$0xf] }
  0x79   : > { %v2095_v28 = vld [vmem:[%s2832_s24 + $0xb8] sm:$0xf0]  ;;  %v2034_v31 = vor.u32 %v2333_v25, %v2031_v26  ;;  %v2336_v34 = vld [vmem:[%s2832_s24 + $0x44] sm:$0xf0]  ;;  %v2101_v35 = vld [vmem:[%s2832_s24 + $0xc0] sm:$0xf] }
  0x7a   : > { %868 = vmatpush.bf16.msra.mxu0 %v2362_v41  ;;  %2506 = vmatpush.bf16.msra.mxu2 %v2362_v41  ;;  %v2098_v32 = vor.u32 %v2349_v27, %v2095_v28  ;;  %v2352_v36 = vld [vmem:[%s2832_s24 + $0xc4] sm:$0xf0]  ;;  %v2335_v37 = vld [vmem:[%s2832_s24 + $0x44] sm:$0xf]  ;;  %v2039_v38 = vld [vmem:[%s2832_s24 + $0x48] sm:$0xf0]  ;;  %v2038_v41 = vor.u32 %v2336_v34, %v2037_v33 }
  0x7b   : > { %957 = vmatpush.bf16.msra.mxu1 %v2370_v42  ;;  %2514 = vmatpush.bf16.msra.mxu3 %v2370_v42  ;;  %v2351_v39 = vld [vmem:[%s2832_s24 + $0xc4] sm:$0xf]  ;;  %v2103_v40 = vld [vmem:[%s2832_s24 + $0xc8] sm:$0xf0]  ;;  %v2102_v42 = vor.u32 %v2352_v36, %v2101_v35  ;;  %v2337_v49 = vld [vmem:[%s2832_s24 + $0x54] sm:$0xf] }
  0x7c   : > { %v2047_v50 = vld [vmem:[%s2832_s24 + $0x58] sm:$0xf0]  ;;  %v2353_v51 = vld [vmem:[%s2832_s24 + $0xd4] sm:$0xf]  ;;  %v2339_v61 = vld [vmem:[%s2832_s24 + $0x64] sm:$0xf] }
  0x7d   : > { %v2111_v52 = vld [vmem:[%s2832_s24 + $0xd8] sm:$0xf0]  ;;  %v2050_v55 = vor.u32 %v2337_v49, %v2047_v50  ;;  %v2055_v62 = vld [vmem:[%s2832_s24 + $0x68] sm:$0xf0]  ;;  %v2355_v63 = vld [vmem:[%s2832_s24 + $0xe4] sm:$0xf] }
  0x7e   : > { %869 = vmatpush.bf16.msra.mxu0 %v2361_v43  ;;  %2507 = vmatpush.bf16.msra.mxu2 %v2361_v43  ;;  %v2042_v43 = vor.u32 %v2335_v37, %v2039_v38  ;;  %v2114_v56 = vor.u32 %v2353_v51, %v2111_v52  ;;  %v2119_v0 = vld [vmem:[%s2832_s24 + $0xe8] sm:$0xf0]  ;;  %v2058_v3 = vor.u32 %v2339_v61, %v2055_v62  ;;  %v2341_v9 = vld [vmem:[%s2832_s24 + $0x74] sm:$0xf]  ;;  %v2063_v10 = vld [vmem:[%s2832_s24 + $0x78] sm:$0xf0] }
  0x7f   : > { %958 = vmatpush.bf16.msra.mxu1 %v2369_v44  ;;  %2515 = vmatpush.bf16.msra.mxu3 %v2369_v44  ;;  %v2106_v44 = vor.u32 %v2351_v39, %v2103_v40  ;;  %v2122_v4 = vor.u32 %v2355_v63, %v2119_v0  ;;  %v2357_v11 = vld [vmem:[%s2832_s24 + $0xf4] sm:$0xf]  ;;  %v2127_v12 = vld [vmem:[%s2832_s24 + $0xf8] sm:$0xf0]  ;;  %v2066_v15 = vor.u32 %v2341_v9, %v2063_v10  ;;  %v513_v27 = vld [vmem:[#allocation2] sm:$0xff] }
  0x80   : > { %v2130_v16 = vor.u32 %v2357_v11, %v2127_v12  ;;  %v528_v23 = vld [vmem:[#allocation2 + $0x38] sm:$0xff]  ;;  %v532_v63 = vld [vmem:[#allocation2 + $0xe0] sm:$0xff]  ;;  %v533_v9 = vld [vmem:[#allocation2 + $0x90] sm:$0xff] }
  0x81   : > { %v529_v33 = vld [vmem:[#allocation2 + $0x58] sm:$0xff] }
  0x82   : > { %870 = vmatpush.bf16.msra.mxu0 %v2360_v45  ;;  %2508 = vmatpush.bf16.msra.mxu2 %v2360_v45  ;;  %v2045_v45 = vld [vmem:[%s2832_s24 + $0x50] sm:$0xf]  ;;  %v514_v37 = vld [vmem:[#allocation2 + $0xd8] sm:$0xff] }
  0x83   : > { %959 = vmatpush.bf16.msra.mxu1 %v2368_v46  ;;  %2516 = vmatpush.bf16.msra.mxu3 %v2368_v46  ;;  %v2338_v46 = vld [vmem:[%s2832_s24 + $0x54] sm:$0xf0] }
  0x84   : > { %v2046_v53 = vor.u32 %v2338_v46, %v2045_v45 }
  0x86   : > { %871 = vmatpush.bf16.msra.mxu0 %v2359_v47  ;;  %2509 = vmatpush.bf16.msra.mxu2 %v2359_v47  ;;  %v2109_v47 = vld [vmem:[%s2832_s24 + $0xd0] sm:$0xf] }
  0x87   : > { %960 = vmatpush.bf16.msra.mxu1 %v2367_v48  ;;  %2517 = vmatpush.bf16.msra.mxu3 %v2367_v48  ;;  %v2354_v48 = vld [vmem:[%s2832_s24 + $0xd4] sm:$0xf0] }
  0x88   : > { %v2110_v54 = vor.u32 %v2354_v48, %v2109_v47  ;;  %v515_v47 = vld [vmem:[#allocation2 + $0x18] sm:$0xff] }
  0x89   : > { %872 = vmatmul.bf16.vlgmr.msra.gmra.mxu0 %v2006_v57  ;;  %912 = vmatmul.bf16.vlgmr.msra.gmra.mxu2 %v2070_v58  ;;  %v2053_v57 = vld [vmem:[%s2832_s24 + $0x60] sm:$0xf]  ;;  %v2340_v58 = vld [vmem:[%s2832_s24 + $0x64] sm:$0xf0] }
  0x8a   : > { %961 = vmatmul.bf16.vlgmr.msra.gmra.mxu1 %v2010_v59  ;;  %1001 = vmatmul.bf16.vlgmr.msra.gmra.mxu3 %v2074_v60  ;;  %v2117_v59 = vld [vmem:[%s2832_s24 + $0xe0] sm:$0xf]  ;;  %v2356_v60 = vld [vmem:[%s2832_s24 + $0xe4] sm:$0xf0]  ;;  %v2054_v1 = vor.u32 %v2340_v58, %v2053_v57  ;;  %v516_v57 = vld [vmem:[#allocation2 + $0x50] sm:$0xff] }
  0x8b   : > { %v2118_v2 = vor.u32 %v2356_v60, %v2117_v59 }
  0x99   : > { %877 = vmatmul.bf16.gmra.mxu0 %v2014_v5  ;;  %917 = vmatmul.bf16.gmra.mxu2 %v2078_v6  ;;  %v2061_v5 = vld [vmem:[%s2832_s24 + $0x70] sm:$0xf]  ;;  %v2342_v6 = vld [vmem:[%s2832_s24 + $0x74] sm:$0xf0] }
  0x9a   : > { %966 = vmatmul.bf16.gmra.mxu1 %v2018_v7  ;;  %1006 = vmatmul.bf16.gmra.mxu3 %v2082_v8  ;;  %v2125_v7 = vld [vmem:[%s2832_s24 + $0xf0] sm:$0xf]  ;;  %v2358_v8 = vld [vmem:[%s2832_s24 + $0xf4] sm:$0xf0]  ;;  %v2062_v13 = vor.u32 %v2342_v6, %v2061_v5 }
  0x9b   : > { %v2126_v14 = vor.u32 %v2358_v8, %v2125_v7 }
  0xa9   : > { %882 = vmatmul.bf16.gmra.mxu0 %v2022_v17  ;;  %922 = vmatmul.bf16.gmra.mxu2 %v2086_v18  ;;  %v512_v18 = vld [vmem:[#allocation2 + $0xb0] sm:$0xff] }
  0xaa   : > { %971 = vmatmul.bf16.gmra.mxu1 %v2026_v19  ;;  %1011 = vmatmul.bf16.gmra.mxu3 %v2090_v20 }
  0xb9   : > { %887 = vmatmul.bf16.gmra.mxu0 %v2030_v29  ;;  %927 = vmatmul.bf16.gmra.mxu2 %v2094_v30 }
  0xba   : > { %976 = vmatmul.bf16.gmra.mxu1 %v2034_v31  ;;  %1016 = vmatmul.bf16.gmra.mxu3 %v2098_v32 }
  0xc9   : > { %892 = vmatmul.bf16.gmra.mxu0 %v2038_v41  ;;  %932 = vmatmul.bf16.gmra.mxu2 %v2102_v42 }
  0xca   : > { %981 = vmatmul.bf16.gmra.mxu1 %v2042_v43  ;;  %1021 = vmatmul.bf16.gmra.mxu3 %v2106_v44  ;;  %v530_v43 = vld [vmem:[#allocation2 + $0x40] sm:$0xff] }
  0xd9   : > { %897 = vmatmul.bf16.gmra.mxu0 %v2046_v53  ;;  %937 = vmatmul.bf16.gmra.mxu2 %v2110_v54  ;;  %v531_v53 = vld [vmem:[#allocation2 + $0xc8] sm:$0xff] }
  0xda   : > { %986 = vmatmul.bf16.gmra.mxu1 %v2050_v55  ;;  %1026 = vmatmul.bf16.gmra.mxu3 %v2114_v56 }
  0xe9   : > { %902 = vmatmul.bf16.gmra.mxu0 %v2054_v1  ;;  %942 = vmatmul.bf16.gmra.mxu2 %v2118_v2 }
  0xea   : > { %991 = vmatmul.bf16.gmra.mxu1 %v2058_v3  ;;  %1031 = vmatmul.bf16.gmra.mxu3 %v2122_v4  ;;  %v517_v3 = vld [vmem:[#allocation2 + $0x68] sm:$0xff] }
  0xf9   : > { %907 = vmatmul.bf16.gmra.mxu0 %v2062_v13  ;;  %947 = vmatmul.bf16.gmra.mxu2 %v2126_v14  ;;  %v518_v13 = vld [vmem:[#allocation2 + $0x30] sm:$0xff] }
  0xfa   : > { %996 = vmatmul.bf16.gmra.mxu1 %v2066_v15  ;;  %1036 = vmatmul.bf16.gmra.mxu3 %v2130_v16 }
 0x106   : > { %v873_v17 = vpop.f32.mrf.mxu0 }
 0x107   : > { %v962_v19 = vpop.f32.mrf.mxu1 }
 0x108   : > { %v963_v20 = vadd.f32 %v962_v19, %v873_v17  ;;  %v534_v19 = vld [vmem:[#allocation2 + $0x70] sm:$0xff] }
 0x10a   : > { %v1042_v21 = vadd.f32 %v963_v20, %v512_v18 }
 0x10c   : > { %1074 = vst [vmem:[#allocation2 + $0xb0] sm:$0xff] %v1042_v21  ;;  %v913_v22 = vpop.f32.mrf.mxu2 }
 0x10d   : > { %v1002_v24 = vpop.f32.mrf.mxu3 }
 0x10e   : > { %v1003_v25 = vadd.f32 %v1002_v24, %v913_v22  ;;  %v875_v26 = vpop.f32.mrf.mxu0 }
 0x10f   : > { %v964_v28 = vpop.f32.mrf.mxu1 }
 0x110   : > { %v1058_v29 = vadd.f32 %v1003_v25, %v528_v23  ;;  %v965_v30 = vadd.f32 %v964_v28, %v875_v26  ;;  %v519_v23 = vld [vmem:[#allocation2 + $0x48] sm:$0xff] }
 0x112   : > { %1090 = vst [vmem:[#allocation2 + $0x38] sm:$0xff] %v1058_v29  ;;  %v1043_v31 = vadd.f32 %v965_v30, %v513_v27  ;;  %v535_v29 = vld [vmem:[#allocation2 + $0xc0] sm:$0xff] }
 0x114   : > { %1075 = vst [vmem:[#allocation2] sm:$0xff] %v1043_v31  ;;  %v915_v32 = vpop.f32.mrf.mxu2 }
 0x115   : > { %v1004_v34 = vpop.f32.mrf.mxu3 }
 0x116   : > { %v1005_v35 = vadd.f32 %v1004_v34, %v915_v32  ;;  %v878_v36 = vpop.f32.mrf.mxu0 }
 0x117   : > { %v967_v38 = vpop.f32.mrf.mxu1 }
 0x118   : > { %v1059_v39 = vadd.f32 %v1005_v35, %v529_v33  ;;  %v968_v40 = vadd.f32 %v967_v38, %v878_v36  ;;  %v520_v33 = vld [vmem:[#allocation2 + $0x80] sm:$0xff] }
 0x11a   : > { %1091 = vst [vmem:[#allocation2 + $0x58] sm:$0xff] %v1059_v39  ;;  %v1044_v41 = vadd.f32 %v968_v40, %v514_v37  ;;  %v536_v39 = vld [vmem:[#allocation2 + $0xa8] sm:$0xff] }
 0x11c   : > { %1076 = vst [vmem:[#allocation2 + $0xd8] sm:$0xff] %v1044_v41  ;;  %v918_v42 = vpop.f32.mrf.mxu2 }
 0x11d   : > { %v1007_v44 = vpop.f32.mrf.mxu3 }
 0x11e   : > { %v1008_v45 = vadd.f32 %v1007_v44, %v918_v42  ;;  %v880_v46 = vpop.f32.mrf.mxu0 }
 0x11f   : > { %v969_v48 = vpop.f32.mrf.mxu1 }
 0x120   : > { %v1060_v49 = vadd.f32 %v1008_v45, %v530_v43  ;;  %v970_v50 = vadd.f32 %v969_v48, %v880_v46  ;;  %v521_v43 = vld [vmem:[#allocation2 + $0x88] sm:$0xff] }
 0x122   : > { %1092 = vst [vmem:[#allocation2 + $0x40] sm:$0xff] %v1060_v49  ;;  %v1045_v51 = vadd.f32 %v970_v50, %v515_v47  ;;  %v537_v49 = vld [vmem:[#allocation2 + $0xd0] sm:$0xff] }
 0x124   : > { %1077 = vst [vmem:[#allocation2 + $0x18] sm:$0xff] %v1045_v51  ;;  %v920_v52 = vpop.f32.mrf.mxu2 }
 0x125   : > { %v1009_v54 = vpop.f32.mrf.mxu3 }
 0x126   : > { %v1010_v55 = vadd.f32 %v1009_v54, %v920_v52  ;;  %v883_v56 = vpop.f32.mrf.mxu0 }
 0x127   : > { %v972_v58 = vpop.f32.mrf.mxu1 }
 0x128   : > { %v1061_v59 = vadd.f32 %v1010_v55, %v531_v53  ;;  %v973_v60 = vadd.f32 %v972_v58, %v883_v56  ;;  %v522_v53 = vld [vmem:[#allocation2 + $0xe8] sm:$0xff] }
 0x12a   : > { %1093 = vst [vmem:[#allocation2 + $0xc8] sm:$0xff] %v1061_v59  ;;  %v1046_v61 = vadd.f32 %v973_v60, %v516_v57  ;;  %v538_v59 = vld [vmem:[#allocation2 + $0x10] sm:$0xff] }
 0x12c   : > { %1078 = vst [vmem:[#allocation2 + $0x50] sm:$0xff] %v1046_v61  ;;  %v923_v62 = vpop.f32.mrf.mxu2 }
 0x12d   : > { %v1012_v0 = vpop.f32.mrf.mxu3 }
 0x12e   : > { %v1013_v1 = vadd.f32 %v1012_v0, %v923_v62  ;;  %v885_v2 = vpop.f32.mrf.mxu0 }
 0x12f   : > { %v974_v4 = vpop.f32.mrf.mxu1 }
 0x130   : > { %v1062_v5 = vadd.f32 %v1013_v1, %v532_v63  ;;  %v975_v6 = vadd.f32 %v974_v4, %v885_v2  ;;  %v523_v63 = vld [vmem:[#allocation2 + $0xb8] sm:$0xff] }
 0x132   : > { %1094 = vst [vmem:[#allocation2 + $0xe0] sm:$0xff] %v1062_v5  ;;  %v1047_v7 = vadd.f32 %v975_v6, %v517_v3  ;;  %v539_v5 = vld [vmem:[#allocation2 + $0x28] sm:$0xff] }
 0x134   : > { %1079 = vst [vmem:[#allocation2 + $0x68] sm:$0xff] %v1047_v7  ;;  %v925_v8 = vpop.f32.mrf.mxu2 }
 0x135   : > { %v1014_v10 = vpop.f32.mrf.mxu3 }
 0x136   : > { %v1015_v11 = vadd.f32 %v1014_v10, %v925_v8  ;;  %v888_v12 = vpop.f32.mrf.mxu0 }
 0x137   : > { %v977_v14 = vpop.f32.mrf.mxu1 }
 0x138   : > { %v1063_v15 = vadd.f32 %v1015_v11, %v533_v9  ;;  %v978_v16 = vadd.f32 %v977_v14, %v888_v12  ;;  %v524_v9 = vld [vmem:[#allocation2 + $0x60] sm:$0xff] }
 0x13a   : > { %1095 = vst [vmem:[#allocation2 + $0x90] sm:$0xff] %v1063_v15  ;;  %v1048_v17 = vadd.f32 %v978_v16, %v518_v13  ;;  %v540_v15 = vld [vmem:[#allocation2 + $0xa0] sm:$0xff] }
 0x13c   : > { %1080 = vst [vmem:[#allocation2 + $0x30] sm:$0xff] %v1048_v17  ;;  %v928_v18 = vpop.f32.mrf.mxu2 }
 0x13d   : > { %v1017_v20 = vpop.f32.mrf.mxu3 }
 0x13e   : > { %v1018_v21 = vadd.f32 %v1017_v20, %v928_v18  ;;  %v890_v22 = vpop.f32.mrf.mxu0 }
 0x13f   : > { %v979_v24 = vpop.f32.mrf.mxu1 }
 0x140   : > { %v1064_v25 = vadd.f32 %v1018_v21, %v534_v19  ;;  %v980_v26 = vadd.f32 %v979_v24, %v890_v22  ;;  %v525_v19 = vld [vmem:[#allocation2 + $0xf0] sm:$0xff] }
 0x142   : > { %1096 = vst [vmem:[#allocation2 + $0x70] sm:$0xff] %v1064_v25  ;;  %v1049_v27 = vadd.f32 %v980_v26, %v519_v23  ;;  %v541_v25 = vld [vmem:[#allocation2 + $0xf8] sm:$0xff] }
 0x144   : > { %1081 = vst [vmem:[#allocation2 + $0x48] sm:$0xff] %v1049_v27  ;;  %v930_v28 = vpop.f32.mrf.mxu2 }
 0x145   : > { %v1019_v30 = vpop.f32.mrf.mxu3 }
 0x146   : > { %v1020_v31 = vadd.f32 %v1019_v30, %v930_v28  ;;  %v893_v32 = vpop.f32.mrf.mxu0 }
 0x147   : > { %v982_v34 = vpop.f32.mrf.mxu1 }
 0x148   : > { %v1065_v35 = vadd.f32 %v1020_v31, %v535_v29  ;;  %v983_v36 = vadd.f32 %v982_v34, %v893_v32  ;;  %v526_v29 = vld [vmem:[#allocation2 + $0x8] sm:$0xff] }
 0x14a   : > { %1097 = vst [vmem:[#allocation2 + $0xc0] sm:$0xff] %v1065_v35  ;;  %v1050_v37 = vadd.f32 %v983_v36, %v520_v33  ;;  %v542_v35 = vld [vmem:[#allocation2 + $0x20] sm:$0xff] }
 0x14c   : > { %1082 = vst [vmem:[#allocation2 + $0x80] sm:$0xff] %v1050_v37  ;;  %v933_v38 = vpop.f32.mrf.mxu2 }
 0x14d   : > { %v1022_v40 = vpop.f32.mrf.mxu3 }
 0x14e   : > { %v1023_v41 = vadd.f32 %v1022_v40, %v933_v38  ;;  %v895_v42 = vpop.f32.mrf.mxu0 }
 0x14f   : > { %v984_v44 = vpop.f32.mrf.mxu1 }
 0x150   : > { %v1066_v45 = vadd.f32 %v1023_v41, %v536_v39  ;;  %v985_v46 = vadd.f32 %v984_v44, %v895_v42  ;;  %v527_v39 = vld [vmem:[#allocation2 + $0x78] sm:$0xff] }
 0x152   : > { %1098 = vst [vmem:[#allocation2 + $0xa8] sm:$0xff] %v1066_v45  ;;  %v1051_v47 = vadd.f32 %v985_v46, %v521_v43  ;;  %v543_v45 = vld [vmem:[#allocation2 + $0x98] sm:$0xff] }
 0x154   : > { %1083 = vst [vmem:[#allocation2 + $0x88] sm:$0xff] %v1051_v47  ;;  %v935_v48 = vpop.f32.mrf.mxu2 }
 0x155   : > { %v1024_v50 = vpop.f32.mrf.mxu3 }
 0x156   : > { %v1025_v51 = vadd.f32 %v1024_v50, %v935_v48  ;;  %v898_v52 = vpop.f32.mrf.mxu0 }
 0x157   : > { %v987_v54 = vpop.f32.mrf.mxu1 }
 0x158   : > { %v1067_v55 = vadd.f32 %v1025_v51, %v537_v49  ;;  %v988_v56 = vadd.f32 %v987_v54, %v898_v52 }
 0x15a   : > { %1099 = vst [vmem:[#allocation2 + $0xd0] sm:$0xff] %v1067_v55  ;;  %v1052_v57 = vadd.f32 %v988_v56, %v522_v53 }
 0x15c   : > { %1084 = vst [vmem:[#allocation2 + $0xe8] sm:$0xff] %v1052_v57  ;;  %v938_v58 = vpop.f32.mrf.mxu2 }
 0x15d   : > { %v1027_v60 = vpop.f32.mrf.mxu3 }
 0x15e   : > { %v1028_v61 = vadd.f32 %v1027_v60, %v938_v58  ;;  %v900_v62 = vpop.f32.mrf.mxu0 }
 0x15f   : > { %v989_v0 = vpop.f32.mrf.mxu1 }
 0x160   : > { %v1068_v1 = vadd.f32 %v1028_v61, %v538_v59  ;;  %v990_v2 = vadd.f32 %v989_v0, %v900_v62 }
 0x162   : > { %1100 = vst [vmem:[#allocation2 + $0x10] sm:$0xff] %v1068_v1  ;;  %v1053_v3 = vadd.f32 %v990_v2, %v523_v63 }
 0x164   : > { %1085 = vst [vmem:[#allocation2 + $0xb8] sm:$0xff] %v1053_v3  ;;  %v940_v4 = vpop.f32.mrf.mxu2 }
 0x165   : > { %v1029_v6 = vpop.f32.mrf.mxu3 }
 0x166   : > { %v1030_v7 = vadd.f32 %v1029_v6, %v940_v4  ;;  %v903_v8 = vpop.f32.mrf.mxu0 }
 0x167   : > { %v992_v10 = vpop.f32.mrf.mxu1 }
 0x168   : > { %v1069_v11 = vadd.f32 %v1030_v7, %v539_v5  ;;  %v993_v12 = vadd.f32 %v992_v10, %v903_v8 }
 0x16a   : > { %1101 = vst [vmem:[#allocation2 + $0x28] sm:$0xff] %v1069_v11  ;;  %v1054_v13 = vadd.f32 %v993_v12, %v524_v9 }
 0x16c   : > { %1086 = vst [vmem:[#allocation2 + $0x60] sm:$0xff] %v1054_v13  ;;  %v943_v14 = vpop.f32.mrf.mxu2 }
 0x16d   : > { %v1032_v16 = vpop.f32.mrf.mxu3 }
 0x16e   : > { %v1033_v17 = vadd.f32 %v1032_v16, %v943_v14  ;;  %v905_v18 = vpop.f32.mrf.mxu0 }
 0x16f   : > { %v994_v20 = vpop.f32.mrf.mxu1 }
 0x170   : > { %v1070_v21 = vadd.f32 %v1033_v17, %v540_v15  ;;  %v995_v22 = vadd.f32 %v994_v20, %v905_v18 }
 0x172   : > { %1102 = vst [vmem:[#allocation2 + $0xa0] sm:$0xff] %v1070_v21  ;;  %v1055_v23 = vadd.f32 %v995_v22, %v525_v19 }
 0x174   : > { %1087 = vst [vmem:[#allocation2 + $0xf0] sm:$0xff] %v1055_v23  ;;  %v945_v24 = vpop.f32.mrf.mxu2 }
 0x175   : > { %v1034_v26 = vpop.f32.mrf.mxu3 }
 0x176   : > { %v1035_v27 = vadd.f32 %v1034_v26, %v945_v24  ;;  %v908_v28 = vpop.f32.mrf.mxu0 }
 0x177   : > { %v997_v30 = vpop.f32.mrf.mxu1 }
 0x178   : > { %v1071_v31 = vadd.f32 %v1035_v27, %v541_v25  ;;  %v998_v32 = vadd.f32 %v997_v30, %v908_v28 }
 0x17a   : > { %1103 = vst [vmem:[#allocation2 + $0xf8] sm:$0xff] %v1071_v31  ;;  %v1056_v33 = vadd.f32 %v998_v32, %v526_v29 }
 0x17c   : > { %1088 = vst [vmem:[#allocation2 + $0x8] sm:$0xff] %v1056_v33  ;;  %v948_v34 = vpop.f32.mrf.mxu2 }
 0x17d   : > { %v1037_v36 = vpop.f32.mrf.mxu3 }
 0x17e   : > { %v1038_v37 = vadd.f32 %v1037_v36, %v948_v34  ;;  %v910_v38 = vpop.f32.mrf.mxu0 }
 0x17f   : > { %v999_v40 = vpop.f32.mrf.mxu1 }
 0x180   : > { %v1072_v41 = vadd.f32 %v1038_v37, %v542_v35  ;;  %v1000_v42 = vadd.f32 %v999_v40, %v910_v38 }
 0x182   : > { %1104 = vst [vmem:[#allocation2 + $0x20] sm:$0xff] %v1072_v41  ;;  %v1057_v43 = vadd.f32 %v1000_v42, %v527_v39 }
 0x184   : > { %1089 = vst [vmem:[#allocation2 + $0x78] sm:$0xff] %v1057_v43  ;;  %v950_v44 = vpop.f32.mrf.mxu2 }
 0x185   : > { %v1039_v46 = vpop.f32.mrf.mxu3 }
 0x186   : > { %v1040_v47 = vadd.f32 %v1039_v46, %v950_v44  ;;  %1109 = sbr.rel (%p2195_p13) target bundleno = 690 (0x2b2), region = 90 }
 0x188   : > { %v1073_v48 = vadd.f32 %v1040_v47, %v543_v45 }
 0x18a   : > { %1105 = vst [vmem:[#allocation2 + $0x98] sm:$0xff] %v1073_v48 }
 0x18b   : > { %v2406_v49 = vld [vmem:[%s3058_s4 + $0x38] sm:$0xff]  ;;  %v2405_v51 = vld [vmem:[%s3058_s4 + $0x30] sm:$0xff]  ;;  %v2404_v53 = vld [vmem:[%s3058_s4 + $0x28] sm:$0xff] }
 0x18c   : > { %v2382_v50 = vld [vmem:[%s3057_s3 + $0x38] sm:$0xff]  ;;  %1462 = vmatpush.bf16.msra.mxu0 %v2406_v49  ;;  %2518 = vmatpush.bf16.msra.mxu2 %v2406_v49  ;;  %v2381_v52 = vld [vmem:[%s3057_s3 + $0x30] sm:$0xff]  ;;  %v2380_v54 = vld [vmem:[%s3057_s3 + $0x28] sm:$0xff] }
 0x18d   : > { %1599 = vmatpush.bf16.msra.mxu1 %v2382_v50  ;;  %2526 = vmatpush.bf16.msra.mxu3 %v2382_v50  ;;  %v2403_v55 = vld [vmem:[%s3058_s4 + $0x20] sm:$0xff]  ;;  %v2402_v57 = vld [vmem:[%s3058_s4 + $0x18] sm:$0xff]  ;;  %v2401_v59 = vld [vmem:[%s3058_s4 + $0x10] sm:$0xff] }
 0x18e   : > { %v2379_v56 = vld [vmem:[%s3057_s3 + $0x20] sm:$0xff]  ;;  %v2378_v58 = vld [vmem:[%s3057_s3 + $0x18] sm:$0xff]  ;;  %v2377_v60 = vld [vmem:[%s3057_s3 + $0x10] sm:$0xff] }
 0x18f   : > { %v1110_v61 = vld [vmem:[#allocation2 + $0xb0] sm:$0xff]  ;;  %v1111_v62 = vld [vmem:[#allocation2] sm:$0xff]  ;;  %v1126_v63 = vld [vmem:[#allocation2 + $0x38] sm:$0xff] }
 0x190   : > { %1463 = vmatpush.bf16.msra.mxu0 %v2405_v51  ;;  %2519 = vmatpush.bf16.msra.mxu2 %v2405_v51  ;;  %v1127_v0 = vld [vmem:[#allocation2 + $0x58] sm:$0xff]  ;;  %v2400_v1 = vld [vmem:[%s3058_s4 + $0x8] sm:$0xff]  ;;  %vm1142_vm0 = vcmp.ge.f32.partialorder %v1110_v61, 0.0  ;;  %v1174_v3 = vmul.f32 0.01, %v1110_v61  ;;  %vm1143_vm1 = vcmp.ge.f32.partialorder %v1111_v62, 0.0 }
 0x191   : > { %1600 = vmatpush.bf16.msra.mxu1 %v2381_v52  ;;  %2527 = vmatpush.bf16.msra.mxu3 %v2381_v52  ;;  %v2376_v2 = vld [vmem:[%s3057_s3 + $0x8] sm:$0xff]  ;;  %v1175_v4 = vmul.f32 0.01, %v1111_v62  ;;  %v1190_v5 = vmul.f32 0.01, %v1126_v63  ;;  %vm1158_vm2 = vcmp.ge.f32.partialorder %v1126_v63, 0.0 }
 0x192   : > { %v1191_v6 = vmul.f32 0.01, %v1127_v0  ;;  %vm1159_vm3 = vcmp.ge.f32.partialorder %v1127_v0, 0.0  ;;  %v2399_v7 = vld [vmem:[%s3058_s4] sm:$0xff]  ;;  %v1206_v8 = vsel %vm1142_vm0, %v1110_v61, %v1174_v3  ;;  %v1112_v17 = vld [vmem:[#allocation2 + $0xd8] sm:$0xff]  ;;  %v1129_v20 = vld [vmem:[#allocation2 + $0xc8] sm:$0xff] }
 0x193   : > { %v2375_v9 = vld [vmem:[%s3057_s3] sm:$0xff]  ;;  %v1207_v10 = vsel %vm1143_vm1, %v1111_v62, %v1175_v4  ;;  %v1222_v11 = vsel %vm1158_vm2, %v1126_v63, %v1190_v5  ;;  %v1113_v18 = vld [vmem:[#allocation2 + $0x18] sm:$0xff]  ;;  %v1176_v21 = vmul.f32 0.01, %v1112_v17  ;;  %v1193_v24 = vmul.f32 0.01, %v1129_v20 }
 0x194   : > { %1464 = vmatpush.bf16.msra.mxu0 %v2404_v53  ;;  %2520 = vmatpush.bf16.msra.mxu2 %v2404_v53  ;;  %v1223_v12 = vsel %vm1159_vm3, %v1127_v0, %v1191_v6  ;;  %v2383_v13 = vld [vmem:[%s2825_s18] sm:$0xff]  ;;  %v1238_v15 = vpack.c.bf16 %v1207_v10, %v1206_v8  ;;  %v1177_v22 = vmul.f32 0.01, %v1113_v18  ;;  %vm1144_vm4 = vcmp.ge.f32.partialorder %v1112_v17, 0.0  ;;  %v2384_v29 = vld [vmem:[%s2825_s18 + $0x8] sm:$0xff]  ;;  %v1114_v33 = vld [vmem:[#allocation2 + $0x50] sm:$0xff] }
 0x195   : > { %1601 = vmatpush.bf16.msra.mxu1 %v2380_v54  ;;  %2528 = vmatpush.bf16.msra.mxu3 %v2380_v54  ;;  %v2391_v14 = vld [vmem:[%s2825_s18 + $0x40] sm:$0xff]  ;;  %v1246_v16 = vpack.c.bf16 %v1223_v12, %v1222_v11  ;;  %vm1145_vm5 = vcmp.ge.f32.partialorder %v1113_v18, 0.0  ;;  %vm1161_vm7 = vcmp.ge.f32.partialorder %v1129_v20, 0.0  ;;  %v1208_v25 = vsel %vm1144_vm4, %v1112_v17, %v1176_v21  ;;  %v2392_v30 = vld [vmem:[%s2825_s18 + $0x48] sm:$0xff]  ;;  %v1131_v36 = vld [vmem:[#allocation2 + $0x90] sm:$0xff] }
 0x196   : > { %v1128_v19 = vld [vmem:[#allocation2 + $0x40] sm:$0xff]  ;;  %v1209_v26 = vsel %vm1145_vm5, %v1113_v18, %v1177_v22  ;;  %v1225_v28 = vsel %vm1161_vm7, %v1129_v20, %v1193_v24  ;;  %v1115_v34 = vld [vmem:[#allocation2 + $0x68] sm:$0xff]  ;;  %v1178_v37 = vmul.f32 0.01, %v1114_v33  ;;  %v1195_v40 = vmul.f32 0.01, %v1131_v36 }
 0x197   : > { %v1192_v23 = vmul.f32 0.01, %v1128_v19  ;;  %vm1160_vm6 = vcmp.ge.f32.partialorder %v1128_v19, 0.0  ;;  %v1239_v31 = vpack.c.bf16 %v1209_v26, %v1208_v25  ;;  %v1130_v35 = vld [vmem:[#allocation2 + $0xe0] sm:$0xff]  ;;  %v1179_v38 = vmul.f32 0.01, %v1115_v34 }
 0x198   : > { %1465 = vmatpush.bf16.msra.mxu0 %v2403_v55  ;;  %2521 = vmatpush.bf16.msra.mxu2 %v2403_v55  ;;  %v1194_v39 = vmul.f32 0.01, %v1130_v35  ;;  %vm1146_vm8 = vcmp.ge.f32.partialorder %v1114_v33, 0.0  ;;  %vm1147_vm9 = vcmp.ge.f32.partialorder %v1115_v34, 0.0  ;;  %vm1162_vm10 = vcmp.ge.f32.partialorder %v1130_v35, 0.0  ;;  %v2385_v45 = vld [vmem:[%s2825_s18 + $0x10] sm:$0xff] }
 0x199   : > { %1602 = vmatpush.bf16.msra.mxu1 %v2379_v56  ;;  %2529 = vmatpush.bf16.msra.mxu3 %v2379_v56  ;;  %v1224_v27 = vsel %vm1160_vm6, %v1128_v19, %v1192_v23  ;;  %vm1163_vm11 = vcmp.ge.f32.partialorder %v1131_v36, 0.0  ;;  %v1210_v41 = vsel %vm1146_vm8, %v1114_v33, %v1178_v37  ;;  %v1211_v42 = vsel %vm1147_vm9, %v1115_v34, %v1179_v38  ;;  %v2393_v46 = vld [vmem:[%s2825_s18 + $0x50] sm:$0xff]  ;;  %v1117_v50 = vld [vmem:[#allocation2 + $0x48] sm:$0xff]  ;;  %v1133_v52 = vld [vmem:[#allocation2 + $0xc0] sm:$0xff] }
 0x19a   : > { %v1247_v32 = vpack.c.bf16 %v1225_v28, %v1224_v27  ;;  %v1226_v43 = vsel %vm1162_vm10, %v1130_v35, %v1194_v39  ;;  %v1227_v44 = vsel %vm1163_vm11, %v1131_v36, %v1195_v40  ;;  %v1240_v47 = vpack.c.bf16 %v1211_v42, %v1210_v41  ;;  %v1116_v49 = vld [vmem:[#allocation2 + $0x30] sm:$0xff]  ;;  %v2386_v61 = vld [vmem:[%s2825_s18 + $0x18] sm:$0xff]  ;;  %v1134_v3 = vld [vmem:[#allocation2 + $0xa8] sm:$0xff] }
 0x19b   : > { %v1248_v48 = vpack.c.bf16 %v1227_v44, %v1226_v43  ;;  %v1132_v51 = vld [vmem:[#allocation2 + $0x70] sm:$0xff]  ;;  %v1180_v53 = vmul.f32 0.01, %v1116_v49  ;;  %v1181_v54 = vmul.f32 0.01, %v1117_v50  ;;  %vm1148_vm12 = vcmp.ge.f32.partialorder %v1116_v49, 0.0 }
 0x19c   : > { %1466 = vmatpush.bf16.msra.mxu0 %v2402_v57  ;;  %2522 = vmatpush.bf16.msra.mxu2 %v2402_v57  ;;  %v1196_v55 = vmul.f32 0.01, %v1132_v51  ;;  %v1197_v56 = vmul.f32 0.01, %v1133_v52  ;;  %vm1149_vm13 = vcmp.ge.f32.partialorder %v1117_v50, 0.0  ;;  %vm1164_vm14 = vcmp.ge.f32.partialorder %v1132_v51, 0.0 }
 0x19d   : > { %1603 = vmatpush.bf16.msra.mxu1 %v2378_v58  ;;  %2530 = vmatpush.bf16.msra.mxu3 %v2378_v58  ;;  %vm1165_vm15 = vcmp.ge.f32.partialorder %v1133_v52, 0.0  ;;  %v1212_v57 = vsel %vm1148_vm12, %v1116_v49, %v1180_v53  ;;  %v1213_v58 = vsel %vm1149_vm13, %v1117_v50, %v1181_v54  ;;  %v2394_v62 = vld [vmem:[%s2825_s18 + $0x58] sm:$0xff]  ;;  %v1135_v4 = vld [vmem:[#allocation2 + $0xd0] sm:$0xff]  ;;  %vm1166_vm2 = vcmp.ge.f32.partialorder %v1134_v3, 0.0  ;;  %v1120_v17 = vld [vmem:[#allocation2 + $0xe8] sm:$0xff] }
 0x19e   : > { %v1241_v63 = vpack.c.bf16 %v1213_v58, %v1212_v57  ;;  %v1199_v8 = vmul.f32 0.01, %v1135_v4  ;;  %vm1167_vm3 = vcmp.ge.f32.partialorder %v1135_v4, 0.0  ;;  %v1121_v18 = vld [vmem:[#allocation2 + $0xb8] sm:$0xff]  ;;  %v1136_v19 = vld [vmem:[#allocation2 + $0x10] sm:$0xff]  ;;  %v1137_v20 = vld [vmem:[#allocation2 + $0x28] sm:$0xff] }
 0x19f   : > { %v1184_v21 = vmul.f32 0.01, %v1120_v17  ;;  %v1185_v22 = vmul.f32 0.01, %v1121_v18  ;;  %v1200_v23 = vmul.f32 0.01, %v1136_v19 }
 0x1a0   : > { %1467 = vmatpush.bf16.msra.mxu0 %v2401_v59  ;;  %2523 = vmatpush.bf16.msra.mxu2 %v2401_v59  ;;  %v1228_v59 = vsel %vm1164_vm14, %v1132_v51, %v1196_v55  ;;  %v1231_v12 = vsel %vm1167_vm3, %v1135_v4, %v1199_v8  ;;  %v1201_v24 = vmul.f32 0.01, %v1137_v20  ;;  %vm1152_vm4 = vcmp.ge.f32.partialorder %v1120_v17, 0.0  ;;  %v1122_v33 = vld [vmem:[#allocation2 + $0x60] sm:$0xff]  ;;  %v1123_v34 = vld [vmem:[#allocation2 + $0xf0] sm:$0xff]  ;;  %v1139_v36 = vld [vmem:[#allocation2 + $0xf8] sm:$0xff] }
 0x1a1   : > { %1604 = vmatpush.bf16.msra.mxu1 %v2377_v60  ;;  %2531 = vmatpush.bf16.msra.mxu3 %v2377_v60  ;;  %v1229_v60 = vsel %vm1165_vm15, %v1133_v52, %v1197_v56  ;;  %vm1153_vm5 = vcmp.ge.f32.partialorder %v1121_v18, 0.0  ;;  %vm1168_vm6 = vcmp.ge.f32.partialorder %v1136_v19, 0.0  ;;  %vm1169_vm7 = vcmp.ge.f32.partialorder %v1137_v20, 0.0  ;;  %v1138_v35 = vld [vmem:[#allocation2 + $0xa0] sm:$0xff]  ;;  %v1124_v49 = vld [vmem:[#allocation2 + $0x8] sm:$0xff]  ;;  %v1125_v50 = vld [vmem:[#allocation2 + $0x78] sm:$0xff] }
 0x1a2   : > { %v1249_v0 = vpack.c.bf16 %v1229_v60, %v1228_v59  ;;  %v1216_v25 = vsel %vm1152_vm4, %v1120_v17, %v1184_v21  ;;  %v1217_v26 = vsel %vm1153_vm5, %v1121_v18, %v1185_v22  ;;  %v1232_v27 = vsel %vm1168_vm6, %v1136_v19, %v1200_v23  ;;  %v1140_v51 = vld [vmem:[#allocation2 + $0x20] sm:$0xff]  ;;  %v1141_v52 = vld [vmem:[#allocation2 + $0x98] sm:$0xff] }
 0x1a3   : > { %v1233_v28 = vsel %vm1169_vm7, %v1137_v20, %v1201_v24  ;;  %v1186_v37 = vmul.f32 0.01, %v1122_v33  ;;  %v1187_v38 = vmul.f32 0.01, %v1123_v34  ;;  %v1202_v39 = vmul.f32 0.01, %v1138_v35 }
 0x1a4   : > { %1468 = vmatpush.bf16.msra.mxu0 %v2400_v1  ;;  %2524 = vmatpush.bf16.msra.mxu2 %v2400_v1  ;;  %v1118_v1 = vld [vmem:[#allocation2 + $0x80] sm:$0xff]  ;;  %v1203_v40 = vmul.f32 0.01, %v1139_v36  ;;  %vm1154_vm8 = vcmp.ge.f32.partialorder %v1122_v33, 0.0  ;;  %vm1155_vm9 = vcmp.ge.f32.partialorder %v1123_v34, 0.0  ;;  %vm1170_vm10 = vcmp.ge.f32.partialorder %v1138_v35, 0.0 }
 0x1a5   : > { %1605 = vmatpush.bf16.msra.mxu1 %v2376_v2  ;;  %2532 = vmatpush.bf16.msra.mxu3 %v2376_v2  ;;  %v1119_v2 = vld [vmem:[#allocation2 + $0x88] sm:$0xff]  ;;  %v1182_v5 = vmul.f32 0.01, %v1118_v1  ;;  %vm1150_vm0 = vcmp.ge.f32.partialorder %v1118_v1, 0.0  ;;  %vm1171_vm11 = vcmp.ge.f32.partialorder %v1139_v36, 0.0  ;;  %v1218_v41 = vsel %vm1154_vm8, %v1122_v33, %v1186_v37 }
 0x1a6   : > { %v1183_v6 = vmul.f32 0.01, %v1119_v2  ;;  %vm1151_vm1 = vcmp.ge.f32.partialorder %v1119_v2, 0.0  ;;  %v1219_v42 = vsel %vm1155_vm9, %v1123_v34, %v1187_v38  ;;  %v1234_v43 = vsel %vm1170_vm10, %v1138_v35, %v1202_v39  ;;  %v2983_v4 = vld [vmem:[%s3059_s5] ss:$0 sm:$0xff] }
 0x1a7   : > { %v1235_v44 = vsel %vm1171_vm11, %v1139_v36, %v1203_v40  ;;  %v1188_v53 = vmul.f32 0.01, %v1124_v49  ;;  %v1189_v54 = vmul.f32 0.01, %v1125_v50  ;;  %v1204_v55 = vmul.f32 0.01, %v1140_v51 }
 0x1a8   : > { %1469 = vmatpush.bf16.msra.mxu0 %v2399_v7  ;;  %2525 = vmatpush.bf16.msra.mxu2 %v2399_v7  ;;  %v1198_v7 = vmul.f32 0.01, %v1134_v3  ;;  %v1215_v10 = vsel %vm1151_vm1, %v1119_v2, %v1183_v6  ;;  %v1205_v56 = vmul.f32 0.01, %v1141_v52  ;;  %vm1156_vm12 = vcmp.ge.f32.partialorder %v1124_v49, 0.0 }
 0x1a9   : > { %1606 = vmatpush.bf16.msra.mxu1 %v2375_v9  ;;  %2533 = vmatpush.bf16.msra.mxu3 %v2375_v9  ;;  %v1214_v9 = vsel %vm1150_vm0, %v1118_v1, %v1182_v5  ;;  %vm1157_vm13 = vcmp.ge.f32.partialorder %v1125_v50, 0.0  ;;  %vm1172_vm14 = vcmp.ge.f32.partialorder %v1140_v51, 0.0  ;;  %vm1173_vm15 = vcmp.ge.f32.partialorder %v1141_v52, 0.0 }
 0x1aa   : > { %v1230_v11 = vsel %vm1166_vm2, %v1134_v3, %v1198_v7  ;;  %v1220_v57 = vsel %vm1156_vm12, %v1124_v49, %v1188_v53  ;;  %v1221_v58 = vsel %vm1157_vm13, %v1125_v50, %v1189_v54  ;;  %v1236_v59 = vsel %vm1172_vm14, %v1140_v51, %v1204_v55 }
 0x1ab   : > { %1470 = vmatmul.bf16.vlgmr.msra.gmra.mxu0 %v2383_v13  ;;  %1510 = vmatmul.bf16.vlgmr.msra.gmra.mxu2 %v2391_v14  ;;  %v2387_v13 = vld [vmem:[%s2825_s18 + $0x20] sm:$0xff]  ;;  %v1237_v60 = vsel %vm1173_vm15, %v1141_v52, %v1205_v56 }
 0x1ac   : > { %1607 = vmatmul.bf16.vlgmr.msra.gmra.mxu1 %v1238_v15  ;;  %1647 = vmatmul.bf16.vlgmr.msra.gmra.mxu3 %v1246_v16  ;;  %v2395_v14 = vld [vmem:[%s2825_s18 + $0x60] sm:$0xff]  ;;  %v1242_v15 = vpack.c.bf16 %v1215_v10, %v1214_v9  ;;  %v1250_v16 = vpack.c.bf16 %v1231_v12, %v1230_v11 }
 0x1bb   : > { %1475 = vmatmul.bf16.gmra.mxu0 %v2384_v29  ;;  %1515 = vmatmul.bf16.gmra.mxu2 %v2392_v30  ;;  %v2388_v29 = vld [vmem:[%s2825_s18 + $0x28] sm:$0xff] }
 0x1bc   : > { %1612 = vmatmul.bf16.gmra.mxu1 %v1239_v31  ;;  %1652 = vmatmul.bf16.gmra.mxu3 %v1247_v32  ;;  %v2396_v30 = vld [vmem:[%s2825_s18 + $0x68] sm:$0xff]  ;;  %v1243_v31 = vpack.c.bf16 %v1217_v26, %v1216_v25  ;;  %v1251_v32 = vpack.c.bf16 %v1233_v28, %v1232_v27 }
 0x1cb   : > { %1480 = vmatmul.bf16.gmra.mxu0 %v2385_v45  ;;  %1520 = vmatmul.bf16.gmra.mxu2 %v2393_v46  ;;  %v2389_v45 = vld [vmem:[%s2825_s18 + $0x30] sm:$0xff] }
 0x1cc   : > { %1617 = vmatmul.bf16.gmra.mxu1 %v1240_v47  ;;  %1657 = vmatmul.bf16.gmra.mxu3 %v1248_v48  ;;  %v2397_v46 = vld [vmem:[%s2825_s18 + $0x70] sm:$0xff]  ;;  %v1244_v47 = vpack.c.bf16 %v1219_v42, %v1218_v41  ;;  %v1252_v48 = vpack.c.bf16 %v1235_v44, %v1234_v43 }
 0x1db   : > { %1485 = vmatmul.bf16.gmra.mxu0 %v2386_v61  ;;  %1525 = vmatmul.bf16.gmra.mxu2 %v2394_v62  ;;  %v2390_v61 = vld [vmem:[%s2825_s18 + $0x38] sm:$0xff] }
 0x1dc   : > { %1622 = vmatmul.bf16.gmra.mxu1 %v1241_v63  ;;  %1662 = vmatmul.bf16.gmra.mxu3 %v1249_v0  ;;  %v2398_v62 = vld [vmem:[%s2825_s18 + $0x78] sm:$0xff]  ;;  %v1245_v63 = vpack.c.bf16 %v1221_v58, %v1220_v57  ;;  %v1253_v0 = vpack.c.bf16 %v1237_v60, %v1236_v59 }
 0x1eb   : > { %1490 = vmatmul.bf16.gmra.mxu0 %v2387_v13  ;;  %1530 = vmatmul.bf16.gmra.mxu2 %v2395_v14 }
 0x1ec   : > { %1627 = vmatmul.bf16.gmra.mxu1 %v1242_v15  ;;  %1667 = vmatmul.bf16.gmra.mxu3 %v1250_v16 }
 0x1fb   : > { %1495 = vmatmul.bf16.gmra.mxu0 %v2388_v29  ;;  %1535 = vmatmul.bf16.gmra.mxu2 %v2396_v30 }
 0x1fc   : > { %1632 = vmatmul.bf16.gmra.mxu1 %v1243_v31  ;;  %1672 = vmatmul.bf16.gmra.mxu3 %v1251_v32 }
 0x20b   : > { %1500 = vmatmul.bf16.gmra.mxu0 %v2389_v45  ;;  %1540 = vmatmul.bf16.gmra.mxu2 %v2397_v46 }
 0x20c   : > { %1637 = vmatmul.bf16.gmra.mxu1 %v1244_v47  ;;  %1677 = vmatmul.bf16.gmra.mxu3 %v1252_v48 }
 0x21b   : > { %1505 = vmatmul.bf16.gmra.mxu0 %v2390_v61  ;;  %1545 = vmatmul.bf16.gmra.mxu2 %v2398_v62 }
 0x21c   : > { %1642 = vmatmul.bf16.gmra.mxu1 %v1245_v63  ;;  %1682 = vmatmul.bf16.gmra.mxu3 %v1253_v0 }
 0x228   : > { %v1471_v1 = vpop.f32.mrf.mxu0 }
 0x229   : > { %v1608_v2 = vpop.f32.mrf.mxu1 }
 0x22a   : > { %v1609_v3 = vadd.f32 %v1608_v2, %v1471_v1 }
 0x22c   : > { %v1692_v7 = vadd.f32 %v2983_v4, %v1609_v3 }
 0x22e   : > { %v1511_v5 = vpop.f32.mrf.mxu2  ;;  %v1756_v12 = vmul.f32 0.01, %v1692_v7  ;;  %vm1724_vm0 = vcmp.ge.f32.partialorder %v1692_v7, 0.0 }
 0x22f   : > { %v1648_v6 = vpop.f32.mrf.mxu3 }
 0x230   : > { %v1473_v8 = vpop.f32.mrf.mxu0  ;;  %v1649_v10 = vadd.f32 %v1648_v6, %v1511_v5  ;;  %v1788_v18 = vsel %vm1724_vm0, %v1692_v7, %v1756_v12 }
 0x231   : > { %v1610_v9 = vpop.f32.mrf.mxu1 }
 0x232   : > { %v1611_v11 = vadd.f32 %v1610_v9, %v1473_v8  ;;  %v1708_v14 = vadd.f32 %v2983_v4, %v1649_v10 }
 0x234   : > { %v1693_v13 = vadd.f32 %v2983_v4, %v1611_v11  ;;  %v1772_v24 = vmul.f32 0.01, %v1708_v14  ;;  %vm1740_vm2 = vcmp.ge.f32.partialorder %v1708_v14, 0.0 }
 0x236   : > { %vm1725_vm1 = vcmp.ge.f32.partialorder %v1693_v13, 0.0  ;;  %v1757_v15 = vmul.f32 0.01, %v1693_v13  ;;  %v1513_v16 = vpop.f32.mrf.mxu2  ;;  %v1804_v28 = vsel %vm1740_vm2, %v1708_v14, %v1772_v24 }
 0x237   : > { %v1650_v17 = vpop.f32.mrf.mxu3 }
 0x238   : > { %v1789_v19 = vsel %vm1725_vm1, %v1693_v13, %v1757_v15  ;;  %v1651_v20 = vadd.f32 %v1650_v17, %v1513_v16  ;;  %v1476_v21 = vpop.f32.mrf.mxu0 }
 0x239   : > { %v2410_v22 = vpack.c.bf16 %v1789_v19, %v1788_v18  ;;  %v1613_v23 = vpop.f32.mrf.mxu1 }
 0x23a   : > { %v1709_v25 = vadd.f32 %v2983_v4, %v1651_v20  ;;  %v1614_v27 = vadd.f32 %v1613_v23, %v1476_v21 }
 0x23b   : > { %2411 = vst [vmem:[%s2830_s20] sm:$0xff] %v2410_v22  }
 0x23c   : > { %vm1741_vm3 = vcmp.ge.f32.partialorder %v1709_v25, 0.0  ;;  %v1773_v26 = vmul.f32 0.01, %v1709_v25  ;;  %v1694_v33 = vadd.f32 %v2983_v4, %v1614_v27 }
 0x23e   : > { %v1805_v29 = vsel %vm1741_vm3, %v1709_v25, %v1773_v26  ;;  %v1516_v30 = vpop.f32.mrf.mxu2  ;;  %v1758_v38 = vmul.f32 0.01, %v1694_v33  ;;  %vm1726_vm4 = vcmp.ge.f32.partialorder %v1694_v33, 0.0 }
 0x23f   : > { %v2450_v31 = vpack.c.bf16 %v1805_v29, %v1804_v28  ;;  %v1653_v32 = vpop.f32.mrf.mxu3 }
 0x240   : > { %v1478_v34 = vpop.f32.mrf.mxu0  ;;  %v1654_v36 = vadd.f32 %v1653_v32, %v1516_v30  ;;  %v1790_v44 = vsel %vm1726_vm4, %v1694_v33, %v1758_v38 }
 0x241   : > { %2494 = vst [vmem:[%s2830_s20 + $0x40] sm:$0xff] %v2450_v31   ;;  %v1615_v35 = vpop.f32.mrf.mxu1 }
 0x242   : > { %v1616_v37 = vadd.f32 %v1615_v35, %v1478_v34  ;;  %v1710_v40 = vadd.f32 %v2983_v4, %v1654_v36 }
 0x244   : > { %v1695_v39 = vadd.f32 %v2983_v4, %v1616_v37  ;;  %v1774_v50 = vmul.f32 0.01, %v1710_v40  ;;  %vm1742_vm6 = vcmp.ge.f32.partialorder %v1710_v40, 0.0 }
 0x246   : > { %vm1727_vm5 = vcmp.ge.f32.partialorder %v1695_v39, 0.0  ;;  %v1759_v41 = vmul.f32 0.01, %v1695_v39  ;;  %v1518_v42 = vpop.f32.mrf.mxu2  ;;  %v1806_v54 = vsel %vm1742_vm6, %v1710_v40, %v1774_v50 }
 0x247   : > { %v1655_v43 = vpop.f32.mrf.mxu3 }
 0x248   : > { %v1791_v45 = vsel %vm1727_vm5, %v1695_v39, %v1759_v41  ;;  %v1656_v46 = vadd.f32 %v1655_v43, %v1518_v42  ;;  %v1481_v47 = vpop.f32.mrf.mxu0 }
 0x249   : > { %v2415_v48 = vpack.c.bf16 %v1791_v45, %v1790_v44  ;;  %v1618_v49 = vpop.f32.mrf.mxu1 }
 0x24a   : > { %v1711_v51 = vadd.f32 %v2983_v4, %v1656_v46  ;;  %v1619_v53 = vadd.f32 %v1618_v49, %v1481_v47 }
 0x24b   : > { %2487 = vst [vmem:[%s2830_s20 + $0x8] sm:$0xff] %v2415_v48  }
 0x24c   : > { %vm1743_vm7 = vcmp.ge.f32.partialorder %v1711_v51, 0.0  ;;  %v1775_v52 = vmul.f32 0.01, %v1711_v51  ;;  %v1696_v59 = vadd.f32 %v2983_v4, %v1619_v53 }
 0x24e   : > { %v1807_v55 = vsel %vm1743_vm7, %v1711_v51, %v1775_v52  ;;  %v1521_v56 = vpop.f32.mrf.mxu2  ;;  %v1760_v0 = vmul.f32 0.01, %v1696_v59  ;;  %vm1728_vm8 = vcmp.ge.f32.partialorder %v1696_v59, 0.0 }
 0x24f   : > { %v2455_v57 = vpack.c.bf16 %v1807_v55, %v1806_v54  ;;  %v1658_v58 = vpop.f32.mrf.mxu3 }
 0x250   : > { %v1483_v60 = vpop.f32.mrf.mxu0  ;;  %v1659_v62 = vadd.f32 %v1658_v58, %v1521_v56  ;;  %v1792_v7 = vsel %vm1728_vm8, %v1696_v59, %v1760_v0 }
 0x251   : > { %2495 = vst [vmem:[%s2830_s20 + $0x48] sm:$0xff] %v2455_v57   ;;  %v1620_v61 = vpop.f32.mrf.mxu1 }
 0x252   : > { %v1621_v63 = vadd.f32 %v1620_v61, %v1483_v60  ;;  %v1712_v2 = vadd.f32 %v2983_v4, %v1659_v62 }
 0x254   : > { %v1697_v1 = vadd.f32 %v2983_v4, %v1621_v63  ;;  %v1776_v13 = vmul.f32 0.01, %v1712_v2  ;;  %vm1744_vm10 = vcmp.ge.f32.partialorder %v1712_v2, 0.0 }
 0x256   : > { %vm1729_vm9 = vcmp.ge.f32.partialorder %v1697_v1, 0.0  ;;  %v1761_v3 = vmul.f32 0.01, %v1697_v1  ;;  %v1523_v5 = vpop.f32.mrf.mxu2  ;;  %v1808_v17 = vsel %vm1744_vm10, %v1712_v2, %v1776_v13 }
 0x257   : > { %v1660_v6 = vpop.f32.mrf.mxu3 }
 0x258   : > { %v1793_v8 = vsel %vm1729_vm9, %v1697_v1, %v1761_v3  ;;  %v1661_v9 = vadd.f32 %v1660_v6, %v1523_v5  ;;  %v1486_v10 = vpop.f32.mrf.mxu0 }
 0x259   : > { %v2420_v11 = vpack.c.bf16 %v1793_v8, %v1792_v7  ;;  %v1623_v12 = vpop.f32.mrf.mxu1 }
 0x25a   : > { %v1713_v14 = vadd.f32 %v2983_v4, %v1661_v9  ;;  %v1624_v16 = vadd.f32 %v1623_v12, %v1486_v10 }
 0x25b   : > { %2488 = vst [vmem:[%s2830_s20 + $0x10] sm:$0xff] %v2420_v11  }
 0x25c   : > { %vm1745_vm11 = vcmp.ge.f32.partialorder %v1713_v14, 0.0  ;;  %v1777_v15 = vmul.f32 0.01, %v1713_v14  ;;  %v1698_v22 = vadd.f32 %v2983_v4, %v1624_v16 }
 0x25e   : > { %v1809_v18 = vsel %vm1745_vm11, %v1713_v14, %v1777_v15  ;;  %v1526_v19 = vpop.f32.mrf.mxu2  ;;  %v1762_v27 = vmul.f32 0.01, %v1698_v22  ;;  %vm1730_vm12 = vcmp.ge.f32.partialorder %v1698_v22, 0.0 }
 0x25f   : > { %v2460_v20 = vpack.c.bf16 %v1809_v18, %v1808_v17  ;;  %v1663_v21 = vpop.f32.mrf.mxu3 }
 0x260   : > { %v1488_v23 = vpop.f32.mrf.mxu0  ;;  %v1664_v25 = vadd.f32 %v1663_v21, %v1526_v19  ;;  %v1794_v33 = vsel %vm1730_vm12, %v1698_v22, %v1762_v27 }
 0x261   : > { %2496 = vst [vmem:[%s2830_s20 + $0x50] sm:$0xff] %v2460_v20   ;;  %v1625_v24 = vpop.f32.mrf.mxu1 }
 0x262   : > { %v1626_v26 = vadd.f32 %v1625_v24, %v1488_v23  ;;  %v1714_v29 = vadd.f32 %v2983_v4, %v1664_v25 }
 0x264   : > { %v1699_v28 = vadd.f32 %v2983_v4, %v1626_v26  ;;  %v1778_v39 = vmul.f32 0.01, %v1714_v29  ;;  %vm1746_vm14 = vcmp.ge.f32.partialorder %v1714_v29, 0.0 }
 0x266   : > { %vm1731_vm13 = vcmp.ge.f32.partialorder %v1699_v28, 0.0  ;;  %v1763_v30 = vmul.f32 0.01, %v1699_v28  ;;  %v1528_v31 = vpop.f32.mrf.mxu2  ;;  %v1810_v43 = vsel %vm1746_vm14, %v1714_v29, %v1778_v39 }
 0x267   : > { %v1665_v32 = vpop.f32.mrf.mxu3 }
 0x268   : > { %v1795_v34 = vsel %vm1731_vm13, %v1699_v28, %v1763_v30  ;;  %v1666_v35 = vadd.f32 %v1665_v32, %v1528_v31  ;;  %v1491_v36 = vpop.f32.mrf.mxu0 }
 0x269   : > { %v2425_v37 = vpack.c.bf16 %v1795_v34, %v1794_v33  ;;  %v1628_v38 = vpop.f32.mrf.mxu1 }
 0x26a   : > { %v1715_v40 = vadd.f32 %v2983_v4, %v1666_v35  ;;  %v1629_v42 = vadd.f32 %v1628_v38, %v1491_v36 }
 0x26b   : > { %2489 = vst [vmem:[%s2830_s20 + $0x18] sm:$0xff] %v2425_v37  }
 0x26c   : > { %vm1747_vm15 = vcmp.ge.f32.partialorder %v1715_v40, 0.0  ;;  %v1779_v41 = vmul.f32 0.01, %v1715_v40  ;;  %v1700_v48 = vadd.f32 %v2983_v4, %v1629_v42 }
 0x26e   : > { %v1811_v44 = vsel %vm1747_vm15, %v1715_v40, %v1779_v41  ;;  %v1531_v45 = vpop.f32.mrf.mxu2  ;;  %v1764_v53 = vmul.f32 0.01, %v1700_v48  ;;  %vm1732_vm0 = vcmp.ge.f32.partialorder %v1700_v48, 0.0 }
 0x26f   : > { %v2465_v46 = vpack.c.bf16 %v1811_v44, %v1810_v43  ;;  %v1668_v47 = vpop.f32.mrf.mxu3 }
 0x270   : > { %v1493_v49 = vpop.f32.mrf.mxu0  ;;  %v1669_v51 = vadd.f32 %v1668_v47, %v1531_v45  ;;  %v1796_v59 = vsel %vm1732_vm0, %v1700_v48, %v1764_v53 }
 0x271   : > { %2497 = vst [vmem:[%s2830_s20 + $0x58] sm:$0xff] %v2465_v46   ;;  %v1630_v50 = vpop.f32.mrf.mxu1 }
 0x272   : > { %v1631_v52 = vadd.f32 %v1630_v50, %v1493_v49  ;;  %v1716_v55 = vadd.f32 %v2983_v4, %v1669_v51 }
 0x274   : > { %v1701_v54 = vadd.f32 %v2983_v4, %v1631_v52  ;;  %v1780_v1 = vmul.f32 0.01, %v1716_v55  ;;  %vm1748_vm2 = vcmp.ge.f32.partialorder %v1716_v55, 0.0 }
 0x276   : > { %vm1733_vm1 = vcmp.ge.f32.partialorder %v1701_v54, 0.0  ;;  %v1765_v56 = vmul.f32 0.01, %v1701_v54  ;;  %v1533_v57 = vpop.f32.mrf.mxu2  ;;  %v1812_v6 = vsel %vm1748_vm2, %v1716_v55, %v1780_v1 }
 0x277   : > { %v1670_v58 = vpop.f32.mrf.mxu3 }
 0x278   : > { %v1797_v60 = vsel %vm1733_vm1, %v1701_v54, %v1765_v56  ;;  %v1671_v61 = vadd.f32 %v1670_v58, %v1533_v57  ;;  %v1496_v62 = vpop.f32.mrf.mxu0 }
 0x279   : > { %v2430_v63 = vpack.c.bf16 %v1797_v60, %v1796_v59  ;;  %v1633_v0 = vpop.f32.mrf.mxu1 }
 0x27a   : > { %v1717_v2 = vadd.f32 %v2983_v4, %v1671_v61  ;;  %v1634_v5 = vadd.f32 %v1633_v0, %v1496_v62 }
 0x27b   : > { %2490 = vst [vmem:[%s2830_s20 + $0x20] sm:$0xff] %v2430_v63  }
 0x27c   : > { %vm1749_vm3 = vcmp.ge.f32.partialorder %v1717_v2, 0.0  ;;  %v1781_v3 = vmul.f32 0.01, %v1717_v2  ;;  %v1702_v11 = vadd.f32 %v2983_v4, %v1634_v5 }
 0x27e   : > { %v1813_v7 = vsel %vm1749_vm3, %v1717_v2, %v1781_v3  ;;  %v1536_v8 = vpop.f32.mrf.mxu2  ;;  %v1766_v16 = vmul.f32 0.01, %v1702_v11  ;;  %vm1734_vm4 = vcmp.ge.f32.partialorder %v1702_v11, 0.0 }
 0x27f   : > { %v2470_v9 = vpack.c.bf16 %v1813_v7, %v1812_v6  ;;  %v1673_v10 = vpop.f32.mrf.mxu3 }
 0x280   : > { %v1498_v12 = vpop.f32.mrf.mxu0  ;;  %v1674_v14 = vadd.f32 %v1673_v10, %v1536_v8  ;;  %v1798_v22 = vsel %vm1734_vm4, %v1702_v11, %v1766_v16 }
 0x281   : > { %2498 = vst [vmem:[%s2830_s20 + $0x60] sm:$0xff] %v2470_v9   ;;  %v1635_v13 = vpop.f32.mrf.mxu1 }
 0x282   : > { %v1636_v15 = vadd.f32 %v1635_v13, %v1498_v12  ;;  %v1718_v18 = vadd.f32 %v2983_v4, %v1674_v14 }
 0x284   : > { %v1703_v17 = vadd.f32 %v2983_v4, %v1636_v15  ;;  %v1782_v28 = vmul.f32 0.01, %v1718_v18  ;;  %vm1750_vm6 = vcmp.ge.f32.partialorder %v1718_v18, 0.0 }
 0x286   : > { %vm1735_vm5 = vcmp.ge.f32.partialorder %v1703_v17, 0.0  ;;  %v1767_v19 = vmul.f32 0.01, %v1703_v17  ;;  %v1538_v20 = vpop.f32.mrf.mxu2  ;;  %v1814_v32 = vsel %vm1750_vm6, %v1718_v18, %v1782_v28 }
 0x287   : > { %v1675_v21 = vpop.f32.mrf.mxu3 }
 0x288   : > { %v1799_v23 = vsel %vm1735_vm5, %v1703_v17, %v1767_v19  ;;  %v1676_v24 = vadd.f32 %v1675_v21, %v1538_v20  ;;  %v1501_v25 = vpop.f32.mrf.mxu0 }
 0x289   : > { %v2435_v26 = vpack.c.bf16 %v1799_v23, %v1798_v22  ;;  %v1638_v27 = vpop.f32.mrf.mxu1 }
 0x28a   : > { %v1719_v29 = vadd.f32 %v2983_v4, %v1676_v24  ;;  %v1639_v31 = vadd.f32 %v1638_v27, %v1501_v25 }
 0x28b   : > { %2491 = vst [vmem:[%s2830_s20 + $0x28] sm:$0xff] %v2435_v26  }
 0x28c   : > { %vm1751_vm7 = vcmp.ge.f32.partialorder %v1719_v29, 0.0  ;;  %v1783_v30 = vmul.f32 0.01, %v1719_v29  ;;  %v1704_v37 = vadd.f32 %v2983_v4, %v1639_v31 }
 0x28e   : > { %v1815_v33 = vsel %vm1751_vm7, %v1719_v29, %v1783_v30  ;;  %v1541_v34 = vpop.f32.mrf.mxu2  ;;  %v1768_v42 = vmul.f32 0.01, %v1704_v37  ;;  %vm1736_vm8 = vcmp.ge.f32.partialorder %v1704_v37, 0.0 }
 0x28f   : > { %v2475_v35 = vpack.c.bf16 %v1815_v33, %v1814_v32  ;;  %v1678_v36 = vpop.f32.mrf.mxu3 }
 0x290   : > { %v1503_v38 = vpop.f32.mrf.mxu0  ;;  %v1679_v40 = vadd.f32 %v1678_v36, %v1541_v34  ;;  %v1800_v48 = vsel %vm1736_vm8, %v1704_v37, %v1768_v42 }
 0x291   : > { %2499 = vst [vmem:[%s2830_s20 + $0x68] sm:$0xff] %v2475_v35   ;;  %v1640_v39 = vpop.f32.mrf.mxu1 }
 0x292   : > { %v1641_v41 = vadd.f32 %v1640_v39, %v1503_v38  ;;  %v1720_v44 = vadd.f32 %v2983_v4, %v1679_v40 }
 0x294   : > { %v1705_v43 = vadd.f32 %v2983_v4, %v1641_v41  ;;  %v1784_v54 = vmul.f32 0.01, %v1720_v44  ;;  %vm1752_vm10 = vcmp.ge.f32.partialorder %v1720_v44, 0.0 }
 0x296   : > { %vm1737_vm9 = vcmp.ge.f32.partialorder %v1705_v43, 0.0  ;;  %v1769_v45 = vmul.f32 0.01, %v1705_v43  ;;  %v1543_v46 = vpop.f32.mrf.mxu2  ;;  %v1816_v58 = vsel %vm1752_vm10, %v1720_v44, %v1784_v54 }
 0x297   : > { %v1680_v47 = vpop.f32.mrf.mxu3 }
 0x298   : > { %v1801_v49 = vsel %vm1737_vm9, %v1705_v43, %v1769_v45  ;;  %v1681_v50 = vadd.f32 %v1680_v47, %v1543_v46  ;;  %v1506_v51 = vpop.f32.mrf.mxu0 }
 0x299   : > { %v2440_v52 = vpack.c.bf16 %v1801_v49, %v1800_v48  ;;  %v1643_v53 = vpop.f32.mrf.mxu1 }
 0x29a   : > { %v1721_v55 = vadd.f32 %v2983_v4, %v1681_v50  ;;  %v1644_v57 = vadd.f32 %v1643_v53, %v1506_v51 }
 0x29b   : > { %2492 = vst [vmem:[%s2830_s20 + $0x30] sm:$0xff] %v2440_v52  }
 0x29c   : > { %vm1753_vm11 = vcmp.ge.f32.partialorder %v1721_v55, 0.0  ;;  %v1785_v56 = vmul.f32 0.01, %v1721_v55  ;;  %v1706_v63 = vadd.f32 %v2983_v4, %v1644_v57 }
 0x29e   : > { %v1817_v59 = vsel %vm1753_vm11, %v1721_v55, %v1785_v56  ;;  %v1546_v60 = vpop.f32.mrf.mxu2  ;;  %v1770_v5 = vmul.f32 0.01, %v1706_v63  ;;  %vm1738_vm12 = vcmp.ge.f32.partialorder %v1706_v63, 0.0 }
 0x29f   : > { %v2480_v61 = vpack.c.bf16 %v1817_v59, %v1816_v58  ;;  %v1683_v62 = vpop.f32.mrf.mxu3 }
 0x2a0   : > { %v1508_v0 = vpop.f32.mrf.mxu0  ;;  %v1684_v2 = vadd.f32 %v1683_v62, %v1546_v60  ;;  %v1802_v11 = vsel %vm1738_vm12, %v1706_v63, %v1770_v5 }
 0x2a1   : > { %2500 = vst [vmem:[%s2830_s20 + $0x70] sm:$0xff] %v2480_v61   ;;  %v1645_v1 = vpop.f32.mrf.mxu1 }
 0x2a2   : > { %v1646_v3 = vadd.f32 %v1645_v1, %v1508_v0  ;;  %v1722_v7 = vadd.f32 %v2983_v4, %v1684_v2 }
 0x2a4   : > { %v1707_v6 = vadd.f32 %v2983_v4, %v1646_v3  ;;  %v1786_v15 = vmul.f32 0.01, %v1722_v7  ;;  %vm1754_vm14 = vcmp.ge.f32.partialorder %v1722_v7, 0.0 }
 0x2a6   : > { %vm1739_vm13 = vcmp.ge.f32.partialorder %v1707_v6, 0.0  ;;  %v1771_v8 = vmul.f32 0.01, %v1707_v6  ;;  %v1548_v9 = vpop.f32.mrf.mxu2  ;;  %v1818_v18 = vsel %vm1754_vm14, %v1722_v7, %v1786_v15 }
 0x2a7   : > { %v1685_v10 = vpop.f32.mrf.mxu3 }
 0x2a8   : > { %v1803_v12 = vsel %vm1739_vm13, %v1707_v6, %v1771_v8  ;;  %v1686_v13 = vadd.f32 %v1685_v10, %v1548_v9 }
 0x2a9   : > { %v2445_v14 = vpack.c.bf16 %v1803_v12, %v1802_v11 }
 0x2aa   : > { %v1723_v16 = vadd.f32 %v2983_v4, %v1686_v13 }
 0x2ab   : > { %2493 = vst [vmem:[%s2830_s20 + $0x38] sm:$0xff] %v2445_v14  }
 0x2ac   : > { %vm1755_vm15 = vcmp.ge.f32.partialorder %v1723_v16, 0.0  ;;  %v1787_v17 = vmul.f32 0.01, %v1723_v16 }
 0x2ae   : > { %v1819_v19 = vsel %vm1755_vm15, %v1723_v16, %v1787_v17 }
 0x2af   : > { %v2485_v20 = vpack.c.bf16 %v1819_v19, %v1818_v18 }
 0x2b1   : > { %2501 = vst [vmem:[%s2830_s20 + $0x78] sm:$0xff] %v2485_v20  }
 0x2b2 PF: > { %s16_s27 = sadd.s32 1, %s2646_s27   ;;  %s3061_s21 = smov %s2626_s22 }
 0x2b3   : > { %p13_p0 = scmp.ge.s32.totalorder %s16_s27, 6   ;;  %s3062_s22 = smov %s2735_s10 }
 0x2b4   : > { %s3063_s23 = smov %s2638_s25  ;;  %s3064_s24 = smov %s2642_s26 }
 0x2b5   : > { %s3065_s25 = smov %s3068_s28  ;;  %s3066_s26 = smov %s3072_s29 }
 0x2b6   :  { %15 = sbr.rel (!%p13_p0) target bundleno = 4 (0x4), region = 131 }

// kernel: graph_conv_net_forward.11
= control target key start
LH: loop header
LB: loop body
LE: loop exit
PB: predicated region body
PF: predicated region fallthrough
CT: control target
= control target key end

     0   :  { %s2557_s21 = smov 0   ;;  %s2559_s22 = smov 0   ;;  %s2943_s0 = inlined_call_operand.vmem [shape: bf16[512,128], index: 0, kind: input, shape index: {}]   ;;  %s2944_s1 = inlined_call_operand.vmem [shape: bf16[512,512], index: 1, kind: input, shape index: {}]   ;;  %s2945_s2 = inlined_call_operand.vmem [shape: bf16[512,128], index: 2, kind: input, shape index: {}]   ;;  %s2946_s3 = inlined_call_operand.vmem [shape: bf16[128,128], index: 3, kind: input, shape index: {}]   ;;  %s2947_s4 = inlined_call_operand.vmem [shape: bf16[128,128], index: 4, kind: input, shape index: {}]   ;;  %s2948_s5 = inlined_call_operand.vmem [shape: f32[1,128], index: 5, kind: input, shape index: {}]   ;;  %s2949_s6 = inlined_call_operand.vmem [shape: f32[512,128], index: 6, kind: output, shape index: {}]  }
   0x1   :  { %s2561_s23 = smov 0   ;;  %s2563_s24 = smov 0  }
   0x2   :  { %s2565_s25 = smov 0   ;;  %s2567_s26 = smov 0  }
   0x3   :  { %s2569_s27 = smov 0  }
   0x4 LB: > { %s25_s28 = sadd.s32 1, %s2511_s25  ;;  %s28_s29 = sadd.s32 1, %s2515_s26  ;;  %s2519_s27 = sphi %s2569_s27, %s16_s27   ;;  %s2515_s26 = sphi %s2567_s26, %s2955_s26   ;;  %s2511_s25 = sphi %s2565_s25, %s2954_s25   ;;  %s2507_s24 = sphi %s2563_s24, %s2953_s24   ;;  %s2503_s23 = sphi %s2561_s23, %s2952_s23   ;;  %s2499_s22 = sphi %s2559_s22, %s2951_s22   ;;  %s2495_s21 = sphi %s2557_s21, %s2950_s21  }
   0x5   : > { %p26_p0 = scmp.ge.s32.totalorder %s25_s28, 2  ;;  %p70_p1 = scmp.ne.s32.totalorder %s2499_s22, %s2495_s21 }
   0x6   : > { %p71_p2 = scmp.eq.s32.totalorder %s2519_s27, 0  ;;  %s63_s9 = sadd.s32 1, %s2499_s22 }
   0x7   : > { %s2957_s28 = smov (%p26_p0, %s25_s28), 0  ;;  %s2959_s29 = smov (!%p26_p0, %s28_s29), %s2515_s26 }
   0x8   : > { %p72_p3 = por %p71_p2, %p70_p1  ;;  %p30_p4 = scmp.ge.s32.totalorder %s2959_s29, 2 }
   0x9   : > { %s59_s30 = ssub.s32 %s2511_s25, %s2957_s28  ;;  %p1956_p6 = scmp.ge.s32.totalorder %s2519_s27, 4 }
   0xa   : > { %s2961_s29 = smov (%p30_p4, %s2959_s29), 0 }
   0xb   : > { %s58_s7 = ssub.s32 %s2515_s26, %s2961_s29  ;;  %220 = sbr.rel (%p1956_p6) target bundleno = 55 (0x37), region = 28 }
   0xc   : > { %s60_s8 = sor.u32 %s59_s30, %s58_s7 }
   0xd   : > { %p61_p5 = scmp.eq.s32.totalorder %s60_s8, 0 }
   0xf   : > { %s2608_s10 = scalar_select %p61_p5, %s2499_s22, %s63_s9  }
  0x10   : > { %232 = sbr.rel (!%p72_p3) target bundleno = 55 (0x37), region = 36  ;;  %s234_s11 = sand.u32 (%p72_p3), 1, %s2499_s22  }
  0x11   : > { %s1959_s12 = sshll.u32 (%p72_p3), %s2511_s25, 1  ;;  %s1957_s13 = sshll.u32 (%p72_p3), %s234_s11, 8 }
  0x12   : > { %s2294_s14 = sshll.u32 (%p72_p3), %s2515_s26, 7  ;;  %s2622_s20 = scalar_lea.vmem (%p72_p3), [#allocation3], %s1957_s13 }
  0x13   : > { %s240_s15 = sadd.s32 (%p72_p3), %s2294_s14, %s1959_s12 }
  0x14   : > { %s1961_s16 = sshll.u32 (%p72_p3), %s240_s15, 2 }
  0x15   : > { %s2617_s19 = scalar_lea.vmem %s2944_s1, %s1961_s16 }
  0x16   : > { %v333_v0 = vld [vmem:[%s2617_s19] sm:$0xff]  ;;  %v335_v1 = vld [vmem:[%s2617_s19 + $0x10] sm:$0xff] }
  0x17   : > { %v337_v2 = vld [vmem:[%s2617_s19 + $0x20] sm:$0xff]  ;;  %334 = vst [vmem:[%s2622_s20] sm:$0xff] %v333_v0  ;;  %v339_v3 = vld [vmem:[%s2617_s19 + $0x30] sm:$0xff] }
  0x18   : > { %336 = vst [vmem:[%s2622_s20 + $0x8] sm:$0xff] %v335_v1  ;;  %v341_v4 = vld [vmem:[%s2617_s19 + $0x40] sm:$0xff]  ;;  %v343_v5 = vld [vmem:[%s2617_s19 + $0x50] sm:$0xff] }
  0x19   : > { %338 = vst [vmem:[%s2622_s20 + $0x10] sm:$0xff] %v337_v2  ;;  %v345_v6 = vld [vmem:[%s2617_s19 + $0x60] sm:$0xff]  ;;  %v347_v7 = vld [vmem:[%s2617_s19 + $0x70] sm:$0xff] }
  0x1a   : > { %340 = vst [vmem:[%s2622_s20 + $0x18] sm:$0xff] %v339_v3  ;;  %v349_v8 = vld [vmem:[%s2617_s19 + $0x80] sm:$0xff]  ;;  %v351_v9 = vld [vmem:[%s2617_s19 + $0x90] sm:$0xff] }
  0x1b   : > { %342 = vst [vmem:[%s2622_s20 + $0x20] sm:$0xff] %v341_v4  ;;  %v353_v10 = vld [vmem:[%s2617_s19 + $0xa0] sm:$0xff]  ;;  %v355_v11 = vld [vmem:[%s2617_s19 + $0xb0] sm:$0xff] }
  0x1c   : > { %344 = vst [vmem:[%s2622_s20 + $0x28] sm:$0xff] %v343_v5  ;;  %v357_v12 = vld [vmem:[%s2617_s19 + $0xc0] sm:$0xff]  ;;  %v359_v13 = vld [vmem:[%s2617_s19 + $0xd0] sm:$0xff] }
  0x1d   : > { %346 = vst [vmem:[%s2622_s20 + $0x30] sm:$0xff] %v345_v6  ;;  %v361_v14 = vld [vmem:[%s2617_s19 + $0xe0] sm:$0xff]  ;;  %v363_v15 = vld [vmem:[%s2617_s19 + $0xf0] sm:$0xff] }
  0x1e   : > { %348 = vst [vmem:[%s2622_s20 + $0x38] sm:$0xff] %v347_v7  ;;  %v365_v16 = vld [vmem:[%s2617_s19 + $0x100] sm:$0xff]  ;;  %v367_v17 = vld [vmem:[%s2617_s19 + $0x110] sm:$0xff] }
  0x1f   : > { %350 = vst [vmem:[%s2622_s20 + $0x40] sm:$0xff] %v349_v8  ;;  %v369_v18 = vld [vmem:[%s2617_s19 + $0x120] sm:$0xff]  ;;  %v371_v19 = vld [vmem:[%s2617_s19 + $0x130] sm:$0xff] }
  0x20   : > { %352 = vst [vmem:[%s2622_s20 + $0x48] sm:$0xff] %v351_v9  ;;  %v373_v20 = vld [vmem:[%s2617_s19 + $0x140] sm:$0xff]  ;;  %v375_v21 = vld [vmem:[%s2617_s19 + $0x150] sm:$0xff] }
  0x21   : > { %354 = vst [vmem:[%s2622_s20 + $0x50] sm:$0xff] %v353_v10  ;;  %v377_v22 = vld [vmem:[%s2617_s19 + $0x160] sm:$0xff]  ;;  %v379_v23 = vld [vmem:[%s2617_s19 + $0x170] sm:$0xff] }
  0x22   : > { %356 = vst [vmem:[%s2622_s20 + $0x58] sm:$0xff] %v355_v11  ;;  %v381_v24 = vld [vmem:[%s2617_s19 + $0x180] sm:$0xff]  ;;  %v383_v25 = vld [vmem:[%s2617_s19 + $0x190] sm:$0xff] }
  0x23   : > { %358 = vst [vmem:[%s2622_s20 + $0x60] sm:$0xff] %v357_v12  ;;  %v385_v26 = vld [vmem:[%s2617_s19 + $0x1a0] sm:$0xff]  ;;  %v387_v27 = vld [vmem:[%s2617_s19 + $0x1b0] sm:$0xff] }
  0x24   : > { %360 = vst [vmem:[%s2622_s20 + $0x68] sm:$0xff] %v359_v13  ;;  %v389_v28 = vld [vmem:[%s2617_s19 + $0x1c0] sm:$0xff]  ;;  %v391_v29 = vld [vmem:[%s2617_s19 + $0x1d0] sm:$0xff] }
  0x25   : > { %362 = vst [vmem:[%s2622_s20 + $0x70] sm:$0xff] %v361_v14  ;;  %v393_v30 = vld [vmem:[%s2617_s19 + $0x1e0] sm:$0xff]  ;;  %v395_v31 = vld [vmem:[%s2617_s19 + $0x1f0] sm:$0xff] }
  0x26   : > { %364 = vst [vmem:[%s2622_s20 + $0x78] sm:$0xff] %v363_v15 }
  0x27   : > { %366 = vst [vmem:[%s2622_s20 + $0x80] sm:$0xff] %v365_v16 }
  0x28   : > { %368 = vst [vmem:[%s2622_s20 + $0x88] sm:$0xff] %v367_v17 }
  0x29   : > { %370 = vst [vmem:[%s2622_s20 + $0x90] sm:$0xff] %v369_v18 }
  0x2a   : > { %372 = vst [vmem:[%s2622_s20 + $0x98] sm:$0xff] %v371_v19 }
  0x2b   : > { %374 = vst [vmem:[%s2622_s20 + $0xa0] sm:$0xff] %v373_v20 }
  0x2c   : > { %376 = vst [vmem:[%s2622_s20 + $0xa8] sm:$0xff] %v375_v21 }
  0x2d   : > { %378 = vst [vmem:[%s2622_s20 + $0xb0] sm:$0xff] %v377_v22 }
  0x2e   : > { %380 = vst [vmem:[%s2622_s20 + $0xb8] sm:$0xff] %v379_v23 }
  0x2f   : > { %382 = vst [vmem:[%s2622_s20 + $0xc0] sm:$0xff] %v381_v24 }
  0x30   : > { %384 = vst [vmem:[%s2622_s20 + $0xc8] sm:$0xff] %v383_v25 }
  0x31   : > { %386 = vst [vmem:[%s2622_s20 + $0xd0] sm:$0xff] %v385_v26 }
  0x32   : > { %388 = vst [vmem:[%s2622_s20 + $0xd8] sm:$0xff] %v387_v27 }
  0x33   : > { %390 = vst [vmem:[%s2622_s20 + $0xe0] sm:$0xff] %v389_v28 }
  0x34   : > { %392 = vst [vmem:[%s2622_s20 + $0xe8] sm:$0xff] %v391_v29 }
  0x35   : > { %394 = vst [vmem:[%s2622_s20 + $0xf0] sm:$0xff] %v393_v30 }
  0x36   : > { %396 = vst [vmem:[%s2622_s20 + $0xf8] sm:$0xff] %v395_v31 }
  0x37 PF: > { %p1962_p7 = scmp.ge.s32.totalorder %s2519_s27, 1  ;;  %p410_p8 = scmp.lt.s32.totalorder %s2519_s27, 5 }
  0x39   : > { %p411_p9 = pnand %p1962_p7, %p410_p8 }
  0x3a   : > { %s417_s30 = sand.u32 (!%p411_p9), 1, %s2495_s21   ;;  %s1964_s7 = sshll.u32 (!%p411_p9), %s2503_s23, 5 }
  0x3b   : > { %414 = sbr.rel (%p411_p9) target bundleno = 689 (0x2b1), region = 78  ;;  %s1963_s8 = sshll.u32 (!%p411_p9), %s417_s30, 8 }
  0x3c   : > { %p457_p10 = scmp.lt.s32.totalorder (!%p411_p9), %s1964_s7, 63  ;;  %s1966_s9 = sshll.u32 (!%p411_p9), %s2507_s24, 5 }
  0x3d   : > { %p465_p11 = scmp.lt.s32.totalorder (!%p411_p9), %s1966_s9, 63  ;;  %s2705_s30 = scalar_lea.vmem (!%p411_p9), [#allocation3], %s1963_s8 }
  0x3e   : > { %p1970_p12 = scmp.ne.s32.totalorder (!%p411_p9), %s2503_s23, 0 }
  0x40   : > { %s2963_s7 = smov (!%p457_p10, %s1964_s7), 63  ;;  %s2965_s9 = smov (!%p465_p11, %s1966_s9), 63 }
  0x41   : > { %s1965_s11 = sshll.u32 %s2963_s7, 2  ;;  %s1967_s15 = sshll.u32 %s2965_s9, 2 }
  0x42   : > { %s2693_s14 = scalar_lea.vmem %s2943_s0, %s1965_s11  ;;  %s1969_s16 = sshll.u32 %s2965_s9, 3 }
  0x43   : > { %s2698_s19 = scalar_lea.vmem %s2945_s2, %s1967_s15  ;;  %s2703_s24 = scalar_lea.vmem %s2949_s6, %s1969_s16 }
  0x44   : > { %479 = sbr.rel (%p1970_p12) target bundleno = 106 (0x6a), region = 86 }
  0x49   : > { %v2521_v32 = vmov 0.0  }
  0x4a   : > { %480 = vst [vmem:[#allocation2 + $0xb0] sm:$0xff] %v2521_v32 }
  0x4b   : > { %481 = vst [vmem:[#allocation2] sm:$0xff] %v2521_v32 }
  0x4c   : > { %482 = vst [vmem:[#allocation2 + $0xd8] sm:$0xff] %v2521_v32 }
  0x4d   : > { %483 = vst [vmem:[#allocation2 + $0x18] sm:$0xff] %v2521_v32 }
  0x4e   : > { %484 = vst [vmem:[#allocation2 + $0x50] sm:$0xff] %v2521_v32 }
  0x4f   : > { %485 = vst [vmem:[#allocation2 + $0x68] sm:$0xff] %v2521_v32 }
  0x50   : > { %486 = vst [vmem:[#allocation2 + $0x30] sm:$0xff] %v2521_v32 }
  0x51   : > { %487 = vst [vmem:[#allocation2 + $0x48] sm:$0xff] %v2521_v32 }
  0x52   : > { %488 = vst [vmem:[#allocation2 + $0x80] sm:$0xff] %v2521_v32 }
  0x53   : > { %489 = vst [vmem:[#allocation2 + $0x88] sm:$0xff] %v2521_v32 }
  0x54   : > { %490 = vst [vmem:[#allocation2 + $0xe8] sm:$0xff] %v2521_v32 }
  0x55   : > { %491 = vst [vmem:[#allocation2 + $0xb8] sm:$0xff] %v2521_v32 }
  0x56   : > { %492 = vst [vmem:[#allocation2 + $0x60] sm:$0xff] %v2521_v32 }
  0x57   : > { %493 = vst [vmem:[#allocation2 + $0xf0] sm:$0xff] %v2521_v32 }
  0x58   : > { %494 = vst [vmem:[#allocation2 + $0x8] sm:$0xff] %v2521_v32 }
  0x59   : > { %495 = vst [vmem:[#allocation2 + $0x78] sm:$0xff] %v2521_v32 }
  0x5a   : > { %496 = vst [vmem:[#allocation2 + $0x38] sm:$0xff] %v2521_v32 }
  0x5b   : > { %497 = vst [vmem:[#allocation2 + $0x58] sm:$0xff] %v2521_v32 }
  0x5c   : > { %498 = vst [vmem:[#allocation2 + $0x40] sm:$0xff] %v2521_v32 }
  0x5d   : > { %499 = vst [vmem:[#allocation2 + $0xc8] sm:$0xff] %v2521_v32 }
  0x5e   : > { %500 = vst [vmem:[#allocation2 + $0xe0] sm:$0xff] %v2521_v32 }
  0x5f   : > { %501 = vst [vmem:[#allocation2 + $0x90] sm:$0xff] %v2521_v32 }
  0x60   : > { %502 = vst [vmem:[#allocation2 + $0x70] sm:$0xff] %v2521_v32 }
  0x61   : > { %503 = vst [vmem:[#allocation2 + $0xc0] sm:$0xff] %v2521_v32 }
  0x62   : > { %504 = vst [vmem:[#allocation2 + $0xa8] sm:$0xff] %v2521_v32 }
  0x63   : > { %505 = vst [vmem:[#allocation2 + $0xd0] sm:$0xff] %v2521_v32 }
  0x64   : > { %506 = vst [vmem:[#allocation2 + $0x10] sm:$0xff] %v2521_v32 }
  0x65   : > { %507 = vst [vmem:[#allocation2 + $0x28] sm:$0xff] %v2521_v32 }
  0x66   : > { %508 = vst [vmem:[#allocation2 + $0xa0] sm:$0xff] %v2521_v32 }
  0x67   : > { %509 = vst [vmem:[#allocation2 + $0xf8] sm:$0xff] %v2521_v32 }
  0x68   : > { %510 = vst [vmem:[#allocation2 + $0x20] sm:$0xff] %v2521_v32 }
  0x69   : > { %511 = vst [vmem:[#allocation2 + $0x98] sm:$0xff] %v2521_v32 }
  0x6a PF: > { %v2334_v33 = vld [vmem:[%s2693_s14 + $0x38] sm:$0xff]  ;;  %v2333_v35 = vld [vmem:[%s2693_s14 + $0x30] sm:$0xff]  ;;  %v2332_v37 = vld [vmem:[%s2693_s14 + $0x28] sm:$0xff]  ;;  %p2163_p13 = scmp.ne.s32.totalorder %s2503_s23, 1 }
  0x6b   : > { %v2342_v34 = vld [vmem:[%s2693_s14 + $0x78] sm:$0xff]  ;;  %864 = vmatpush.bf16.msra.mxu0 %v2334_v33  ;;  %2375 = vmatpush.bf16.msra.mxu2 %v2334_v33  ;;  %v2341_v36 = vld [vmem:[%s2693_s14 + $0x70] sm:$0xff]  ;;  %v2340_v38 = vld [vmem:[%s2693_s14 + $0x68] sm:$0xff] }
  0x6c   : > { %953 = vmatpush.bf16.msra.mxu1 %v2342_v34  ;;  %2383 = vmatpush.bf16.msra.mxu3 %v2342_v34  ;;  %v2331_v39 = vld [vmem:[%s2693_s14 + $0x20] sm:$0xff]  ;;  %v2330_v41 = vld [vmem:[%s2693_s14 + $0x18] sm:$0xff]  ;;  %v2329_v43 = vld [vmem:[%s2693_s14 + $0x10] sm:$0xff] }
  0x6d   : > { %v2339_v40 = vld [vmem:[%s2693_s14 + $0x60] sm:$0xff]  ;;  %v2338_v42 = vld [vmem:[%s2693_s14 + $0x58] sm:$0xff]  ;;  %v2337_v44 = vld [vmem:[%s2693_s14 + $0x50] sm:$0xff] }
  0x6e   : > { %v2328_v45 = vld [vmem:[%s2693_s14 + $0x8] sm:$0xff]  ;;  %v2327_v47 = vld [vmem:[%s2693_s14] sm:$0xff]  ;;  %v1981_v61 = vld [vmem:[%s2705_s30 + $0x10] sm:$0xf] }
  0x6f   : > { %865 = vmatpush.bf16.msra.mxu0 %v2333_v35  ;;  %2376 = vmatpush.bf16.msra.mxu2 %v2333_v35  ;;  %v2336_v46 = vld [vmem:[%s2693_s14 + $0x48] sm:$0xff]  ;;  %v2335_v48 = vld [vmem:[%s2693_s14 + $0x40] sm:$0xff]  ;;  %v2298_v62 = vld [vmem:[%s2705_s30 + $0x14] sm:$0xf0] }
  0x70   : > { %954 = vmatpush.bf16.msra.mxu1 %v2341_v36  ;;  %2384 = vmatpush.bf16.msra.mxu3 %v2341_v36  ;;  %v1973_v49 = vld [vmem:[%s2705_s30] sm:$0xf]  ;;  %v2296_v50 = vld [vmem:[%s2705_s30 + $0x4] sm:$0xf0]  ;;  %v2295_v53 = vld [vmem:[%s2705_s30 + $0x4] sm:$0xf]  ;;  %v1982_v5 = vor.u32 %v2298_v62, %v1981_v61 }
  0x71   : > { %v2037_v51 = vld [vmem:[%s2705_s30 + $0x80] sm:$0xf]  ;;  %v2312_v52 = vld [vmem:[%s2705_s30 + $0x84] sm:$0xf0]  ;;  %v1975_v54 = vld [vmem:[%s2705_s30 + $0x8] sm:$0xf0]  ;;  %v1974_v57 = vor.u32 %v2296_v50, %v1973_v49 }
  0x72   : > { %v2311_v55 = vld [vmem:[%s2705_s30 + $0x84] sm:$0xf]  ;;  %v2039_v56 = vld [vmem:[%s2705_s30 + $0x88] sm:$0xf0]  ;;  %v2038_v58 = vor.u32 %v2312_v52, %v2037_v51  ;;  %v1978_v59 = vor.u32 %v2295_v53, %v1975_v54  ;;  %v2045_v63 = vld [vmem:[%s2705_s30 + $0x90] sm:$0xf] }
  0x73   : > { %866 = vmatpush.bf16.msra.mxu0 %v2332_v37  ;;  %2377 = vmatpush.bf16.msra.mxu2 %v2332_v37  ;;  %v2042_v60 = vor.u32 %v2311_v55, %v2039_v56  ;;  %v2314_v0 = vld [vmem:[%s2705_s30 + $0x94] sm:$0xf0]  ;;  %v2297_v1 = vld [vmem:[%s2705_s30 + $0x14] sm:$0xf]  ;;  %v1983_v2 = vld [vmem:[%s2705_s30 + $0x18] sm:$0xf0] }
  0x74   : > { %955 = vmatpush.bf16.msra.mxu1 %v2340_v38  ;;  %2385 = vmatpush.bf16.msra.mxu3 %v2340_v38  ;;  %v2313_v3 = vld [vmem:[%s2705_s30 + $0x94] sm:$0xf]  ;;  %v2047_v4 = vld [vmem:[%s2705_s30 + $0x98] sm:$0xf0]  ;;  %v2046_v6 = vor.u32 %v2314_v0, %v2045_v63  ;;  %v1986_v7 = vor.u32 %v2297_v1, %v1983_v2  ;;  %v1989_v9 = vld [vmem:[%s2705_s30 + $0x20] sm:$0xf] }
  0x75   : > { %v2050_v8 = vor.u32 %v2313_v3, %v2047_v4  ;;  %v2300_v10 = vld [vmem:[%s2705_s30 + $0x24] sm:$0xf0]  ;;  %v2053_v11 = vld [vmem:[%s2705_s30 + $0xa0] sm:$0xf]  ;;  %v2299_v13 = vld [vmem:[%s2705_s30 + $0x24] sm:$0xf] }
  0x76   : > { %v2316_v12 = vld [vmem:[%s2705_s30 + $0xa4] sm:$0xf0]  ;;  %v1991_v14 = vld [vmem:[%s2705_s30 + $0x28] sm:$0xf0]  ;;  %v2315_v15 = vld [vmem:[%s2705_s30 + $0xa4] sm:$0xf]  ;;  %v1990_v17 = vor.u32 %v2300_v10, %v1989_v9 }
  0x77   : > { %867 = vmatpush.bf16.msra.mxu0 %v2331_v39  ;;  %2378 = vmatpush.bf16.msra.mxu2 %v2331_v39  ;;  %v2055_v16 = vld [vmem:[%s2705_s30 + $0xa8] sm:$0xf0]  ;;  %v2054_v18 = vor.u32 %v2316_v12, %v2053_v11  ;;  %v1994_v19 = vor.u32 %v2299_v13, %v1991_v14  ;;  %v1997_v21 = vld [vmem:[%s2705_s30 + $0x30] sm:$0xf]  ;;  %v2302_v22 = vld [vmem:[%s2705_s30 + $0x34] sm:$0xf0] }
  0x78   : > { %956 = vmatpush.bf16.msra.mxu1 %v2339_v40  ;;  %2386 = vmatpush.bf16.msra.mxu3 %v2339_v40  ;;  %v2058_v20 = vor.u32 %v2315_v15, %v2055_v16  ;;  %v2061_v23 = vld [vmem:[%s2705_s30 + $0xb0] sm:$0xf]  ;;  %v2318_v24 = vld [vmem:[%s2705_s30 + $0xb4] sm:$0xf0]  ;;  %v2301_v25 = vld [vmem:[%s2705_s30 + $0x34] sm:$0xf]  ;;  %v1998_v29 = vor.u32 %v2302_v22, %v1997_v21 }
  0x79   : > { %v1999_v26 = vld [vmem:[%s2705_s30 + $0x38] sm:$0xf0]  ;;  %v2317_v27 = vld [vmem:[%s2705_s30 + $0xb4] sm:$0xf]  ;;  %v2062_v30 = vor.u32 %v2318_v24, %v2061_v23  ;;  %v2005_v33 = vld [vmem:[%s2705_s30 + $0x40] sm:$0xf] }
  0x7a   : > { %v2063_v28 = vld [vmem:[%s2705_s30 + $0xb8] sm:$0xf0]  ;;  %v2002_v31 = vor.u32 %v2301_v25, %v1999_v26  ;;  %v2304_v34 = vld [vmem:[%s2705_s30 + $0x44] sm:$0xf0]  ;;  %v2069_v35 = vld [vmem:[%s2705_s30 + $0xc0] sm:$0xf] }
  0x7b   : > { %868 = vmatpush.bf16.msra.mxu0 %v2330_v41  ;;  %2379 = vmatpush.bf16.msra.mxu2 %v2330_v41  ;;  %v2066_v32 = vor.u32 %v2317_v27, %v2063_v28  ;;  %v2320_v36 = vld [vmem:[%s2705_s30 + $0xc4] sm:$0xf0]  ;;  %v2303_v37 = vld [vmem:[%s2705_s30 + $0x44] sm:$0xf]  ;;  %v2007_v38 = vld [vmem:[%s2705_s30 + $0x48] sm:$0xf0]  ;;  %v2006_v41 = vor.u32 %v2304_v34, %v2005_v33 }
  0x7c   : > { %957 = vmatpush.bf16.msra.mxu1 %v2338_v42  ;;  %2387 = vmatpush.bf16.msra.mxu3 %v2338_v42  ;;  %v2319_v39 = vld [vmem:[%s2705_s30 + $0xc4] sm:$0xf]  ;;  %v2071_v40 = vld [vmem:[%s2705_s30 + $0xc8] sm:$0xf0]  ;;  %v2070_v42 = vor.u32 %v2320_v36, %v2069_v35  ;;  %v2305_v49 = vld [vmem:[%s2705_s30 + $0x54] sm:$0xf] }
  0x7d   : > { %v2015_v50 = vld [vmem:[%s2705_s30 + $0x58] sm:$0xf0]  ;;  %v2321_v51 = vld [vmem:[%s2705_s30 + $0xd4] sm:$0xf]  ;;  %v2307_v61 = vld [vmem:[%s2705_s30 + $0x64] sm:$0xf] }
  0x7e   : > { %v2079_v52 = vld [vmem:[%s2705_s30 + $0xd8] sm:$0xf0]  ;;  %v2018_v55 = vor.u32 %v2305_v49, %v2015_v50  ;;  %v2023_v62 = vld [vmem:[%s2705_s30 + $0x68] sm:$0xf0]  ;;  %v2323_v63 = vld [vmem:[%s2705_s30 + $0xe4] sm:$0xf] }
  0x7f   : > { %869 = vmatpush.bf16.msra.mxu0 %v2329_v43  ;;  %2380 = vmatpush.bf16.msra.mxu2 %v2329_v43  ;;  %v2010_v43 = vor.u32 %v2303_v37, %v2007_v38  ;;  %v2082_v56 = vor.u32 %v2321_v51, %v2079_v52  ;;  %v2087_v0 = vld [vmem:[%s2705_s30 + $0xe8] sm:$0xf0]  ;;  %v2026_v3 = vor.u32 %v2307_v61, %v2023_v62  ;;  %v2309_v9 = vld [vmem:[%s2705_s30 + $0x74] sm:$0xf]  ;;  %v2031_v10 = vld [vmem:[%s2705_s30 + $0x78] sm:$0xf0] }
  0x80   : > { %958 = vmatpush.bf16.msra.mxu1 %v2337_v44  ;;  %2388 = vmatpush.bf16.msra.mxu3 %v2337_v44  ;;  %v2074_v44 = vor.u32 %v2319_v39, %v2071_v40  ;;  %v2090_v4 = vor.u32 %v2323_v63, %v2087_v0  ;;  %v2325_v11 = vld [vmem:[%s2705_s30 + $0xf4] sm:$0xf]  ;;  %v2095_v12 = vld [vmem:[%s2705_s30 + $0xf8] sm:$0xf0]  ;;  %v2034_v15 = vor.u32 %v2309_v9, %v2031_v10  ;;  %v513_v27 = vld [vmem:[#allocation2] sm:$0xff] }
  0x81   : > { %v2098_v16 = vor.u32 %v2325_v11, %v2095_v12  ;;  %v528_v23 = vld [vmem:[#allocation2 + $0x38] sm:$0xff]  ;;  %v532_v63 = vld [vmem:[#allocation2 + $0xe0] sm:$0xff]  ;;  %v533_v9 = vld [vmem:[#allocation2 + $0x90] sm:$0xff] }
  0x82   : > { %v529_v33 = vld [vmem:[#allocation2 + $0x58] sm:$0xff] }
  0x83   : > { %870 = vmatpush.bf16.msra.mxu0 %v2328_v45  ;;  %2381 = vmatpush.bf16.msra.mxu2 %v2328_v45  ;;  %v2013_v45 = vld [vmem:[%s2705_s30 + $0x50] sm:$0xf]  ;;  %v514_v37 = vld [vmem:[#allocation2 + $0xd8] sm:$0xff] }
  0x84   : > { %959 = vmatpush.bf16.msra.mxu1 %v2336_v46  ;;  %2389 = vmatpush.bf16.msra.mxu3 %v2336_v46  ;;  %v2306_v46 = vld [vmem:[%s2705_s30 + $0x54] sm:$0xf0] }
  0x85   : > { %v2014_v53 = vor.u32 %v2306_v46, %v2013_v45 }
  0x87   : > { %871 = vmatpush.bf16.msra.mxu0 %v2327_v47  ;;  %2382 = vmatpush.bf16.msra.mxu2 %v2327_v47  ;;  %v2077_v47 = vld [vmem:[%s2705_s30 + $0xd0] sm:$0xf] }
  0x88   : > { %960 = vmatpush.bf16.msra.mxu1 %v2335_v48  ;;  %2390 = vmatpush.bf16.msra.mxu3 %v2335_v48  ;;  %v2322_v48 = vld [vmem:[%s2705_s30 + $0xd4] sm:$0xf0] }
  0x89   : > { %v2078_v54 = vor.u32 %v2322_v48, %v2077_v47  ;;  %v515_v47 = vld [vmem:[#allocation2 + $0x18] sm:$0xff] }
  0x8a   : > { %872 = vmatmul.bf16.vlgmr.msra.gmra.mxu0 %v1974_v57  ;;  %912 = vmatmul.bf16.vlgmr.msra.gmra.mxu2 %v2038_v58  ;;  %v2021_v57 = vld [vmem:[%s2705_s30 + $0x60] sm:$0xf]  ;;  %v2308_v58 = vld [vmem:[%s2705_s30 + $0x64] sm:$0xf0] }
  0x8b   : > { %961 = vmatmul.bf16.vlgmr.msra.gmra.mxu1 %v1978_v59  ;;  %1001 = vmatmul.bf16.vlgmr.msra.gmra.mxu3 %v2042_v60  ;;  %v2085_v59 = vld [vmem:[%s2705_s30 + $0xe0] sm:$0xf]  ;;  %v2324_v60 = vld [vmem:[%s2705_s30 + $0xe4] sm:$0xf0]  ;;  %v2022_v1 = vor.u32 %v2308_v58, %v2021_v57  ;;  %v516_v57 = vld [vmem:[#allocation2 + $0x50] sm:$0xff] }
  0x8c   : > { %v2086_v2 = vor.u32 %v2324_v60, %v2085_v59 }
  0x9a   : > { %877 = vmatmul.bf16.gmra.mxu0 %v1982_v5  ;;  %917 = vmatmul.bf16.gmra.mxu2 %v2046_v6  ;;  %v2029_v5 = vld [vmem:[%s2705_s30 + $0x70] sm:$0xf]  ;;  %v2310_v6 = vld [vmem:[%s2705_s30 + $0x74] sm:$0xf0] }
  0x9b   : > { %966 = vmatmul.bf16.gmra.mxu1 %v1986_v7  ;;  %1006 = vmatmul.bf16.gmra.mxu3 %v2050_v8  ;;  %v2093_v7 = vld [vmem:[%s2705_s30 + $0xf0] sm:$0xf]  ;;  %v2326_v8 = vld [vmem:[%s2705_s30 + $0xf4] sm:$0xf0]  ;;  %v2030_v13 = vor.u32 %v2310_v6, %v2029_v5 }
  0x9c   : > { %v2094_v14 = vor.u32 %v2326_v8, %v2093_v7 }
  0xaa   : > { %882 = vmatmul.bf16.gmra.mxu0 %v1990_v17  ;;  %922 = vmatmul.bf16.gmra.mxu2 %v2054_v18  ;;  %v512_v18 = vld [vmem:[#allocation2 + $0xb0] sm:$0xff] }
  0xab   : > { %971 = vmatmul.bf16.gmra.mxu1 %v1994_v19  ;;  %1011 = vmatmul.bf16.gmra.mxu3 %v2058_v20 }
  0xba   : > { %887 = vmatmul.bf16.gmra.mxu0 %v1998_v29  ;;  %927 = vmatmul.bf16.gmra.mxu2 %v2062_v30 }
  0xbb   : > { %976 = vmatmul.bf16.gmra.mxu1 %v2002_v31  ;;  %1016 = vmatmul.bf16.gmra.mxu3 %v2066_v32 }
  0xca   : > { %892 = vmatmul.bf16.gmra.mxu0 %v2006_v41  ;;  %932 = vmatmul.bf16.gmra.mxu2 %v2070_v42 }
  0xcb   : > { %981 = vmatmul.bf16.gmra.mxu1 %v2010_v43  ;;  %1021 = vmatmul.bf16.gmra.mxu3 %v2074_v44  ;;  %v530_v43 = vld [vmem:[#allocation2 + $0x40] sm:$0xff] }
  0xda   : > { %897 = vmatmul.bf16.gmra.mxu0 %v2014_v53  ;;  %937 = vmatmul.bf16.gmra.mxu2 %v2078_v54  ;;  %v531_v53 = vld [vmem:[#allocation2 + $0xc8] sm:$0xff] }
  0xdb   : > { %986 = vmatmul.bf16.gmra.mxu1 %v2018_v55  ;;  %1026 = vmatmul.bf16.gmra.mxu3 %v2082_v56 }
  0xea   : > { %902 = vmatmul.bf16.gmra.mxu0 %v2022_v1  ;;  %942 = vmatmul.bf16.gmra.mxu2 %v2086_v2 }
  0xeb   : > { %991 = vmatmul.bf16.gmra.mxu1 %v2026_v3  ;;  %1031 = vmatmul.bf16.gmra.mxu3 %v2090_v4  ;;  %v517_v3 = vld [vmem:[#allocation2 + $0x68] sm:$0xff] }
  0xfa   : > { %907 = vmatmul.bf16.gmra.mxu0 %v2030_v13  ;;  %947 = vmatmul.bf16.gmra.mxu2 %v2094_v14  ;;  %v518_v13 = vld [vmem:[#allocation2 + $0x30] sm:$0xff] }
  0xfb   : > { %996 = vmatmul.bf16.gmra.mxu1 %v2034_v15  ;;  %1036 = vmatmul.bf16.gmra.mxu3 %v2098_v16 }
 0x107   : > { %v873_v17 = vpop.f32.mrf.mxu0 }
 0x108   : > { %v962_v19 = vpop.f32.mrf.mxu1 }
 0x109   : > { %v963_v20 = vadd.f32 %v962_v19, %v873_v17  ;;  %v534_v19 = vld [vmem:[#allocation2 + $0x70] sm:$0xff] }
 0x10b   : > { %v1042_v21 = vadd.f32 %v963_v20, %v512_v18 }
 0x10d   : > { %1074 = vst [vmem:[#allocation2 + $0xb0] sm:$0xff] %v1042_v21  ;;  %v913_v22 = vpop.f32.mrf.mxu2 }
 0x10e   : > { %v1002_v24 = vpop.f32.mrf.mxu3 }
 0x10f   : > { %v1003_v25 = vadd.f32 %v1002_v24, %v913_v22  ;;  %v875_v26 = vpop.f32.mrf.mxu0 }
 0x110   : > { %v964_v28 = vpop.f32.mrf.mxu1 }
 0x111   : > { %v1058_v29 = vadd.f32 %v1003_v25, %v528_v23  ;;  %v965_v30 = vadd.f32 %v964_v28, %v875_v26  ;;  %v519_v23 = vld [vmem:[#allocation2 + $0x48] sm:$0xff] }
 0x113   : > { %1090 = vst [vmem:[#allocation2 + $0x38] sm:$0xff] %v1058_v29  ;;  %v1043_v31 = vadd.f32 %v965_v30, %v513_v27  ;;  %v535_v29 = vld [vmem:[#allocation2 + $0xc0] sm:$0xff] }
 0x115   : > { %1075 = vst [vmem:[#allocation2] sm:$0xff] %v1043_v31  ;;  %v915_v32 = vpop.f32.mrf.mxu2 }
 0x116   : > { %v1004_v34 = vpop.f32.mrf.mxu3 }
 0x117   : > { %v1005_v35 = vadd.f32 %v1004_v34, %v915_v32  ;;  %v878_v36 = vpop.f32.mrf.mxu0 }
 0x118   : > { %v967_v38 = vpop.f32.mrf.mxu1 }
 0x119   : > { %v1059_v39 = vadd.f32 %v1005_v35, %v529_v33  ;;  %v968_v40 = vadd.f32 %v967_v38, %v878_v36  ;;  %v520_v33 = vld [vmem:[#allocation2 + $0x80] sm:$0xff] }
 0x11b   : > { %1091 = vst [vmem:[#allocation2 + $0x58] sm:$0xff] %v1059_v39  ;;  %v1044_v41 = vadd.f32 %v968_v40, %v514_v37  ;;  %v536_v39 = vld [vmem:[#allocation2 + $0xa8] sm:$0xff] }
 0x11d   : > { %1076 = vst [vmem:[#allocation2 + $0xd8] sm:$0xff] %v1044_v41  ;;  %v918_v42 = vpop.f32.mrf.mxu2 }
 0x11e   : > { %v1007_v44 = vpop.f32.mrf.mxu3 }
 0x11f   : > { %v1008_v45 = vadd.f32 %v1007_v44, %v918_v42  ;;  %v880_v46 = vpop.f32.mrf.mxu0 }
 0x120   : > { %v969_v48 = vpop.f32.mrf.mxu1 }
 0x121   : > { %v1060_v49 = vadd.f32 %v1008_v45, %v530_v43  ;;  %v970_v50 = vadd.f32 %v969_v48, %v880_v46  ;;  %v521_v43 = vld [vmem:[#allocation2 + $0x88] sm:$0xff] }
 0x123   : > { %1092 = vst [vmem:[#allocation2 + $0x40] sm:$0xff] %v1060_v49  ;;  %v1045_v51 = vadd.f32 %v970_v50, %v515_v47  ;;  %v537_v49 = vld [vmem:[#allocation2 + $0xd0] sm:$0xff] }
 0x125   : > { %1077 = vst [vmem:[#allocation2 + $0x18] sm:$0xff] %v1045_v51  ;;  %v920_v52 = vpop.f32.mrf.mxu2 }
 0x126   : > { %v1009_v54 = vpop.f32.mrf.mxu3 }
 0x127   : > { %v1010_v55 = vadd.f32 %v1009_v54, %v920_v52  ;;  %v883_v56 = vpop.f32.mrf.mxu0 }
 0x128   : > { %v972_v58 = vpop.f32.mrf.mxu1 }
 0x129   : > { %v1061_v59 = vadd.f32 %v1010_v55, %v531_v53  ;;  %v973_v60 = vadd.f32 %v972_v58, %v883_v56  ;;  %v522_v53 = vld [vmem:[#allocation2 + $0xe8] sm:$0xff] }
 0x12b   : > { %1093 = vst [vmem:[#allocation2 + $0xc8] sm:$0xff] %v1061_v59  ;;  %v1046_v61 = vadd.f32 %v973_v60, %v516_v57  ;;  %v538_v59 = vld [vmem:[#allocation2 + $0x10] sm:$0xff] }
 0x12d   : > { %1078 = vst [vmem:[#allocation2 + $0x50] sm:$0xff] %v1046_v61  ;;  %v923_v62 = vpop.f32.mrf.mxu2 }
 0x12e   : > { %v1012_v0 = vpop.f32.mrf.mxu3 }
 0x12f   : > { %v1013_v1 = vadd.f32 %v1012_v0, %v923_v62  ;;  %v885_v2 = vpop.f32.mrf.mxu0 }
 0x130   : > { %v974_v4 = vpop.f32.mrf.mxu1 }
 0x131   : > { %v1062_v5 = vadd.f32 %v1013_v1, %v532_v63  ;;  %v975_v6 = vadd.f32 %v974_v4, %v885_v2  ;;  %v523_v63 = vld [vmem:[#allocation2 + $0xb8] sm:$0xff] }
 0x133   : > { %1094 = vst [vmem:[#allocation2 + $0xe0] sm:$0xff] %v1062_v5  ;;  %v1047_v7 = vadd.f32 %v975_v6, %v517_v3  ;;  %v539_v5 = vld [vmem:[#allocation2 + $0x28] sm:$0xff] }
 0x135   : > { %1079 = vst [vmem:[#allocation2 + $0x68] sm:$0xff] %v1047_v7  ;;  %v925_v8 = vpop.f32.mrf.mxu2 }
 0x136   : > { %v1014_v10 = vpop.f32.mrf.mxu3 }
 0x137   : > { %v1015_v11 = vadd.f32 %v1014_v10, %v925_v8  ;;  %v888_v12 = vpop.f32.mrf.mxu0 }
 0x138   : > { %v977_v14 = vpop.f32.mrf.mxu1 }
 0x139   : > { %v1063_v15 = vadd.f32 %v1015_v11, %v533_v9  ;;  %v978_v16 = vadd.f32 %v977_v14, %v888_v12  ;;  %v524_v9 = vld [vmem:[#allocation2 + $0x60] sm:$0xff] }
 0x13b   : > { %1095 = vst [vmem:[#allocation2 + $0x90] sm:$0xff] %v1063_v15  ;;  %v1048_v17 = vadd.f32 %v978_v16, %v518_v13  ;;  %v540_v15 = vld [vmem:[#allocation2 + $0xa0] sm:$0xff] }
 0x13d   : > { %1080 = vst [vmem:[#allocation2 + $0x30] sm:$0xff] %v1048_v17  ;;  %v928_v18 = vpop.f32.mrf.mxu2 }
 0x13e   : > { %v1017_v20 = vpop.f32.mrf.mxu3 }
 0x13f   : > { %v1018_v21 = vadd.f32 %v1017_v20, %v928_v18  ;;  %v890_v22 = vpop.f32.mrf.mxu0 }
 0x140   : > { %v979_v24 = vpop.f32.mrf.mxu1 }
 0x141   : > { %v1064_v25 = vadd.f32 %v1018_v21, %v534_v19  ;;  %v980_v26 = vadd.f32 %v979_v24, %v890_v22  ;;  %v525_v19 = vld [vmem:[#allocation2 + $0xf0] sm:$0xff] }
 0x143   : > { %1096 = vst [vmem:[#allocation2 + $0x70] sm:$0xff] %v1064_v25  ;;  %v1049_v27 = vadd.f32 %v980_v26, %v519_v23  ;;  %v541_v25 = vld [vmem:[#allocation2 + $0xf8] sm:$0xff] }
 0x145   : > { %1081 = vst [vmem:[#allocation2 + $0x48] sm:$0xff] %v1049_v27  ;;  %v930_v28 = vpop.f32.mrf.mxu2 }
 0x146   : > { %v1019_v30 = vpop.f32.mrf.mxu3 }
 0x147   : > { %v1020_v31 = vadd.f32 %v1019_v30, %v930_v28  ;;  %v893_v32 = vpop.f32.mrf.mxu0 }
 0x148   : > { %v982_v34 = vpop.f32.mrf.mxu1 }
 0x149   : > { %v1065_v35 = vadd.f32 %v1020_v31, %v535_v29  ;;  %v983_v36 = vadd.f32 %v982_v34, %v893_v32  ;;  %v526_v29 = vld [vmem:[#allocation2 + $0x8] sm:$0xff] }
 0x14b   : > { %1097 = vst [vmem:[#allocation2 + $0xc0] sm:$0xff] %v1065_v35  ;;  %v1050_v37 = vadd.f32 %v983_v36, %v520_v33  ;;  %v542_v35 = vld [vmem:[#allocation2 + $0x20] sm:$0xff] }
 0x14d   : > { %1082 = vst [vmem:[#allocation2 + $0x80] sm:$0xff] %v1050_v37  ;;  %v933_v38 = vpop.f32.mrf.mxu2 }
 0x14e   : > { %v1022_v40 = vpop.f32.mrf.mxu3 }
 0x14f   : > { %v1023_v41 = vadd.f32 %v1022_v40, %v933_v38  ;;  %v895_v42 = vpop.f32.mrf.mxu0 }
 0x150   : > { %v984_v44 = vpop.f32.mrf.mxu1 }
 0x151   : > { %v1066_v45 = vadd.f32 %v1023_v41, %v536_v39  ;;  %v985_v46 = vadd.f32 %v984_v44, %v895_v42  ;;  %v527_v39 = vld [vmem:[#allocation2 + $0x78] sm:$0xff] }
 0x153   : > { %1098 = vst [vmem:[#allocation2 + $0xa8] sm:$0xff] %v1066_v45  ;;  %v1051_v47 = vadd.f32 %v985_v46, %v521_v43  ;;  %v543_v45 = vld [vmem:[#allocation2 + $0x98] sm:$0xff] }
 0x155   : > { %1083 = vst [vmem:[#allocation2 + $0x88] sm:$0xff] %v1051_v47  ;;  %v935_v48 = vpop.f32.mrf.mxu2 }
 0x156   : > { %v1024_v50 = vpop.f32.mrf.mxu3 }
 0x157   : > { %v1025_v51 = vadd.f32 %v1024_v50, %v935_v48  ;;  %v898_v52 = vpop.f32.mrf.mxu0 }
 0x158   : > { %v987_v54 = vpop.f32.mrf.mxu1 }
 0x159   : > { %v1067_v55 = vadd.f32 %v1025_v51, %v537_v49  ;;  %v988_v56 = vadd.f32 %v987_v54, %v898_v52 }
 0x15b   : > { %1099 = vst [vmem:[#allocation2 + $0xd0] sm:$0xff] %v1067_v55  ;;  %v1052_v57 = vadd.f32 %v988_v56, %v522_v53 }
 0x15d   : > { %1084 = vst [vmem:[#allocation2 + $0xe8] sm:$0xff] %v1052_v57  ;;  %v938_v58 = vpop.f32.mrf.mxu2 }
 0x15e   : > { %v1027_v60 = vpop.f32.mrf.mxu3 }
 0x15f   : > { %v1028_v61 = vadd.f32 %v1027_v60, %v938_v58  ;;  %v900_v62 = vpop.f32.mrf.mxu0 }
 0x160   : > { %v989_v0 = vpop.f32.mrf.mxu1 }
 0x161   : > { %v1068_v1 = vadd.f32 %v1028_v61, %v538_v59  ;;  %v990_v2 = vadd.f32 %v989_v0, %v900_v62 }
 0x163   : > { %1100 = vst [vmem:[#allocation2 + $0x10] sm:$0xff] %v1068_v1  ;;  %v1053_v3 = vadd.f32 %v990_v2, %v523_v63 }
 0x165   : > { %1085 = vst [vmem:[#allocation2 + $0xb8] sm:$0xff] %v1053_v3  ;;  %v940_v4 = vpop.f32.mrf.mxu2 }
 0x166   : > { %v1029_v6 = vpop.f32.mrf.mxu3 }
 0x167   : > { %v1030_v7 = vadd.f32 %v1029_v6, %v940_v4  ;;  %v903_v8 = vpop.f32.mrf.mxu0 }
 0x168   : > { %v992_v10 = vpop.f32.mrf.mxu1 }
 0x169   : > { %v1069_v11 = vadd.f32 %v1030_v7, %v539_v5  ;;  %v993_v12 = vadd.f32 %v992_v10, %v903_v8 }
 0x16b   : > { %1101 = vst [vmem:[#allocation2 + $0x28] sm:$0xff] %v1069_v11  ;;  %v1054_v13 = vadd.f32 %v993_v12, %v524_v9 }
 0x16d   : > { %1086 = vst [vmem:[#allocation2 + $0x60] sm:$0xff] %v1054_v13  ;;  %v943_v14 = vpop.f32.mrf.mxu2 }
 0x16e   : > { %v1032_v16 = vpop.f32.mrf.mxu3 }
 0x16f   : > { %v1033_v17 = vadd.f32 %v1032_v16, %v943_v14  ;;  %v905_v18 = vpop.f32.mrf.mxu0 }
 0x170   : > { %v994_v20 = vpop.f32.mrf.mxu1 }
 0x171   : > { %v1070_v21 = vadd.f32 %v1033_v17, %v540_v15  ;;  %v995_v22 = vadd.f32 %v994_v20, %v905_v18 }
 0x173   : > { %1102 = vst [vmem:[#allocation2 + $0xa0] sm:$0xff] %v1070_v21  ;;  %v1055_v23 = vadd.f32 %v995_v22, %v525_v19 }
 0x175   : > { %1087 = vst [vmem:[#allocation2 + $0xf0] sm:$0xff] %v1055_v23  ;;  %v945_v24 = vpop.f32.mrf.mxu2 }
 0x176   : > { %v1034_v26 = vpop.f32.mrf.mxu3 }
 0x177   : > { %v1035_v27 = vadd.f32 %v1034_v26, %v945_v24  ;;  %v908_v28 = vpop.f32.mrf.mxu0 }
 0x178   : > { %v997_v30 = vpop.f32.mrf.mxu1 }
 0x179   : > { %v1071_v31 = vadd.f32 %v1035_v27, %v541_v25  ;;  %v998_v32 = vadd.f32 %v997_v30, %v908_v28 }
 0x17b   : > { %1103 = vst [vmem:[#allocation2 + $0xf8] sm:$0xff] %v1071_v31  ;;  %v1056_v33 = vadd.f32 %v998_v32, %v526_v29 }
 0x17d   : > { %1088 = vst [vmem:[#allocation2 + $0x8] sm:$0xff] %v1056_v33  ;;  %v948_v34 = vpop.f32.mrf.mxu2 }
 0x17e   : > { %v1037_v36 = vpop.f32.mrf.mxu3 }
 0x17f   : > { %v1038_v37 = vadd.f32 %v1037_v36, %v948_v34  ;;  %v910_v38 = vpop.f32.mrf.mxu0 }
 0x180   : > { %v999_v40 = vpop.f32.mrf.mxu1 }
 0x181   : > { %v1072_v41 = vadd.f32 %v1038_v37, %v542_v35  ;;  %v1000_v42 = vadd.f32 %v999_v40, %v910_v38 }
 0x183   : > { %1104 = vst [vmem:[#allocation2 + $0x20] sm:$0xff] %v1072_v41  ;;  %v1057_v43 = vadd.f32 %v1000_v42, %v527_v39 }
 0x185   : > { %1089 = vst [vmem:[#allocation2 + $0x78] sm:$0xff] %v1057_v43  ;;  %v950_v44 = vpop.f32.mrf.mxu2 }
 0x186   : > { %v1039_v46 = vpop.f32.mrf.mxu3 }
 0x187   : > { %v1040_v47 = vadd.f32 %v1039_v46, %v950_v44  ;;  %1109 = sbr.rel (%p2163_p13) target bundleno = 689 (0x2b1), region = 90 }
 0x189   : > { %v1073_v48 = vadd.f32 %v1040_v47, %v543_v45 }
 0x18b   : > { %1105 = vst [vmem:[#allocation2 + $0x98] sm:$0xff] %v1073_v48 }
 0x18c   : > { %v2374_v49 = vld [vmem:[%s2947_s4 + $0x38] sm:$0xff]  ;;  %v2373_v51 = vld [vmem:[%s2947_s4 + $0x30] sm:$0xff]  ;;  %v2372_v53 = vld [vmem:[%s2947_s4 + $0x28] sm:$0xff] }
 0x18d   : > { %v2350_v50 = vld [vmem:[%s2946_s3 + $0x38] sm:$0xff]  ;;  %1462 = vmatpush.bf16.msra.mxu0 %v2374_v49  ;;  %2391 = vmatpush.bf16.msra.mxu2 %v2374_v49  ;;  %v2349_v52 = vld [vmem:[%s2946_s3 + $0x30] sm:$0xff]  ;;  %v2348_v54 = vld [vmem:[%s2946_s3 + $0x28] sm:$0xff] }
 0x18e   : > { %1599 = vmatpush.bf16.msra.mxu1 %v2350_v50  ;;  %2399 = vmatpush.bf16.msra.mxu3 %v2350_v50  ;;  %v2371_v55 = vld [vmem:[%s2947_s4 + $0x20] sm:$0xff]  ;;  %v2370_v57 = vld [vmem:[%s2947_s4 + $0x18] sm:$0xff]  ;;  %v2369_v59 = vld [vmem:[%s2947_s4 + $0x10] sm:$0xff] }
 0x18f   : > { %v2347_v56 = vld [vmem:[%s2946_s3 + $0x20] sm:$0xff]  ;;  %v2346_v58 = vld [vmem:[%s2946_s3 + $0x18] sm:$0xff]  ;;  %v2345_v60 = vld [vmem:[%s2946_s3 + $0x10] sm:$0xff] }
 0x190   : > { %v1110_v61 = vld [vmem:[#allocation2 + $0xb0] sm:$0xff]  ;;  %v1111_v62 = vld [vmem:[#allocation2] sm:$0xff]  ;;  %v1126_v63 = vld [vmem:[#allocation2 + $0x38] sm:$0xff] }
 0x191   : > { %1463 = vmatpush.bf16.msra.mxu0 %v2373_v51  ;;  %2392 = vmatpush.bf16.msra.mxu2 %v2373_v51  ;;  %v1127_v0 = vld [vmem:[#allocation2 + $0x58] sm:$0xff]  ;;  %v2368_v1 = vld [vmem:[%s2947_s4 + $0x8] sm:$0xff]  ;;  %vm1142_vm0 = vcmp.ge.f32.partialorder %v1110_v61, 0.0  ;;  %v1174_v3 = vmul.f32 0.01, %v1110_v61  ;;  %vm1143_vm1 = vcmp.ge.f32.partialorder %v1111_v62, 0.0 }
 0x192   : > { %1600 = vmatpush.bf16.msra.mxu1 %v2349_v52  ;;  %2400 = vmatpush.bf16.msra.mxu3 %v2349_v52  ;;  %v2344_v2 = vld [vmem:[%s2946_s3 + $0x8] sm:$0xff]  ;;  %v1175_v4 = vmul.f32 0.01, %v1111_v62  ;;  %v1190_v5 = vmul.f32 0.01, %v1126_v63  ;;  %vm1158_vm2 = vcmp.ge.f32.partialorder %v1126_v63, 0.0 }
 0x193   : > { %v1191_v6 = vmul.f32 0.01, %v1127_v0  ;;  %vm1159_vm3 = vcmp.ge.f32.partialorder %v1127_v0, 0.0  ;;  %v2367_v7 = vld [vmem:[%s2947_s4] sm:$0xff]  ;;  %v1206_v8 = vsel %vm1142_vm0, %v1110_v61, %v1174_v3  ;;  %v1112_v17 = vld [vmem:[#allocation2 + $0xd8] sm:$0xff]  ;;  %v1129_v20 = vld [vmem:[#allocation2 + $0xc8] sm:$0xff] }
 0x194   : > { %v2343_v9 = vld [vmem:[%s2946_s3] sm:$0xff]  ;;  %v1207_v10 = vsel %vm1143_vm1, %v1111_v62, %v1175_v4  ;;  %v1222_v11 = vsel %vm1158_vm2, %v1126_v63, %v1190_v5  ;;  %v1113_v18 = vld [vmem:[#allocation2 + $0x18] sm:$0xff]  ;;  %v1176_v21 = vmul.f32 0.01, %v1112_v17  ;;  %v1193_v24 = vmul.f32 0.01, %v1129_v20 }
 0x195   : > { %1464 = vmatpush.bf16.msra.mxu0 %v2372_v53  ;;  %2393 = vmatpush.bf16.msra.mxu2 %v2372_v53  ;;  %v1223_v12 = vsel %vm1159_vm3, %v1127_v0, %v1191_v6  ;;  %v2351_v13 = vld [vmem:[%s2698_s19] sm:$0xff]  ;;  %v1238_v15 = vpack.c.bf16 %v1207_v10, %v1206_v8  ;;  %v1177_v22 = vmul.f32 0.01, %v1113_v18  ;;  %vm1144_vm4 = vcmp.ge.f32.partialorder %v1112_v17, 0.0  ;;  %v2352_v29 = vld [vmem:[%s2698_s19 + $0x8] sm:$0xff]  ;;  %v1114_v33 = vld [vmem:[#allocation2 + $0x50] sm:$0xff] }
 0x196   : > { %1601 = vmatpush.bf16.msra.mxu1 %v2348_v54  ;;  %2401 = vmatpush.bf16.msra.mxu3 %v2348_v54  ;;  %v2359_v14 = vld [vmem:[%s2698_s19 + $0x40] sm:$0xff]  ;;  %v1246_v16 = vpack.c.bf16 %v1223_v12, %v1222_v11  ;;  %vm1145_vm5 = vcmp.ge.f32.partialorder %v1113_v18, 0.0  ;;  %vm1161_vm7 = vcmp.ge.f32.partialorder %v1129_v20, 0.0  ;;  %v1208_v25 = vsel %vm1144_vm4, %v1112_v17, %v1176_v21  ;;  %v2360_v30 = vld [vmem:[%s2698_s19 + $0x48] sm:$0xff]  ;;  %v1131_v36 = vld [vmem:[#allocation2 + $0x90] sm:$0xff] }
 0x197   : > { %v1128_v19 = vld [vmem:[#allocation2 + $0x40] sm:$0xff]  ;;  %v1209_v26 = vsel %vm1145_vm5, %v1113_v18, %v1177_v22  ;;  %v1225_v28 = vsel %vm1161_vm7, %v1129_v20, %v1193_v24  ;;  %v1115_v34 = vld [vmem:[#allocation2 + $0x68] sm:$0xff]  ;;  %v1178_v37 = vmul.f32 0.01, %v1114_v33  ;;  %v1195_v40 = vmul.f32 0.01, %v1131_v36 }
 0x198   : > { %v1192_v23 = vmul.f32 0.01, %v1128_v19  ;;  %vm1160_vm6 = vcmp.ge.f32.partialorder %v1128_v19, 0.0  ;;  %v1239_v31 = vpack.c.bf16 %v1209_v26, %v1208_v25  ;;  %v1130_v35 = vld [vmem:[#allocation2 + $0xe0] sm:$0xff]  ;;  %v1179_v38 = vmul.f32 0.01, %v1115_v34 }
 0x199   : > { %1465 = vmatpush.bf16.msra.mxu0 %v2371_v55  ;;  %2394 = vmatpush.bf16.msra.mxu2 %v2371_v55  ;;  %v1194_v39 = vmul.f32 0.01, %v1130_v35  ;;  %vm1146_vm8 = vcmp.ge.f32.partialorder %v1114_v33, 0.0  ;;  %vm1147_vm9 = vcmp.ge.f32.partialorder %v1115_v34, 0.0  ;;  %vm1162_vm10 = vcmp.ge.f32.partialorder %v1130_v35, 0.0  ;;  %v2353_v45 = vld [vmem:[%s2698_s19 + $0x10] sm:$0xff] }
 0x19a   : > { %1602 = vmatpush.bf16.msra.mxu1 %v2347_v56  ;;  %2402 = vmatpush.bf16.msra.mxu3 %v2347_v56  ;;  %v1224_v27 = vsel %vm1160_vm6, %v1128_v19, %v1192_v23  ;;  %vm1163_vm11 = vcmp.ge.f32.partialorder %v1131_v36, 0.0  ;;  %v1210_v41 = vsel %vm1146_vm8, %v1114_v33, %v1178_v37  ;;  %v1211_v42 = vsel %vm1147_vm9, %v1115_v34, %v1179_v38  ;;  %v2361_v46 = vld [vmem:[%s2698_s19 + $0x50] sm:$0xff]  ;;  %v1117_v50 = vld [vmem:[#allocation2 + $0x48] sm:$0xff]  ;;  %v1133_v52 = vld [vmem:[#allocation2 + $0xc0] sm:$0xff] }
 0x19b   : > { %v1247_v32 = vpack.c.bf16 %v1225_v28, %v1224_v27  ;;  %v1226_v43 = vsel %vm1162_vm10, %v1130_v35, %v1194_v39  ;;  %v1227_v44 = vsel %vm1163_vm11, %v1131_v36, %v1195_v40  ;;  %v1240_v47 = vpack.c.bf16 %v1211_v42, %v1210_v41  ;;  %v1116_v49 = vld [vmem:[#allocation2 + $0x30] sm:$0xff]  ;;  %v2354_v61 = vld [vmem:[%s2698_s19 + $0x18] sm:$0xff]  ;;  %v1134_v3 = vld [vmem:[#allocation2 + $0xa8] sm:$0xff] }
 0x19c   : > { %v1248_v48 = vpack.c.bf16 %v1227_v44, %v1226_v43  ;;  %v1132_v51 = vld [vmem:[#allocation2 + $0x70] sm:$0xff]  ;;  %v1180_v53 = vmul.f32 0.01, %v1116_v49  ;;  %v1181_v54 = vmul.f32 0.01, %v1117_v50  ;;  %vm1148_vm12 = vcmp.ge.f32.partialorder %v1116_v49, 0.0 }
 0x19d   : > { %1466 = vmatpush.bf16.msra.mxu0 %v2370_v57  ;;  %2395 = vmatpush.bf16.msra.mxu2 %v2370_v57  ;;  %v1196_v55 = vmul.f32 0.01, %v1132_v51  ;;  %v1197_v56 = vmul.f32 0.01, %v1133_v52  ;;  %vm1149_vm13 = vcmp.ge.f32.partialorder %v1117_v50, 0.0  ;;  %vm1164_vm14 = vcmp.ge.f32.partialorder %v1132_v51, 0.0 }
 0x19e   : > { %1603 = vmatpush.bf16.msra.mxu1 %v2346_v58  ;;  %2403 = vmatpush.bf16.msra.mxu3 %v2346_v58  ;;  %vm1165_vm15 = vcmp.ge.f32.partialorder %v1133_v52, 0.0  ;;  %v1212_v57 = vsel %vm1148_vm12, %v1116_v49, %v1180_v53  ;;  %v1213_v58 = vsel %vm1149_vm13, %v1117_v50, %v1181_v54  ;;  %v2362_v62 = vld [vmem:[%s2698_s19 + $0x58] sm:$0xff]  ;;  %v1135_v4 = vld [vmem:[#allocation2 + $0xd0] sm:$0xff]  ;;  %vm1166_vm2 = vcmp.ge.f32.partialorder %v1134_v3, 0.0  ;;  %v1120_v17 = vld [vmem:[#allocation2 + $0xe8] sm:$0xff] }
 0x19f   : > { %v1241_v63 = vpack.c.bf16 %v1213_v58, %v1212_v57  ;;  %v1199_v8 = vmul.f32 0.01, %v1135_v4  ;;  %vm1167_vm3 = vcmp.ge.f32.partialorder %v1135_v4, 0.0  ;;  %v1121_v18 = vld [vmem:[#allocation2 + $0xb8] sm:$0xff]  ;;  %v1136_v19 = vld [vmem:[#allocation2 + $0x10] sm:$0xff]  ;;  %v1137_v20 = vld [vmem:[#allocation2 + $0x28] sm:$0xff] }
 0x1a0   : > { %v1184_v21 = vmul.f32 0.01, %v1120_v17  ;;  %v1185_v22 = vmul.f32 0.01, %v1121_v18  ;;  %v1200_v23 = vmul.f32 0.01, %v1136_v19 }
 0x1a1   : > { %1467 = vmatpush.bf16.msra.mxu0 %v2369_v59  ;;  %2396 = vmatpush.bf16.msra.mxu2 %v2369_v59  ;;  %v1228_v59 = vsel %vm1164_vm14, %v1132_v51, %v1196_v55  ;;  %v1231_v12 = vsel %vm1167_vm3, %v1135_v4, %v1199_v8  ;;  %v1201_v24 = vmul.f32 0.01, %v1137_v20  ;;  %vm1152_vm4 = vcmp.ge.f32.partialorder %v1120_v17, 0.0  ;;  %v1122_v33 = vld [vmem:[#allocation2 + $0x60] sm:$0xff]  ;;  %v1123_v34 = vld [vmem:[#allocation2 + $0xf0] sm:$0xff]  ;;  %v1139_v36 = vld [vmem:[#allocation2 + $0xf8] sm:$0xff] }
 0x1a2   : > { %1604 = vmatpush.bf16.msra.mxu1 %v2345_v60  ;;  %2404 = vmatpush.bf16.msra.mxu3 %v2345_v60  ;;  %v1229_v60 = vsel %vm1165_vm15, %v1133_v52, %v1197_v56  ;;  %vm1153_vm5 = vcmp.ge.f32.partialorder %v1121_v18, 0.0  ;;  %vm1168_vm6 = vcmp.ge.f32.partialorder %v1136_v19, 0.0  ;;  %vm1169_vm7 = vcmp.ge.f32.partialorder %v1137_v20, 0.0  ;;  %v1138_v35 = vld [vmem:[#allocation2 + $0xa0] sm:$0xff]  ;;  %v1124_v49 = vld [vmem:[#allocation2 + $0x8] sm:$0xff]  ;;  %v1125_v50 = vld [vmem:[#allocation2 + $0x78] sm:$0xff] }
 0x1a3   : > { %v1249_v0 = vpack.c.bf16 %v1229_v60, %v1228_v59  ;;  %v1216_v25 = vsel %vm1152_vm4, %v1120_v17, %v1184_v21  ;;  %v1217_v26 = vsel %vm1153_vm5, %v1121_v18, %v1185_v22  ;;  %v1232_v27 = vsel %vm1168_vm6, %v1136_v19, %v1200_v23  ;;  %v1140_v51 = vld [vmem:[#allocation2 + $0x20] sm:$0xff]  ;;  %v1141_v52 = vld [vmem:[#allocation2 + $0x98] sm:$0xff] }
 0x1a4   : > { %v1233_v28 = vsel %vm1169_vm7, %v1137_v20, %v1201_v24  ;;  %v1186_v37 = vmul.f32 0.01, %v1122_v33  ;;  %v1187_v38 = vmul.f32 0.01, %v1123_v34  ;;  %v1202_v39 = vmul.f32 0.01, %v1138_v35 }
 0x1a5   : > { %1468 = vmatpush.bf16.msra.mxu0 %v2368_v1  ;;  %2397 = vmatpush.bf16.msra.mxu2 %v2368_v1  ;;  %v1118_v1 = vld [vmem:[#allocation2 + $0x80] sm:$0xff]  ;;  %v1203_v40 = vmul.f32 0.01, %v1139_v36  ;;  %vm1154_vm8 = vcmp.ge.f32.partialorder %v1122_v33, 0.0  ;;  %vm1155_vm9 = vcmp.ge.f32.partialorder %v1123_v34, 0.0  ;;  %vm1170_vm10 = vcmp.ge.f32.partialorder %v1138_v35, 0.0 }
 0x1a6   : > { %1605 = vmatpush.bf16.msra.mxu1 %v2344_v2  ;;  %2405 = vmatpush.bf16.msra.mxu3 %v2344_v2  ;;  %v1119_v2 = vld [vmem:[#allocation2 + $0x88] sm:$0xff]  ;;  %v1182_v5 = vmul.f32 0.01, %v1118_v1  ;;  %vm1150_vm0 = vcmp.ge.f32.partialorder %v1118_v1, 0.0  ;;  %vm1171_vm11 = vcmp.ge.f32.partialorder %v1139_v36, 0.0  ;;  %v1218_v41 = vsel %vm1154_vm8, %v1122_v33, %v1186_v37 }
 0x1a7   : > { %v1183_v6 = vmul.f32 0.01, %v1119_v2  ;;  %vm1151_vm1 = vcmp.ge.f32.partialorder %v1119_v2, 0.0  ;;  %v1219_v42 = vsel %vm1155_vm9, %v1123_v34, %v1187_v38  ;;  %v1234_v43 = vsel %vm1170_vm10, %v1138_v35, %v1202_v39 }
 0x1a8   : > { %v1235_v44 = vsel %vm1171_vm11, %v1139_v36, %v1203_v40  ;;  %v1188_v53 = vmul.f32 0.01, %v1124_v49  ;;  %v1189_v54 = vmul.f32 0.01, %v1125_v50  ;;  %v1204_v55 = vmul.f32 0.01, %v1140_v51 }
 0x1a9   : > { %1469 = vmatpush.bf16.msra.mxu0 %v2367_v7  ;;  %2398 = vmatpush.bf16.msra.mxu2 %v2367_v7  ;;  %v1198_v7 = vmul.f32 0.01, %v1134_v3  ;;  %v1215_v10 = vsel %vm1151_vm1, %v1119_v2, %v1183_v6  ;;  %v1205_v56 = vmul.f32 0.01, %v1141_v52  ;;  %vm1156_vm12 = vcmp.ge.f32.partialorder %v1124_v49, 0.0 }
 0x1aa   : > { %1606 = vmatpush.bf16.msra.mxu1 %v2343_v9  ;;  %2406 = vmatpush.bf16.msra.mxu3 %v2343_v9  ;;  %v1214_v9 = vsel %vm1150_vm0, %v1118_v1, %v1182_v5  ;;  %vm1157_vm13 = vcmp.ge.f32.partialorder %v1125_v50, 0.0  ;;  %vm1172_vm14 = vcmp.ge.f32.partialorder %v1140_v51, 0.0  ;;  %vm1173_vm15 = vcmp.ge.f32.partialorder %v1141_v52, 0.0  ;;  %v2856_v2 = vld [vmem:[%s2948_s5] ss:$0 sm:$0xff] }
 0x1ab   : > { %v1230_v11 = vsel %vm1166_vm2, %v1134_v3, %v1198_v7  ;;  %v1220_v57 = vsel %vm1156_vm12, %v1124_v49, %v1188_v53  ;;  %v1221_v58 = vsel %vm1157_vm13, %v1125_v50, %v1189_v54  ;;  %v1236_v59 = vsel %vm1172_vm14, %v1140_v51, %v1204_v55 }
 0x1ac   : > { %1470 = vmatmul.bf16.vlgmr.msra.gmra.mxu0 %v2351_v13  ;;  %1510 = vmatmul.bf16.vlgmr.msra.gmra.mxu2 %v2359_v14  ;;  %v2355_v13 = vld [vmem:[%s2698_s19 + $0x20] sm:$0xff]  ;;  %v1237_v60 = vsel %vm1173_vm15, %v1141_v52, %v1205_v56 }
 0x1ad   : > { %1607 = vmatmul.bf16.vlgmr.msra.gmra.mxu1 %v1238_v15  ;;  %1647 = vmatmul.bf16.vlgmr.msra.gmra.mxu3 %v1246_v16  ;;  %v2363_v14 = vld [vmem:[%s2698_s19 + $0x60] sm:$0xff]  ;;  %v1242_v15 = vpack.c.bf16 %v1215_v10, %v1214_v9  ;;  %v1250_v16 = vpack.c.bf16 %v1231_v12, %v1230_v11 }
 0x1bc   : > { %1475 = vmatmul.bf16.gmra.mxu0 %v2352_v29  ;;  %1515 = vmatmul.bf16.gmra.mxu2 %v2360_v30  ;;  %v2356_v29 = vld [vmem:[%s2698_s19 + $0x28] sm:$0xff] }
 0x1bd   : > { %1612 = vmatmul.bf16.gmra.mxu1 %v1239_v31  ;;  %1652 = vmatmul.bf16.gmra.mxu3 %v1247_v32  ;;  %v2364_v30 = vld [vmem:[%s2698_s19 + $0x68] sm:$0xff]  ;;  %v1243_v31 = vpack.c.bf16 %v1217_v26, %v1216_v25  ;;  %v1251_v32 = vpack.c.bf16 %v1233_v28, %v1232_v27 }
 0x1cc   : > { %1480 = vmatmul.bf16.gmra.mxu0 %v2353_v45  ;;  %1520 = vmatmul.bf16.gmra.mxu2 %v2361_v46  ;;  %v2357_v45 = vld [vmem:[%s2698_s19 + $0x30] sm:$0xff] }
 0x1cd   : > { %1617 = vmatmul.bf16.gmra.mxu1 %v1240_v47  ;;  %1657 = vmatmul.bf16.gmra.mxu3 %v1248_v48  ;;  %v2365_v46 = vld [vmem:[%s2698_s19 + $0x70] sm:$0xff]  ;;  %v1244_v47 = vpack.c.bf16 %v1219_v42, %v1218_v41  ;;  %v1252_v48 = vpack.c.bf16 %v1235_v44, %v1234_v43 }
 0x1dc   : > { %1485 = vmatmul.bf16.gmra.mxu0 %v2354_v61  ;;  %1525 = vmatmul.bf16.gmra.mxu2 %v2362_v62  ;;  %v2358_v61 = vld [vmem:[%s2698_s19 + $0x38] sm:$0xff] }
 0x1dd   : > { %1622 = vmatmul.bf16.gmra.mxu1 %v1241_v63  ;;  %1662 = vmatmul.bf16.gmra.mxu3 %v1249_v0  ;;  %v2366_v62 = vld [vmem:[%s2698_s19 + $0x78] sm:$0xff]  ;;  %v1245_v63 = vpack.c.bf16 %v1221_v58, %v1220_v57  ;;  %v1253_v0 = vpack.c.bf16 %v1237_v60, %v1236_v59 }
 0x1ec   : > { %1490 = vmatmul.bf16.gmra.mxu0 %v2355_v13  ;;  %1530 = vmatmul.bf16.gmra.mxu2 %v2363_v14 }
 0x1ed   : > { %1627 = vmatmul.bf16.gmra.mxu1 %v1242_v15  ;;  %1667 = vmatmul.bf16.gmra.mxu3 %v1250_v16 }
 0x1fc   : > { %1495 = vmatmul.bf16.gmra.mxu0 %v2356_v29  ;;  %1535 = vmatmul.bf16.gmra.mxu2 %v2364_v30 }
 0x1fd   : > { %1632 = vmatmul.bf16.gmra.mxu1 %v1243_v31  ;;  %1672 = vmatmul.bf16.gmra.mxu3 %v1251_v32 }
 0x20c   : > { %1500 = vmatmul.bf16.gmra.mxu0 %v2357_v45  ;;  %1540 = vmatmul.bf16.gmra.mxu2 %v2365_v46 }
 0x20d   : > { %1637 = vmatmul.bf16.gmra.mxu1 %v1244_v47  ;;  %1677 = vmatmul.bf16.gmra.mxu3 %v1252_v48 }
 0x21c   : > { %1505 = vmatmul.bf16.gmra.mxu0 %v2358_v61  ;;  %1545 = vmatmul.bf16.gmra.mxu2 %v2366_v62 }
 0x21d   : > { %1642 = vmatmul.bf16.gmra.mxu1 %v1245_v63  ;;  %1682 = vmatmul.bf16.gmra.mxu3 %v1253_v0 }
 0x229   : > { %v1471_v1 = vpop.f32.mrf.mxu0 }
 0x22a   : > { %v1608_v3 = vpop.f32.mrf.mxu1 }
 0x22b   : > { %v1609_v4 = vadd.f32 %v1608_v3, %v1471_v1 }
 0x22d   : > { %v1692_v5 = vadd.f32 %v2856_v2, %v1609_v4 }
 0x22f   : > { %vm1724_vm0 = vcmp.ge.f32.partialorder %v1692_v5, 0.0  ;;  %v1756_v6 = vmul.f32 0.01, %v1692_v5  ;;  %v1511_v7 = vpop.f32.mrf.mxu2 }
 0x230   : > { %v1648_v8 = vpop.f32.mrf.mxu3 }
 0x231   : > { %v1788_v9 = vsel %vm1724_vm0, %v1692_v5, %v1756_v6  ;;  %v1649_v10 = vadd.f32 %v1648_v8, %v1511_v7  ;;  %v1473_v11 = vpop.f32.mrf.mxu0 }
 0x232   : > { %1820 = vst [vmem:[%s2703_s24] sm:$0xff] %v1788_v9  ;;  %v1610_v12 = vpop.f32.mrf.mxu1 }
 0x233   : > { %v1708_v13 = vadd.f32 %v2856_v2, %v1649_v10  ;;  %v1611_v14 = vadd.f32 %v1610_v12, %v1473_v11 }
 0x235   : > { %vm1740_vm1 = vcmp.ge.f32.partialorder %v1708_v13, 0.0  ;;  %v1772_v15 = vmul.f32 0.01, %v1708_v13  ;;  %v1693_v16 = vadd.f32 %v2856_v2, %v1611_v14 }
 0x237   : > { %v1804_v17 = vsel %vm1740_vm1, %v1708_v13, %v1772_v15  ;;  %vm1725_vm2 = vcmp.ge.f32.partialorder %v1693_v16, 0.0  ;;  %v1757_v18 = vmul.f32 0.01, %v1693_v16  ;;  %v1513_v19 = vpop.f32.mrf.mxu2 }
 0x238   : > { %1836 = vst [vmem:[%s2703_s24 + $0x80] sm:$0xff] %v1804_v17  ;;  %v1650_v20 = vpop.f32.mrf.mxu3 }
 0x239   : > { %v1789_v21 = vsel %vm1725_vm2, %v1693_v16, %v1757_v18  ;;  %v1651_v22 = vadd.f32 %v1650_v20, %v1513_v19  ;;  %v1476_v23 = vpop.f32.mrf.mxu0 }
 0x23a   : > { %1821 = vst [vmem:[%s2703_s24 + $0x8] sm:$0xff] %v1789_v21  ;;  %v1613_v24 = vpop.f32.mrf.mxu1 }
 0x23b   : > { %v1709_v25 = vadd.f32 %v2856_v2, %v1651_v22  ;;  %v1614_v26 = vadd.f32 %v1613_v24, %v1476_v23 }
 0x23d   : > { %vm1741_vm3 = vcmp.ge.f32.partialorder %v1709_v25, 0.0  ;;  %v1773_v27 = vmul.f32 0.01, %v1709_v25  ;;  %v1694_v28 = vadd.f32 %v2856_v2, %v1614_v26 }
 0x23f   : > { %v1805_v29 = vsel %vm1741_vm3, %v1709_v25, %v1773_v27  ;;  %vm1726_vm4 = vcmp.ge.f32.partialorder %v1694_v28, 0.0  ;;  %v1758_v30 = vmul.f32 0.01, %v1694_v28  ;;  %v1516_v31 = vpop.f32.mrf.mxu2 }
 0x240   : > { %1837 = vst [vmem:[%s2703_s24 + $0x88] sm:$0xff] %v1805_v29  ;;  %v1653_v32 = vpop.f32.mrf.mxu3 }
 0x241   : > { %v1790_v33 = vsel %vm1726_vm4, %v1694_v28, %v1758_v30  ;;  %v1654_v34 = vadd.f32 %v1653_v32, %v1516_v31  ;;  %v1478_v35 = vpop.f32.mrf.mxu0 }
 0x242   : > { %1822 = vst [vmem:[%s2703_s24 + $0x10] sm:$0xff] %v1790_v33  ;;  %v1615_v36 = vpop.f32.mrf.mxu1 }
 0x243   : > { %v1710_v37 = vadd.f32 %v2856_v2, %v1654_v34  ;;  %v1616_v38 = vadd.f32 %v1615_v36, %v1478_v35 }
 0x245   : > { %vm1742_vm5 = vcmp.ge.f32.partialorder %v1710_v37, 0.0  ;;  %v1774_v39 = vmul.f32 0.01, %v1710_v37  ;;  %v1695_v40 = vadd.f32 %v2856_v2, %v1616_v38 }
 0x247   : > { %v1806_v41 = vsel %vm1742_vm5, %v1710_v37, %v1774_v39  ;;  %vm1727_vm6 = vcmp.ge.f32.partialorder %v1695_v40, 0.0  ;;  %v1759_v42 = vmul.f32 0.01, %v1695_v40  ;;  %v1518_v43 = vpop.f32.mrf.mxu2 }
 0x248   : > { %1838 = vst [vmem:[%s2703_s24 + $0x90] sm:$0xff] %v1806_v41  ;;  %v1655_v44 = vpop.f32.mrf.mxu3 }
 0x249   : > { %v1791_v45 = vsel %vm1727_vm6, %v1695_v40, %v1759_v42  ;;  %v1656_v46 = vadd.f32 %v1655_v44, %v1518_v43  ;;  %v1481_v47 = vpop.f32.mrf.mxu0 }
 0x24a   : > { %1823 = vst [vmem:[%s2703_s24 + $0x18] sm:$0xff] %v1791_v45  ;;  %v1618_v48 = vpop.f32.mrf.mxu1 }
 0x24b   : > { %v1711_v49 = vadd.f32 %v2856_v2, %v1656_v46  ;;  %v1619_v50 = vadd.f32 %v1618_v48, %v1481_v47 }
 0x24d   : > { %vm1743_vm7 = vcmp.ge.f32.partialorder %v1711_v49, 0.0  ;;  %v1775_v51 = vmul.f32 0.01, %v1711_v49  ;;  %v1696_v52 = vadd.f32 %v2856_v2, %v1619_v50 }
 0x24f   : > { %v1807_v53 = vsel %vm1743_vm7, %v1711_v49, %v1775_v51  ;;  %vm1728_vm8 = vcmp.ge.f32.partialorder %v1696_v52, 0.0  ;;  %v1760_v54 = vmul.f32 0.01, %v1696_v52  ;;  %v1521_v55 = vpop.f32.mrf.mxu2 }
 0x250   : > { %1839 = vst [vmem:[%s2703_s24 + $0x98] sm:$0xff] %v1807_v53  ;;  %v1658_v56 = vpop.f32.mrf.mxu3 }
 0x251   : > { %v1792_v57 = vsel %vm1728_vm8, %v1696_v52, %v1760_v54  ;;  %v1659_v58 = vadd.f32 %v1658_v56, %v1521_v55  ;;  %v1483_v59 = vpop.f32.mrf.mxu0 }
 0x252   : > { %1824 = vst [vmem:[%s2703_s24 + $0x20] sm:$0xff] %v1792_v57  ;;  %v1620_v60 = vpop.f32.mrf.mxu1 }
 0x253   : > { %v1712_v61 = vadd.f32 %v2856_v2, %v1659_v58  ;;  %v1621_v62 = vadd.f32 %v1620_v60, %v1483_v59 }
 0x255   : > { %vm1744_vm9 = vcmp.ge.f32.partialorder %v1712_v61, 0.0  ;;  %v1776_v63 = vmul.f32 0.01, %v1712_v61  ;;  %v1697_v0 = vadd.f32 %v2856_v2, %v1621_v62 }
 0x257   : > { %v1808_v1 = vsel %vm1744_vm9, %v1712_v61, %v1776_v63  ;;  %vm1729_vm10 = vcmp.ge.f32.partialorder %v1697_v0, 0.0  ;;  %v1761_v3 = vmul.f32 0.01, %v1697_v0  ;;  %v1523_v4 = vpop.f32.mrf.mxu2 }
 0x258   : > { %1840 = vst [vmem:[%s2703_s24 + $0xa0] sm:$0xff] %v1808_v1  ;;  %v1660_v5 = vpop.f32.mrf.mxu3 }
 0x259   : > { %v1793_v6 = vsel %vm1729_vm10, %v1697_v0, %v1761_v3  ;;  %v1661_v7 = vadd.f32 %v1660_v5, %v1523_v4  ;;  %v1486_v8 = vpop.f32.mrf.mxu0 }
 0x25a   : > { %1825 = vst [vmem:[%s2703_s24 + $0x28] sm:$0xff] %v1793_v6  ;;  %v1623_v9 = vpop.f32.mrf.mxu1 }
 0x25b   : > { %v1713_v10 = vadd.f32 %v2856_v2, %v1661_v7  ;;  %v1624_v11 = vadd.f32 %v1623_v9, %v1486_v8 }
 0x25d   : > { %vm1745_vm11 = vcmp.ge.f32.partialorder %v1713_v10, 0.0  ;;  %v1777_v12 = vmul.f32 0.01, %v1713_v10  ;;  %v1698_v13 = vadd.f32 %v2856_v2, %v1624_v11 }
 0x25f   : > { %v1809_v14 = vsel %vm1745_vm11, %v1713_v10, %v1777_v12  ;;  %vm1730_vm12 = vcmp.ge.f32.partialorder %v1698_v13, 0.0  ;;  %v1762_v15 = vmul.f32 0.01, %v1698_v13  ;;  %v1526_v16 = vpop.f32.mrf.mxu2 }
 0x260   : > { %1841 = vst [vmem:[%s2703_s24 + $0xa8] sm:$0xff] %v1809_v14  ;;  %v1663_v17 = vpop.f32.mrf.mxu3 }
 0x261   : > { %v1794_v18 = vsel %vm1730_vm12, %v1698_v13, %v1762_v15  ;;  %v1664_v19 = vadd.f32 %v1663_v17, %v1526_v16  ;;  %v1488_v20 = vpop.f32.mrf.mxu0 }
 0x262   : > { %1826 = vst [vmem:[%s2703_s24 + $0x30] sm:$0xff] %v1794_v18  ;;  %v1625_v21 = vpop.f32.mrf.mxu1 }
 0x263   : > { %v1714_v22 = vadd.f32 %v2856_v2, %v1664_v19  ;;  %v1626_v23 = vadd.f32 %v1625_v21, %v1488_v20 }
 0x265   : > { %vm1746_vm13 = vcmp.ge.f32.partialorder %v1714_v22, 0.0  ;;  %v1778_v24 = vmul.f32 0.01, %v1714_v22  ;;  %v1699_v25 = vadd.f32 %v2856_v2, %v1626_v23 }
 0x267   : > { %v1810_v26 = vsel %vm1746_vm13, %v1714_v22, %v1778_v24  ;;  %vm1731_vm14 = vcmp.ge.f32.partialorder %v1699_v25, 0.0  ;;  %v1763_v27 = vmul.f32 0.01, %v1699_v25  ;;  %v1528_v28 = vpop.f32.mrf.mxu2 }
 0x268   : > { %1842 = vst [vmem:[%s2703_s24 + $0xb0] sm:$0xff] %v1810_v26  ;;  %v1665_v29 = vpop.f32.mrf.mxu3 }
 0x269   : > { %v1795_v30 = vsel %vm1731_vm14, %v1699_v25, %v1763_v27  ;;  %v1666_v31 = vadd.f32 %v1665_v29, %v1528_v28  ;;  %v1491_v32 = vpop.f32.mrf.mxu0 }
 0x26a   : > { %1827 = vst [vmem:[%s2703_s24 + $0x38] sm:$0xff] %v1795_v30  ;;  %v1628_v33 = vpop.f32.mrf.mxu1 }
 0x26b   : > { %v1715_v34 = vadd.f32 %v2856_v2, %v1666_v31  ;;  %v1629_v35 = vadd.f32 %v1628_v33, %v1491_v32 }
 0x26d   : > { %vm1747_vm15 = vcmp.ge.f32.partialorder %v1715_v34, 0.0  ;;  %v1779_v36 = vmul.f32 0.01, %v1715_v34  ;;  %v1700_v37 = vadd.f32 %v2856_v2, %v1629_v35 }
 0x26f   : > { %v1811_v38 = vsel %vm1747_vm15, %v1715_v34, %v1779_v36  ;;  %vm1732_vm0 = vcmp.ge.f32.partialorder %v1700_v37, 0.0  ;;  %v1764_v39 = vmul.f32 0.01, %v1700_v37  ;;  %v1531_v40 = vpop.f32.mrf.mxu2 }
 0x270   : > { %1843 = vst [vmem:[%s2703_s24 + $0xb8] sm:$0xff] %v1811_v38  ;;  %v1668_v41 = vpop.f32.mrf.mxu3 }
 0x271   : > { %v1796_v42 = vsel %vm1732_vm0, %v1700_v37, %v1764_v39  ;;  %v1669_v43 = vadd.f32 %v1668_v41, %v1531_v40  ;;  %v1493_v44 = vpop.f32.mrf.mxu0 }
 0x272   : > { %1828 = vst [vmem:[%s2703_s24 + $0x40] sm:$0xff] %v1796_v42  ;;  %v1630_v45 = vpop.f32.mrf.mxu1 }
 0x273   : > { %v1716_v46 = vadd.f32 %v2856_v2, %v1669_v43  ;;  %v1631_v47 = vadd.f32 %v1630_v45, %v1493_v44 }
 0x275   : > { %vm1748_vm1 = vcmp.ge.f32.partialorder %v1716_v46, 0.0  ;;  %v1780_v48 = vmul.f32 0.01, %v1716_v46  ;;  %v1701_v49 = vadd.f32 %v2856_v2, %v1631_v47 }
 0x277   : > { %v1812_v50 = vsel %vm1748_vm1, %v1716_v46, %v1780_v48  ;;  %vm1733_vm2 = vcmp.ge.f32.partialorder %v1701_v49, 0.0  ;;  %v1765_v51 = vmul.f32 0.01, %v1701_v49  ;;  %v1533_v52 = vpop.f32.mrf.mxu2 }
 0x278   : > { %1844 = vst [vmem:[%s2703_s24 + $0xc0] sm:$0xff] %v1812_v50  ;;  %v1670_v53 = vpop.f32.mrf.mxu3 }
 0x279   : > { %v1797_v54 = vsel %vm1733_vm2, %v1701_v49, %v1765_v51  ;;  %v1671_v55 = vadd.f32 %v1670_v53, %v1533_v52  ;;  %v1496_v56 = vpop.f32.mrf.mxu0 }
 0x27a   : > { %1829 = vst [vmem:[%s2703_s24 + $0x48] sm:$0xff] %v1797_v54  ;;  %v1633_v57 = vpop.f32.mrf.mxu1 }
 0x27b   : > { %v1717_v58 = vadd.f32 %v2856_v2, %v1671_v55  ;;  %v1634_v59 = vadd.f32 %v1633_v57, %v1496_v56 }
 0x27d   : > { %vm1749_vm3 = vcmp.ge.f32.partialorder %v1717_v58, 0.0  ;;  %v1781_v60 = vmul.f32 0.01, %v1717_v58  ;;  %v1702_v61 = vadd.f32 %v2856_v2, %v1634_v59 }
 0x27f   : > { %v1813_v62 = vsel %vm1749_vm3, %v1717_v58, %v1781_v60  ;;  %vm1734_vm4 = vcmp.ge.f32.partialorder %v1702_v61, 0.0  ;;  %v1766_v63 = vmul.f32 0.01, %v1702_v61  ;;  %v1536_v0 = vpop.f32.mrf.mxu2 }
 0x280   : > { %1845 = vst [vmem:[%s2703_s24 + $0xc8] sm:$0xff] %v1813_v62  ;;  %v1673_v1 = vpop.f32.mrf.mxu3 }
 0x281   : > { %v1798_v3 = vsel %vm1734_vm4, %v1702_v61, %v1766_v63  ;;  %v1674_v4 = vadd.f32 %v1673_v1, %v1536_v0  ;;  %v1498_v5 = vpop.f32.mrf.mxu0 }
 0x282   : > { %1830 = vst [vmem:[%s2703_s24 + $0x50] sm:$0xff] %v1798_v3  ;;  %v1635_v6 = vpop.f32.mrf.mxu1 }
 0x283   : > { %v1718_v7 = vadd.f32 %v2856_v2, %v1674_v4  ;;  %v1636_v8 = vadd.f32 %v1635_v6, %v1498_v5 }
 0x285   : > { %vm1750_vm5 = vcmp.ge.f32.partialorder %v1718_v7, 0.0  ;;  %v1782_v9 = vmul.f32 0.01, %v1718_v7  ;;  %v1703_v10 = vadd.f32 %v2856_v2, %v1636_v8 }
 0x287   : > { %v1814_v11 = vsel %vm1750_vm5, %v1718_v7, %v1782_v9  ;;  %vm1735_vm6 = vcmp.ge.f32.partialorder %v1703_v10, 0.0  ;;  %v1767_v12 = vmul.f32 0.01, %v1703_v10  ;;  %v1538_v13 = vpop.f32.mrf.mxu2 }
 0x288   : > { %1846 = vst [vmem:[%s2703_s24 + $0xd0] sm:$0xff] %v1814_v11  ;;  %v1675_v14 = vpop.f32.mrf.mxu3 }
 0x289   : > { %v1799_v15 = vsel %vm1735_vm6, %v1703_v10, %v1767_v12  ;;  %v1676_v16 = vadd.f32 %v1675_v14, %v1538_v13  ;;  %v1501_v17 = vpop.f32.mrf.mxu0 }
 0x28a   : > { %1831 = vst [vmem:[%s2703_s24 + $0x58] sm:$0xff] %v1799_v15  ;;  %v1638_v18 = vpop.f32.mrf.mxu1 }
 0x28b   : > { %v1719_v19 = vadd.f32 %v2856_v2, %v1676_v16  ;;  %v1639_v20 = vadd.f32 %v1638_v18, %v1501_v17 }
 0x28d   : > { %vm1751_vm7 = vcmp.ge.f32.partialorder %v1719_v19, 0.0  ;;  %v1783_v21 = vmul.f32 0.01, %v1719_v19  ;;  %v1704_v22 = vadd.f32 %v2856_v2, %v1639_v20 }
 0x28f   : > { %v1815_v23 = vsel %vm1751_vm7, %v1719_v19, %v1783_v21  ;;  %vm1736_vm8 = vcmp.ge.f32.partialorder %v1704_v22, 0.0  ;;  %v1768_v24 = vmul.f32 0.01, %v1704_v22  ;;  %v1541_v25 = vpop.f32.mrf.mxu2 }
 0x290   : > { %1847 = vst [vmem:[%s2703_s24 + $0xd8] sm:$0xff] %v1815_v23  ;;  %v1678_v26 = vpop.f32.mrf.mxu3 }
 0x291   : > { %v1800_v27 = vsel %vm1736_vm8, %v1704_v22, %v1768_v24  ;;  %v1679_v28 = vadd.f32 %v1678_v26, %v1541_v25  ;;  %v1503_v29 = vpop.f32.mrf.mxu0 }
 0x292   : > { %1832 = vst [vmem:[%s2703_s24 + $0x60] sm:$0xff] %v1800_v27  ;;  %v1640_v30 = vpop.f32.mrf.mxu1 }
 0x293   : > { %v1720_v31 = vadd.f32 %v2856_v2, %v1679_v28  ;;  %v1641_v32 = vadd.f32 %v1640_v30, %v1503_v29 }
 0x295   : > { %vm1752_vm9 = vcmp.ge.f32.partialorder %v1720_v31, 0.0  ;;  %v1784_v33 = vmul.f32 0.01, %v1720_v31  ;;  %v1705_v34 = vadd.f32 %v2856_v2, %v1641_v32 }
 0x297   : > { %v1816_v35 = vsel %vm1752_vm9, %v1720_v31, %v1784_v33  ;;  %vm1737_vm10 = vcmp.ge.f32.partialorder %v1705_v34, 0.0  ;;  %v1769_v36 = vmul.f32 0.01, %v1705_v34  ;;  %v1543_v37 = vpop.f32.mrf.mxu2 }
 0x298   : > { %1848 = vst [vmem:[%s2703_s24 + $0xe0] sm:$0xff] %v1816_v35  ;;  %v1680_v38 = vpop.f32.mrf.mxu3 }
 0x299   : > { %v1801_v39 = vsel %vm1737_vm10, %v1705_v34, %v1769_v36  ;;  %v1681_v40 = vadd.f32 %v1680_v38, %v1543_v37  ;;  %v1506_v41 = vpop.f32.mrf.mxu0 }
 0x29a   : > { %1833 = vst [vmem:[%s2703_s24 + $0x68] sm:$0xff] %v1801_v39  ;;  %v1643_v42 = vpop.f32.mrf.mxu1 }
 0x29b   : > { %v1721_v43 = vadd.f32 %v2856_v2, %v1681_v40  ;;  %v1644_v44 = vadd.f32 %v1643_v42, %v1506_v41 }
 0x29d   : > { %vm1753_vm11 = vcmp.ge.f32.partialorder %v1721_v43, 0.0  ;;  %v1785_v45 = vmul.f32 0.01, %v1721_v43  ;;  %v1706_v46 = vadd.f32 %v2856_v2, %v1644_v44 }
 0x29f   : > { %v1817_v47 = vsel %vm1753_vm11, %v1721_v43, %v1785_v45  ;;  %vm1738_vm12 = vcmp.ge.f32.partialorder %v1706_v46, 0.0  ;;  %v1770_v48 = vmul.f32 0.01, %v1706_v46  ;;  %v1546_v49 = vpop.f32.mrf.mxu2 }
 0x2a0   : > { %1849 = vst [vmem:[%s2703_s24 + $0xe8] sm:$0xff] %v1817_v47  ;;  %v1683_v50 = vpop.f32.mrf.mxu3 }
 0x2a1   : > { %v1802_v51 = vsel %vm1738_vm12, %v1706_v46, %v1770_v48  ;;  %v1684_v52 = vadd.f32 %v1683_v50, %v1546_v49  ;;  %v1508_v53 = vpop.f32.mrf.mxu0 }
 0x2a2   : > { %1834 = vst [vmem:[%s2703_s24 + $0x70] sm:$0xff] %v1802_v51  ;;  %v1645_v54 = vpop.f32.mrf.mxu1 }
 0x2a3   : > { %v1722_v55 = vadd.f32 %v2856_v2, %v1684_v52  ;;  %v1646_v56 = vadd.f32 %v1645_v54, %v1508_v53 }
 0x2a5   : > { %vm1754_vm13 = vcmp.ge.f32.partialorder %v1722_v55, 0.0  ;;  %v1786_v57 = vmul.f32 0.01, %v1722_v55  ;;  %v1707_v58 = vadd.f32 %v2856_v2, %v1646_v56 }
 0x2a7   : > { %v1818_v59 = vsel %vm1754_vm13, %v1722_v55, %v1786_v57  ;;  %vm1739_vm14 = vcmp.ge.f32.partialorder %v1707_v58, 0.0  ;;  %v1771_v60 = vmul.f32 0.01, %v1707_v58  ;;  %v1548_v61 = vpop.f32.mrf.mxu2 }
 0x2a8   : > { %1850 = vst [vmem:[%s2703_s24 + $0xf0] sm:$0xff] %v1818_v59  ;;  %v1685_v62 = vpop.f32.mrf.mxu3 }
 0x2a9   : > { %v1803_v63 = vsel %vm1739_vm14, %v1707_v58, %v1771_v60  ;;  %v1686_v0 = vadd.f32 %v1685_v62, %v1548_v61 }
 0x2aa   : > { %1835 = vst [vmem:[%s2703_s24 + $0x78] sm:$0xff] %v1803_v63 }
 0x2ab   : > { %v1723_v1 = vadd.f32 %v2856_v2, %v1686_v0 }
 0x2ad   : > { %vm1755_vm15 = vcmp.ge.f32.partialorder %v1723_v1, 0.0  ;;  %v1787_v3 = vmul.f32 0.01, %v1723_v1 }
 0x2af   : > { %v1819_v4 = vsel %vm1755_vm15, %v1723_v1, %v1787_v3 }
 0x2b0   : > { %1851 = vst [vmem:[%s2703_s24 + $0xf8] sm:$0xff] %v1819_v4 }
 0x2b1 PF: > { %s16_s27 = sadd.s32 1, %s2519_s27   ;;  %s2950_s21 = smov %s2499_s22 }
 0x2b2   : > { %p13_p0 = scmp.ge.s32.totalorder %s16_s27, 6   ;;  %s2951_s22 = smov %s2608_s10 }
 0x2b3   : > { %s2952_s23 = smov %s2511_s25  ;;  %s2953_s24 = smov %s2515_s26 }
 0x2b4   : > { %s2954_s25 = smov %s2957_s28  ;;  %s2955_s26 = smov %s2961_s29 }
 0x2b5   :  { %15 = sbr.rel (!%p13_p0) target bundleno = 4 (0x4), region = 131 }

</bundles_post_ra>
